<compile_context>
chip_gen: v7x
topology: tpu7x:2x2x1
jax: 0.10.0
libtpu: 0.0.40
codegen_flags: <defaults>
</compile_context>

<pallas_src>
import jax
import jax.numpy as jnp
from jax import lax
from jax.experimental import pallas as pl
from jax.experimental.pallas import tpu as pltpu

BN_EPS = 1e-5
_LANES = 128
_VMEM_LIMIT = 32 * 1024 * 1024   # safe on v5e/v6e/v7x; the blocks below use far less


# ---------------------------------------------------------------------------
# In-kernel Mish: x * tanh(softplus(x)) = x * (t^2 + 2t) / (t^2 + 2t + 2), t = exp(x)
# One EUP exp + one approx reciprocal; x > 20 follows PyTorch's softplus threshold.
# ---------------------------------------------------------------------------
def _mish_fast(x):
    t = jnp.exp(jnp.minimum(x, 20.0))
    num = t * (t + 2.0)
    y = x * num * pl.reciprocal(num + 2.0, approx=True)
    return jnp.where(x > 20.0, x, y)


# ---------------------------------------------------------------------------
# Kernel 1: K-folded 3x3 conv (+ bias) + per-tile BN partial sums.
#   patches (TM, 9*Cin) bf16  @  weights (9*Cin, Cp) bf16  -> fp32
#   stats block rows: row0 = per-tile sum(y), row1 = per-tile sum(y*y)
# ---------------------------------------------------------------------------
def conv_stats_kernel(p_ref, w_ref, b_ref, y_ref, stats_ref):
    y = jnp.dot(p_ref[...], w_ref[...], preferred_element_type=jnp.float32)
    y = y + b_ref[...]                       # conv bias (fp32 epilogue)
    y_ref[...] = y
    s = jnp.sum(y, axis=0, keepdims=True)            # (1, Cp)
    q = jnp.sum(y * y, axis=0, keepdims=True)        # (1, Cp)
    row = lax.broadcasted_iota(jnp.int32, (8, y.shape[1]), 0)
    stats_ref[0] = jnp.where(row == 0, s, jnp.where(row == 1, q, 0.0))


def _conv_bias_stats(patches, w, b, tm):
    M, K = patches.shape
    Cp = w.shape[1]
    nt = M // tm
    return pl.pallas_call(
        conv_stats_kernel,
        out_shape=(jax.ShapeDtypeStruct((M, Cp), jnp.float32),
                   jax.ShapeDtypeStruct((nt, 8, Cp), jnp.float32)),
        grid_spec=pltpu.PrefetchScalarGridSpec(
            num_scalar_prefetch=0,
            grid=(nt,),
            in_specs=[
                pl.BlockSpec((tm, K), lambda i: (i, 0)),      # patch row tile
                pl.BlockSpec((K, Cp), lambda i: (0, 0)),      # folded weights
                pl.BlockSpec((1, Cp), lambda i: (0, 0)),      # bias
            ],
            out_specs=[
                pl.BlockSpec((tm, Cp), lambda i: (i, 0)),     # conv output tile
                pl.BlockSpec((1, 8, Cp), lambda i: (i, 0, 0)),  # per-tile BN stats
            ],
        ),
        compiler_params=pltpu.CompilerParams(
            dimension_semantics=("parallel",),
            vmem_limit_bytes=_VMEM_LIMIT),
    )(patches, w, b)


# ---------------------------------------------------------------------------
# Epilogue kernels: BN affine (+ optional residual) + Mish, all math in fp32.
# ---------------------------------------------------------------------------
def bn_mish_kernel(y_ref, sc_ref, sh_ref, out_ref):
    y = y_ref[...] * sc_ref[...] + sh_ref[...]
    out_ref[...] = _mish_fast(y).astype(out_ref.dtype)


def bn_res1x1_mish_kernel(y_ref, sc_ref, sh_ref, x_ref, wr_ref, br_ref, out_ref):
    # 1x1 residual conv fused into the epilogue (tiny K = Cin matmul).
    y = y_ref[...] * sc_ref[...] + sh_ref[...]
    r = jnp.dot(x_ref[...], wr_ref[...], preferred_element_type=jnp.float32) + br_ref[...]
    out_ref[...] = _mish_fast(y + r).astype(out_ref.dtype)


def bn_resadd_mish_kernel(y_ref, sc_ref, sh_ref, r_ref, out_ref):
    # identity residual (in_channels == out_channels)
    y = y_ref[...] * sc_ref[...] + sh_ref[...] + r_ref[...]
    out_ref[...] = _mish_fast(y).astype(out_ref.dtype)


def _tile_spec(tm, c):
    return pl.BlockSpec((tm, c), lambda i: (i, 0))


def _bcast_spec(c):
    return pl.BlockSpec((1, c), lambda i: (0, 0))


def _full_spec(r, c):
    return pl.BlockSpec((r, c), lambda i: (0, 0))


def _run_tiled(kernel, args, in_specs, tm, M, Cp, out_dtype):
    nt = M // tm
    return pl.pallas_call(
        kernel,
        out_shape=jax.ShapeDtypeStruct((M, Cp), out_dtype),
        grid_spec=pltpu.PrefetchScalarGridSpec(
            num_scalar_prefetch=0,
            grid=(nt,),
            in_specs=in_specs,
            out_specs=pl.BlockSpec((tm, Cp), lambda i: (i, 0)),
        ),
        compiler_params=pltpu.CompilerParams(
            dimension_semantics=("parallel",),
            vmem_limit_bytes=_VMEM_LIMIT),
    )(*args)


# ---------------------------------------------------------------------------
# Layout plumbing (JAX wrapper): K-folded im2col, weight folding, padding helpers.
# ---------------------------------------------------------------------------
def _im2col_kfold(x_nhwc):
    # (N, H, W, C) -> (N*H*W, 9*C), tap order t = dy*3 + dx folded into channels.
    N, H, W, C = x_nhwc.shape
    xp = jnp.pad(x_nhwc, ((0, 0), (1, 1), (1, 1), (0, 0)))
    taps = [xp[:, dy:dy + H, dx:dx + W, :] for dy in range(3) for dx in range(3)]
    return jnp.concatenate(taps, axis=-1).reshape(N * H * W, 9 * C)


def _fold_weight_3x3(w_oihw):
    # (Cout, Cin, 3, 3) -> (9*Cin, Cout), rows ordered as tap t = dy*3 + dx.
    return jnp.concatenate([w_oihw[:, :, dy, dx].T
                            for dy in range(3) for dx in range(3)], axis=0)


def _pad_last(a, cp):
    pad = cp - a.shape[-1]
    if pad == 0:
        return a
    widths = [(0, 0)] * (a.ndim - 1) + [(0, pad)]
    return jnp.pad(a, widths)


def _pick_tile(m):
    # biggest row tile (multiple of 8) that divides M and leaves >= 2 grid steps
    for tm in (1024, 512, 256, 128, 64, 32, 16, 8):
        if m % tm == 0 and m // tm >= 2:
            return tm
    return m


def _bn_scale_shift(stats, gamma, beta, m, cp):
    # Reduce per-tile partial sums -> training-mode batch stats -> affine (scale, shift).
    s = jnp.sum(stats[:, 0, :], axis=0)                 # (Cp,)
    q = jnp.sum(stats[:, 1, :], axis=0)                 # (Cp,)
    mean = s / m
    var = jnp.maximum(q / m - mean * mean, 0.0)         # biased variance
    inv = lax.rsqrt(var + BN_EPS)
    g = _pad_last(gamma.reshape(1, -1), cp)
    b = _pad_last(beta.reshape(1, -1), cp)
    scale = g * inv.reshape(1, cp)
    shift = b - mean.reshape(1, cp) * scale
    return scale.astype(jnp.float32), shift.astype(jnp.float32)


def resnet_forward(x_nchw, p):
    N, Cin, H, W = x_nchw.shape
    Cout = p["w1"].shape[0]
    M = N * H * W
    Cp = max(_LANES, -(-Cout // _LANES) * _LANES)       # channels padded to 128 lanes
    tm = _pick_tile(M)

    x_nhwc = jnp.transpose(x_nchw, (0, 2, 3, 1)).astype(jnp.float32)
    x_flat = x_nhwc.reshape(M, Cin)

    # ---- block1: conv3x3 + bias, per-tile BN stats -------------------------------
    # TODO(synk): the K-folded im2col is still materialized by XLA; forming the 9 taps
    # in-kernel from the padded NHWC activation (halo-window DMA) would remove the
    # remaining activation read amplification.
    patches1 = _im2col_kfold(x_nhwc.astype(jnp.bfloat16))                 # (M, 9*Cin)
    w1 = _pad_last(_fold_weight_3x3(p["w1"]), Cp).astype(jnp.bfloat16)    # (9*Cin, Cp)
    b1 = _pad_last(p["b1"].reshape(1, -1), Cp)
    y1, st1 = _conv_bias_stats(patches1, w1, b1, tm)
    scale1, shift1 = _bn_scale_shift(st1, p["g1"], p["beta1"], M, Cp)

    # BN + Mish (no residual for block1); bf16 output feeds the next conv's MXU.
    h1 = _run_tiled(bn_mish_kernel, (y1, scale1, shift1),
                    [_tile_spec(tm, Cp), _bcast_spec(Cp), _bcast_spec(Cp)],
                    tm, M, Cp, jnp.bfloat16)

    # ---- block2: conv3x3 + bias, per-tile BN stats -------------------------------
    h1_nhwc = h1[:, :Cout].reshape(N, H, W, Cout)
    patches2 = _im2col_kfold(h1_nhwc)                                     # (M, 9*Cout)
    w2 = _pad_last(_fold_weight_3x3(p["w2"]), Cp).astype(jnp.bfloat16)
    b2 = _pad_last(p["b2"].reshape(1, -1), Cp)
    y2, st2 = _conv_bias_stats(patches2, w2, b2, tm)
    scale2, shift2 = _bn_scale_shift(st2, p["g2"], p["beta2"], M, Cp)

    # ---- BN + residual + Mish epilogue (1x1 res conv fused, fp32 math) -----------
    if Cin != Cout:
        wr = _pad_last(p["w_res"][:, :, 0, 0].T, Cp).astype(jnp.float32)  # (Cin, Cp)
        br = _pad_last(p["b_res"].reshape(1, -1), Cp)
        out = _run_tiled(bn_res1x1_mish_kernel,
                         (y2, scale2, shift2, x_flat, wr, br),
                         [_tile_spec(tm, Cp), _bcast_spec(Cp), _bcast_spec(Cp),
                          _tile_spec(tm, Cin), _full_spec(Cin, Cp), _bcast_spec(Cp)],
                         tm, M, Cp, jnp.float32)
    else:
        res = _pad_last(x_flat, Cp)
        out = _run_tiled(bn_resadd_mish_kernel,
                         (y2, scale2, shift2, res),
                         [_tile_spec(tm, Cp), _bcast_spec(Cp), _bcast_spec(Cp),
                          _tile_spec(tm, Cp)],
                         tm, M, Cp, jnp.float32)

    out = out[:, :Cout].reshape(N, H, W, Cout)
    return jnp.transpose(out, (0, 3, 1, 2))              # back to NCHW


# ---------------------------------------------------------------------------
# Pure-JAX fp32 reference (lax.conv) for the correctness check.
# ---------------------------------------------------------------------------
def _mish_ref(x):
    sp = jnp.where(x > 20.0, x, jnp.log1p(jnp.exp(jnp.minimum(x, 20.0))))
    return x * jnp.tanh(sp)


def ref_forward(x, p):
    def conv(x, w, b):
        y = lax.conv_general_dilated(
            x, w, (1, 1), "SAME",
            dimension_numbers=("NCHW", "OIHW", "NCHW"))
        return y + b[None, :, None, None]

    def bn(y, g, bt):
        mean = jnp.mean(y, axis=(0, 2, 3), keepdims=True)
        var = jnp.mean((y - mean) ** 2, axis=(0, 2, 3), keepdims=True)
        return ((y - mean) * lax.rsqrt(var + BN_EPS)
                * g[None, :, None, None] + bt[None, :, None, None])

    h = _mish_ref(bn(conv(x, p["w1"], p["b1"]), p["g1"], p["beta1"]))
    h = bn(conv(h, p["w2"], p["b2"]), p["g2"], p["beta2"])
    if p["w1"].shape[1] != p["w1"].shape[0]:
        r = conv(x, p["w_res"], p["b_res"])
    else:
        r = x
    return _mish_ref(h + r)


if __name__ == "__main__":
    key = jax.random.PRNGKey(0)
    ks = jax.random.split(key, 12)
    N, Cin, Cout, H, W = 2, 4, 8, 16, 16

    params = {
        "w1":   0.2 * jax.random.normal(ks[0], (Cout, Cin, 3, 3), jnp.float32),
        "b1":   0.1 * jax.random.normal(ks[1], (Cout,), jnp.float32),
        "g1":   1.0 + 0.1 * jax.random.normal(ks[2], (Cout,), jnp.float32),
        "beta1": 0.1 * jax.random.normal(ks[3], (Cout,), jnp.float32),
        "w2":   0.2 * jax.random.normal(ks[4], (Cout, Cout, 3, 3), jnp.float32),
        "b2":   0.1 * jax.random.normal(ks[5], (Cout,), jnp.float32),
        "g2":   1.0 + 0.1 * jax.random.normal(ks[6], (Cout,), jnp.float32),
        "beta2": 0.1 * jax.random.normal(ks[7], (Cout,), jnp.float32),
        "w_res": 0.2 * jax.random.normal(ks[8], (Cout, Cin, 1, 1), jnp.float32),
        "b_res": 0.1 * jax.random.normal(ks[9], (Cout,), jnp.float32),
    }
    x = jax.random.normal(ks[10], (N, Cin, H, W), jnp.float32)

    fwd = jax.jit(resnet_forward)
    out = jax.block_until_ready(fwd(x, params))
    ref = jax.block_until_ready(ref_forward(x, params))

    assert out.shape == (N, Cout, H, W), out.shape
    # Matmul inputs are bf16 (per perf review, fp32 accumulate + fp32 BN/Mish epilogue);
    # the tolerance vs the fp32 reference covers bf16 input rounding only. Structural
    # bugs (wrong taps / BN / residual) would produce O(1) errors.
    max_err = float(jnp.max(jnp.abs(out - ref)))
    assert jnp.allclose(out, ref, atol=5e-2, rtol=5e-2), max_err

    # TODO(synk): BatchNorm running-stat buffer updates (training-mode side effect)
    # are not materialized; they do not affect this forward output.
    print("KERNEL_OK")
</pallas_src>

<mosaic_0001>
module attributes {stable_mosaic.version = 11 : i64} {
  func.func @conv_stats_kernel(%arg0: i32, %arg1: memref<256x36xbf16, #tpu.memory_space<vmem>>, %arg2: memref<36x128xbf16, #tpu.memory_space<vmem>>, %arg3: memref<1x128xf32, #tpu.memory_space<vmem>>, %arg4: memref<256x128xf32, #tpu.memory_space<vmem>>, %arg5: memref<1x8x128xf32, #tpu.memory_space<vmem>>) attributes {dimension_semantics = [#tpu.dimension_semantics<parallel>], iteration_bounds = array<i64: 2>, scalar_prefetch = 0 : i64, scratch_operands = 0 : i64, tpu.core_type = #tpu.core_type<tc>, window_params = [{transform_indices = @transform_0, window_bounds = array<i64: 256, 36>}, {pipeline_mode = #tpu.pipeline_mode<synchronous>, transform_indices = @transform_1, window_bounds = array<i64: 36, 128>}, {pipeline_mode = #tpu.pipeline_mode<synchronous>, transform_indices = @transform_2, window_bounds = array<i64: 1, 128>}, {transform_indices = @transform_3, window_bounds = array<i64: 256, 128>}, {transform_indices = @transform_4, window_bounds = array<i64: 1, 8, 128>}]} {
    %c0 = arith.constant 0 : index
    %c0_0 = arith.constant 0 : index
    %0 = vector.load %arg1[%c0, %c0_0] : memref<256x36xbf16, #tpu.memory_space<vmem>>, vector<256x36xbf16>
    %c0_1 = arith.constant 0 : index
    %c0_2 = arith.constant 0 : index
    %1 = vector.load %arg2[%c0_1, %c0_2] : memref<36x128xbf16, #tpu.memory_space<vmem>>, vector<36x128xbf16>
    %cst = arith.constant dense<0.000000e+00> : vector<256x128xf32>
    %2 = tpu.matmul %0, %1, %cst {dimension_numbers = #tpu.dot_dimension_numbers<[1], [0], [0], [1], [0, 0, 1, 1], [], []>} : vector<256x36xbf16>, vector<36x128xbf16>, vector<256x128xf32> -> vector<256x128xf32>
    %c0_3 = arith.constant 0 : index
    %c0_4 = arith.constant 0 : index
    %3 = vector.load %arg3[%c0_3, %c0_4] : memref<1x128xf32, #tpu.memory_space<vmem>>, vector<1x128xf32>
    %4 = vector.broadcast %3 : vector<1x128xf32> to vector<256x128xf32>
    %5 = arith.addf %2, %4 : vector<256x128xf32>
    %c0_5 = arith.constant 0 : index
    %c0_6 = arith.constant 0 : index
    %6 = vector.load %arg4[%c0_5, %c0_6] : memref<256x128xf32, #tpu.memory_space<vmem>>, vector<256x128xf32>
    tpu.vector_store %arg4[%c0_5, %c0_6], %5 {strides = array<i32>} : memref<256x128xf32, #tpu.memory_space<vmem>>, vector<256x128xf32>,
    %cst_7 = arith.constant dense<0.000000e+00> : vector<128xf32>
    %7 = vector.multi_reduction <add>, %5, %cst_7 [0] : vector<256x128xf32> to vector<128xf32>
    %8 = vector.shape_cast %7 : vector<128xf32> to vector<1x128xf32>
    %9 = arith.mulf %5, %5 : vector<256x128xf32>
    %cst_8 = arith.constant dense<0.000000e+00> : vector<128xf32>
    %10 = vector.multi_reduction <add>, %9, %cst_8 [0] : vector<256x128xf32> to vector<128xf32>
    %11 = vector.shape_cast %10 : vector<128xf32> to vector<1x128xf32>
    %12 = tpu.iota {dimensions = array<i32: 0>} : vector<8x128xi32>
    %c0_i32 = arith.constant 0 : i32
    %13 = vector.broadcast %c0_i32 : i32 to vector<8x128xi32>
    %14 = arith.cmpi eq, %12, %13 : vector<8x128xi32>
    %c1_i32 = arith.constant 1 : i32
    %15 = vector.broadcast %c1_i32 : i32 to vector<8x128xi32>
    %16 = arith.cmpi eq, %12, %15 : vector<8x128xi32>
    %cst_9 = arith.constant 0.000000e+00 : f32
    %17 = vector.shape_cast %11 : vector<1x128xf32> to vector<1x128xf32>
    %18 = vector.broadcast %17 : vector<1x128xf32> to vector<8x128xf32>
    %19 = vector.broadcast %cst_9 : f32 to vector<8x128xf32>
    %20 = arith.select %16, %18, %19 : vector<8x128xi1>, vector<8x128xf32>
    %21 = vector.shape_cast %8 : vector<1x128xf32> to vector<1x128xf32>
    %22 = vector.broadcast %21 : vector<1x128xf32> to vector<8x128xf32>
    %23 = arith.select %14, %22, %20 : vector<8x128xi1>, vector<8x128xf32>
    %c0_10 = arith.constant 0 : index
    %c0_11 = arith.constant 0 : index
    %c0_12 = arith.constant 0 : index
    %24 = vector.load %arg5[%c0_10, %c0_11, %c0_12] : memref<1x8x128xf32, #tpu.memory_space<vmem>>, vector<1x8x128xf32>
    %25 = vector.shape_cast %24 : vector<1x8x128xf32> to vector<8x128xf32>
    %26 = vector.shape_cast %23 : vector<8x128xf32> to vector<1x8x128xf32>
    tpu.vector_store %arg5[%c0_10, %c0_11, %c0_12], %26 {strides = array<i32>} : memref<1x8x128xf32, #tpu.memory_space<vmem>>, vector<1x8x128xf32>,
    return
  }
  func.func @transform_0(%arg0: i32) -> (i32, i32) {
    %c0_i32 = arith.constant 0 : i32
    %c0_i32_0 = arith.constant 0 : i32
    return %arg0, %c0_i32 : i32, i32
  }
  func.func @transform_1(%arg0: i32) -> (i32, i32) {
    %c0_i32 = arith.constant 0 : i32
    %c0_i32_0 = arith.constant 0 : i32
    %c0_i32_1 = arith.constant 0 : i32
    return %c0_i32, %c0_i32_0 : i32, i32
  }
  func.func @transform_2(%arg0: i32) -> (i32, i32) {
    %c0_i32 = arith.constant 0 : i32
    %c0_i32_0 = arith.constant 0 : i32
    %c0_i32_1 = arith.constant 0 : i32
    return %c0_i32, %c0_i32_0 : i32, i32
  }
  func.func @transform_3(%arg0: i32) -> (i32, i32) {
    %c0_i32 = arith.constant 0 : i32
    %c0_i32_0 = arith.constant 0 : i32
    return %arg0, %c0_i32 : i32, i32
  }
  func.func @transform_4(%arg0: i32) -> (i32, i32, i32) {
    %c0_i32 = arith.constant 0 : i32
    %c0_i32_0 = arith.constant 0 : i32
    %c0_i32_1 = arith.constant 0 : i32
    return %arg0, %c0_i32, %c0_i32_0 : i32, i32, i32
  }
}

module attributes {stable_mosaic.version = 11 : i64} {
  func.func @bn_mish_kernel(%arg0: i32, %arg1: memref<256x128xf32, #tpu.memory_space<vmem>>, %arg2: memref<1x128xf32, #tpu.memory_space<vmem>>, %arg3: memref<1x128xf32, #tpu.memory_space<vmem>>, %arg4: memref<256x128xbf16, #tpu.memory_space<vmem>>) attributes {dimension_semantics = [#tpu.dimension_semantics<parallel>], iteration_bounds = array<i64: 2>, scalar_prefetch = 0 : i64, scratch_operands = 0 : i64, tpu.core_type = #tpu.core_type<tc>, window_params = [{transform_indices = @transform_0, window_bounds = array<i64: 256, 128>}, {pipeline_mode = #tpu.pipeline_mode<synchronous>, transform_indices = @transform_1, window_bounds = array<i64: 1, 128>}, {pipeline_mode = #tpu.pipeline_mode<synchronous>, transform_indices = @transform_2, window_bounds = array<i64: 1, 128>}, {transform_indices = @transform_3, window_bounds = array<i64: 256, 128>}]} {
    %c0 = arith.constant 0 : index
    %c0_0 = arith.constant 0 : index
    %0 = vector.load %arg1[%c0, %c0_0] : memref<256x128xf32, #tpu.memory_space<vmem>>, vector<256x128xf32>
    %c0_1 = arith.constant 0 : index
    %c0_2 = arith.constant 0 : index
    %1 = vector.load %arg2[%c0_1, %c0_2] : memref<1x128xf32, #tpu.memory_space<vmem>>, vector<1x128xf32>
    %2 = vector.broadcast %1 : vector<1x128xf32> to vector<256x128xf32>
    %3 = arith.mulf %0, %2 : vector<256x128xf32>
    %c0_3 = arith.constant 0 : index
    %c0_4 = arith.constant 0 : index
    %4 = vector.load %arg3[%c0_3, %c0_4] : memref<1x128xf32, #tpu.memory_space<vmem>>, vector<1x128xf32>
    %5 = vector.broadcast %4 : vector<1x128xf32> to vector<256x128xf32>
    %6 = arith.addf %3, %5 : vector<256x128xf32>
    %cst = arith.constant 2.000000e+01 : f32
    %7 = vector.broadcast %cst : f32 to vector<256x128xf32>
    %8 = arith.minimumf %6, %7 : vector<256x128xf32>
    %9 = math.exp %8 : vector<256x128xf32>
    %cst_5 = arith.constant 2.000000e+00 : f32
    %10 = vector.broadcast %cst_5 : f32 to vector<256x128xf32>
    %11 = arith.addf %9, %10 : vector<256x128xf32>
    %12 = arith.mulf %9, %11 : vector<256x128xf32>
    %13 = arith.mulf %6, %12 : vector<256x128xf32>
    %cst_6 = arith.constant 2.000000e+00 : f32
    %14 = vector.broadcast %cst_6 : f32 to vector<256x128xf32>
    %15 = arith.addf %12, %14 : vector<256x128xf32>
    %16 = tpu.reciprocal %15 {approx = true} : vector<256x128xf32> -> vector<256x128xf32>
    %17 = arith.mulf %13, %16 : vector<256x128xf32>
    %cst_7 = arith.constant 2.000000e+01 : f32
    %18 = vector.broadcast %cst_7 : f32 to vector<256x128xf32>
    %19 = arith.cmpf ogt, %6, %18 : vector<256x128xf32>
    %20 = arith.select %19, %6, %17 : vector<256x128xi1>, vector<256x128xf32>
    %21 = arith.truncf %20 : vector<256x128xf32> to vector<256x128xbf16>
    %c0_8 = arith.constant 0 : index
    %c0_9 = arith.constant 0 : index
    %22 = vector.load %arg4[%c0_8, %c0_9] : memref<256x128xbf16, #tpu.memory_space<vmem>>, vector<256x128xbf16>
    tpu.vector_store %arg4[%c0_8, %c0_9], %21 {strides = array<i32>} : memref<256x128xbf16, #tpu.memory_space<vmem>>, vector<256x128xbf16>,
    return
  }
  func.func @transform_0(%arg0: i32) -> (i32, i32) {
    %c0_i32 = arith.constant 0 : i32
    %c0_i32_0 = arith.constant 0 : i32
    return %arg0, %c0_i32 : i32, i32
  }
  func.func @transform_1(%arg0: i32) -> (i32, i32) {
    %c0_i32 = arith.constant 0 : i32
    %c0_i32_0 = arith.constant 0 : i32
    %c0_i32_1 = arith.constant 0 : i32
    return %c0_i32, %c0_i32_0 : i32, i32
  }
  func.func @transform_2(%arg0: i32) -> (i32, i32) {
    %c0_i32 = arith.constant 0 : i32
    %c0_i32_0 = arith.constant 0 : i32
    %c0_i32_1 = arith.constant 0 : i32
    return %c0_i32, %c0_i32_0 : i32, i32
  }
  func.func @transform_3(%arg0: i32) -> (i32, i32) {
    %c0_i32 = arith.constant 0 : i32
    %c0_i32_0 = arith.constant 0 : i32
    return %arg0, %c0_i32 : i32, i32
  }
}

module attributes {stable_mosaic.version = 11 : i64} {
  func.func @conv_stats_kernel(%arg0: i32, %arg1: memref<256x72xbf16, #tpu.memory_space<vmem>>, %arg2: memref<72x128xbf16, #tpu.memory_space<vmem>>, %arg3: memref<1x128xf32, #tpu.memory_space<vmem>>, %arg4: memref<256x128xf32, #tpu.memory_space<vmem>>, %arg5: memref<1x8x128xf32, #tpu.memory_space<vmem>>) attributes {dimension_semantics = [#tpu.dimension_semantics<parallel>], iteration_bounds = array<i64: 2>, scalar_prefetch = 0 : i64, scratch_operands = 0 : i64, tpu.core_type = #tpu.core_type<tc>, window_params = [{transform_indices = @transform_0, window_bounds = array<i64: 256, 72>}, {pipeline_mode = #tpu.pipeline_mode<synchronous>, transform_indices = @transform_1, window_bounds = array<i64: 72, 128>}, {pipeline_mode = #tpu.pipeline_mode<synchronous>, transform_indices = @transform_2, window_bounds = array<i64: 1, 128>}, {transform_indices = @transform_3, window_bounds = array<i64: 256, 128>}, {transform_indices = @transform_4, window_bounds = array<i64: 1, 8, 128>}]} {
    %c0 = arith.constant 0 : index
    %c0_0 = arith.constant 0 : index
    %0 = vector.load %arg1[%c0, %c0_0] : memref<256x72xbf16, #tpu.memory_space<vmem>>, vector<256x72xbf16>
    %c0_1 = arith.constant 0 : index
    %c0_2 = arith.constant 0 : index
    %1 = vector.load %arg2[%c0_1, %c0_2] : memref<72x128xbf16, #tpu.memory_space<vmem>>, vector<72x128xbf16>
    %cst = arith.constant dense<0.000000e+00> : vector<256x128xf32>
    %2 = tpu.matmul %0, %1, %cst {dimension_numbers = #tpu.dot_dimension_numbers<[1], [0], [0], [1], [0, 0, 1, 1], [], []>} : vector<256x72xbf16>, vector<72x128xbf16>, vector<256x128xf32> -> vector<256x128xf32>
    %c0_3 = arith.constant 0 : index
    %c0_4 = arith.constant 0 : index
    %3 = vector.load %arg3[%c0_3, %c0_4] : memref<1x128xf32, #tpu.memory_space<vmem>>, vector<1x128xf32>
    %4 = vector.broadcast %3 : vector<1x128xf32> to vector<256x128xf32>
    %5 = arith.addf %2, %4 : vector<256x128xf32>
    %c0_5 = arith.constant 0 : index
    %c0_6 = arith.constant 0 : index
    %6 = vector.load %arg4[%c0_5, %c0_6] : memref<256x128xf32, #tpu.memory_space<vmem>>, vector<256x128xf32>
    tpu.vector_store %arg4[%c0_5, %c0_6], %5 {strides = array<i32>} : memref<256x128xf32, #tpu.memory_space<vmem>>, vector<256x128xf32>,
    %cst_7 = arith.constant dense<0.000000e+00> : vector<128xf32>
    %7 = vector.multi_reduction <add>, %5, %cst_7 [0] : vector<256x128xf32> to vector<128xf32>
    %8 = vector.shape_cast %7 : vector<128xf32> to vector<1x128xf32>
    %9 = arith.mulf %5, %5 : vector<256x128xf32>
    %cst_8 = arith.constant dense<0.000000e+00> : vector<128xf32>
    %10 = vector.multi_reduction <add>, %9, %cst_8 [0] : vector<256x128xf32> to vector<128xf32>
    %11 = vector.shape_cast %10 : vector<128xf32> to vector<1x128xf32>
    %12 = tpu.iota {dimensions = array<i32: 0>} : vector<8x128xi32>
    %c0_i32 = arith.constant 0 : i32
    %13 = vector.broadcast %c0_i32 : i32 to vector<8x128xi32>
    %14 = arith.cmpi eq, %12, %13 : vector<8x128xi32>
    %c1_i32 = arith.constant 1 : i32
    %15 = vector.broadcast %c1_i32 : i32 to vector<8x128xi32>
    %16 = arith.cmpi eq, %12, %15 : vector<8x128xi32>
    %cst_9 = arith.constant 0.000000e+00 : f32
    %17 = vector.shape_cast %11 : vector<1x128xf32> to vector<1x128xf32>
    %18 = vector.broadcast %17 : vector<1x128xf32> to vector<8x128xf32>
    %19 = vector.broadcast %cst_9 : f32 to vector<8x128xf32>
    %20 = arith.select %16, %18, %19 : vector<8x128xi1>, vector<8x128xf32>
    %21 = vector.shape_cast %8 : vector<1x128xf32> to vector<1x128xf32>
    %22 = vector.broadcast %21 : vector<1x128xf32> to vector<8x128xf32>
    %23 = arith.select %14, %22, %20 : vector<8x128xi1>, vector<8x128xf32>
    %c0_10 = arith.constant 0 : index
    %c0_11 = arith.constant 0 : index
    %c0_12 = arith.constant 0 : index
    %24 = vector.load %arg5[%c0_10, %c0_11, %c0_12] : memref<1x8x128xf32, #tpu.memory_space<vmem>>, vector<1x8x128xf32>
    %25 = vector.shape_cast %24 : vector<1x8x128xf32> to vector<8x128xf32>
    %26 = vector.shape_cast %23 : vector<8x128xf32> to vector<1x8x128xf32>
    tpu.vector_store %arg5[%c0_10, %c0_11, %c0_12], %26 {strides = array<i32>} : memref<1x8x128xf32, #tpu.memory_space<vmem>>, vector<1x8x128xf32>,
    return
  }
  func.func @transform_0(%arg0: i32) -> (i32, i32) {
    %c0_i32 = arith.constant 0 : i32
    %c0_i32_0 = arith.constant 0 : i32
    return %arg0, %c0_i32 : i32, i32
  }
  func.func @transform_1(%arg0: i32) -> (i32, i32) {
    %c0_i32 = arith.constant 0 : i32
    %c0_i32_0 = arith.constant 0 : i32
    %c0_i32_1 = arith.constant 0 : i32
    return %c0_i32, %c0_i32_0 : i32, i32
  }
  func.func @transform_2(%arg0: i32) -> (i32, i32) {
    %c0_i32 = arith.constant 0 : i32
    %c0_i32_0 = arith.constant 0 : i32
    %c0_i32_1 = arith.constant 0 : i32
    return %c0_i32, %c0_i32_0 : i32, i32
  }
  func.func @transform_3(%arg0: i32) -> (i32, i32) {
    %c0_i32 = arith.constant 0 : i32
    %c0_i32_0 = arith.constant 0 : i32
    return %arg0, %c0_i32 : i32, i32
  }
  func.func @transform_4(%arg0: i32) -> (i32, i32, i32) {
    %c0_i32 = arith.constant 0 : i32
    %c0_i32_0 = arith.constant 0 : i32
    %c0_i32_1 = arith.constant 0 : i32
    return %arg0, %c0_i32, %c0_i32_0 : i32, i32, i32
  }
}

module attributes {stable_mosaic.version = 11 : i64} {
  func.func @bn_res1x1_mish_kernel(%arg0: i32, %arg1: memref<256x128xf32, #tpu.memory_space<vmem>>, %arg2: memref<1x128xf32, #tpu.memory_space<vmem>>, %arg3: memref<1x128xf32, #tpu.memory_space<vmem>>, %arg4: memref<256x4xf32, #tpu.memory_space<vmem>>, %arg5: memref<4x128xf32, #tpu.memory_space<vmem>>, %arg6: memref<1x128xf32, #tpu.memory_space<vmem>>, %arg7: memref<256x128xf32, #tpu.memory_space<vmem>>) attributes {dimension_semantics = [#tpu.dimension_semantics<parallel>], iteration_bounds = array<i64: 2>, scalar_prefetch = 0 : i64, scratch_operands = 0 : i64, tpu.core_type = #tpu.core_type<tc>, window_params = [{transform_indices = @transform_0, window_bounds = array<i64: 256, 128>}, {pipeline_mode = #tpu.pipeline_mode<synchronous>, transform_indices = @transform_1, window_bounds = array<i64: 1, 128>}, {pipeline_mode = #tpu.pipeline_mode<synchronous>, transform_indices = @transform_2, window_bounds = array<i64: 1, 128>}, {transform_indices = @transform_3, window_bounds = array<i64: 256, 4>}, {pipeline_mode = #tpu.pipeline_mode<synchronous>, transform_indices = @transform_4, window_bounds = array<i64: 4, 128>}, {pipeline_mode = #tpu.pipeline_mode<synchronous>, transform_indices = @transform_5, window_bounds = array<i64: 1, 128>}, {transform_indices = @transform_6, window_bounds = array<i64: 256, 128>}]} {
    %c0 = arith.constant 0 : index
    %c0_0 = arith.constant 0 : index
    %0 = vector.load %arg1[%c0, %c0_0] : memref<256x128xf32, #tpu.memory_space<vmem>>, vector<256x128xf32>
    %c0_1 = arith.constant 0 : index
    %c0_2 = arith.constant 0 : index
    %1 = vector.load %arg2[%c0_1, %c0_2] : memref<1x128xf32, #tpu.memory_space<vmem>>, vector<1x128xf32>
    %2 = vector.broadcast %1 : vector<1x128xf32> to vector<256x128xf32>
    %3 = arith.mulf %0, %2 : vector<256x128xf32>
    %c0_3 = arith.constant 0 : index
    %c0_4 = arith.constant 0 : index
    %4 = vector.load %arg3[%c0_3, %c0_4] : memref<1x128xf32, #tpu.memory_space<vmem>>, vector<1x128xf32>
    %5 = vector.broadcast %4 : vector<1x128xf32> to vector<256x128xf32>
    %6 = arith.addf %3, %5 : vector<256x128xf32>
    %c0_5 = arith.constant 0 : index
    %c0_6 = arith.constant 0 : index
    %7 = vector.load %arg4[%c0_5, %c0_6] : memref<256x4xf32, #tpu.memory_space<vmem>>, vector<256x4xf32>
    %c0_7 = arith.constant 0 : index
    %c0_8 = arith.constant 0 : index
    %8 = vector.load %arg5[%c0_7, %c0_8] : memref<4x128xf32, #tpu.memory_space<vmem>>, vector<4x128xf32>
    %cst = arith.constant dense<0.000000e+00> : vector<256x128xf32>
    %9 = tpu.matmul %7, %8, %cst {dimension_numbers = #tpu.dot_dimension_numbers<[1], [0], [0], [1], [0, 0, 1, 1], [], []>} : vector<256x4xf32>, vector<4x128xf32>, vector<256x128xf32> -> vector<256x128xf32>
    %c0_9 = arith.constant 0 : index
    %c0_10 = arith.constant 0 : index
    %10 = vector.load %arg6[%c0_9, %c0_10] : memref<1x128xf32, #tpu.memory_space<vmem>>, vector<1x128xf32>
    %11 = vector.broadcast %10 : vector<1x128xf32> to vector<256x128xf32>
    %12 = arith.addf %9, %11 : vector<256x128xf32>
    %13 = arith.addf %6, %12 : vector<256x128xf32>
    %cst_11 = arith.constant 2.000000e+01 : f32
    %14 = vector.broadcast %cst_11 : f32 to vector<256x128xf32>
    %15 = arith.minimumf %13, %14 : vector<256x128xf32>
    %16 = math.exp %15 : vector<256x128xf32>
    %cst_12 = arith.constant 2.000000e+00 : f32
    %17 = vector.broadcast %cst_12 : f32 to vector<256x128xf32>
    %18 = arith.addf %16, %17 : vector<256x128xf32>
    %19 = arith.mulf %16, %18 : vector<256x128xf32>
    %20 = arith.mulf %13, %19 : vector<256x128xf32>
    %cst_13 = arith.constant 2.000000e+00 : f32
    %21 = vector.broadcast %cst_13 : f32 to vector<256x128xf32>
    %22 = arith.addf %19, %21 : vector<256x128xf32>
    %23 = tpu.reciprocal %22 {approx = true} : vector<256x128xf32> -> vector<256x128xf32>
    %24 = arith.mulf %20, %23 : vector<256x128xf32>
    %cst_14 = arith.constant 2.000000e+01 : f32
    %25 = vector.broadcast %cst_14 : f32 to vector<256x128xf32>
    %26 = arith.cmpf ogt, %13, %25 : vector<256x128xf32>
    %27 = arith.select %26, %13, %24 : vector<256x128xi1>, vector<256x128xf32>
    %c0_15 = arith.constant 0 : index
    %c0_16 = arith.constant 0 : index
    %28 = vector.load %arg7[%c0_15, %c0_16] : memref<256x128xf32, #tpu.memory_space<vmem>>, vector<256x128xf32>
    tpu.vector_store %arg7[%c0_15, %c0_16], %27 {strides = array<i32>} : memref<256x128xf32, #tpu.memory_space<vmem>>, vector<256x128xf32>,
    return
  }
  func.func @transform_0(%arg0: i32) -> (i32, i32) {
    %c0_i32 = arith.constant 0 : i32
    %c0_i32_0 = arith.constant 0 : i32
    return %arg0, %c0_i32 : i32, i32
  }
  func.func @transform_1(%arg0: i32) -> (i32, i32) {
    %c0_i32 = arith.constant 0 : i32
    %c0_i32_0 = arith.constant 0 : i32
    %c0_i32_1 = arith.constant 0 : i32
    return %c0_i32, %c0_i32_0 : i32, i32
  }
  func.func @transform_2(%arg0: i32) -> (i32, i32) {
    %c0_i32 = arith.constant 0 : i32
    %c0_i32_0 = arith.constant 0 : i32
    %c0_i32_1 = arith.constant 0 : i32
    return %c0_i32, %c0_i32_0 : i32, i32
  }
  func.func @transform_3(%arg0: i32) -> (i32, i32) {
    %c0_i32 = arith.constant 0 : i32
    %c0_i32_0 = arith.constant 0 : i32
    return %arg0, %c0_i32 : i32, i32
  }
  func.func @transform_4(%arg0: i32) -> (i32, i32) {
    %c0_i32 = arith.constant 0 : i32
    %c0_i32_0 = arith.constant 0 : i32
    %c0_i32_1 = arith.constant 0 : i32
    return %c0_i32, %c0_i32_0 : i32, i32
  }
  func.func @transform_5(%arg0: i32) -> (i32, i32) {
    %c0_i32 = arith.constant 0 : i32
    %c0_i32_0 = arith.constant 0 : i32
    %c0_i32_1 = arith.constant 0 : i32
    return %c0_i32, %c0_i32_0 : i32, i32
  }
  func.func @transform_6(%arg0: i32) -> (i32, i32) {
    %c0_i32 = arith.constant 0 : i32
    %c0_i32_0 = arith.constant 0 : i32
    return %arg0, %c0_i32 : i32, i32
  }
}

</mosaic_0001>

<bundles_post_ra>
// kernel: resnet_forward.4
= control target key start
LH: loop header
LB: loop body
LE: loop exit
PB: predicated region body
PF: predicated region fallthrough
CT: control target
= control target key end

     0   :  { %s971_s15 = smov 0   ;;  %s1186_s0 = inlined_call_operand.vmem [shape: bf16[512,36], index: 0, kind: input, shape index: {}]   ;;  %s1187_s1 = inlined_call_operand.vmem [shape: bf16[36,128], index: 1, kind: input, shape index: {}]   ;;  %s1188_s2 = inlined_call_operand.vmem [shape: f32[1,128], index: 2, kind: input, shape index: {}]   ;;  %s1189_s3 = inlined_call_operand.vmem [shape: f32[512,128], index: 3, kind: output, shape index: {0}]   ;;  %s1190_s4 = inlined_call_operand.vmem [shape: f32[2,8,128], index: 4, kind: output, shape index: {1}]  }
   0x1 LB: > { %s977_s16 = sadd.s32 4294967295, %s944_s15   ;;  %p802_p0 = scmp.ge.s32.totalorder %s944_s15, 1  ;;  %s944_s15 = sphi %s971_s15, %s15_s15  }
   0x2   : > { %p166_p1 = scmp.lt.s32.totalorder %s944_s15, 3 }
   0x4   : > { %p167_p2 = pnand %p802_p0, %p166_p1 }
   0x5   : > { %v919_v0 = vld [vmem:[%s1187_s1] sm:$0xff] (!%p167_p2)   ;;  %v920_v1 = vld [vmem:[%s1187_s1 + $0x8] sm:$0xff] (!%p167_p2)   ;;  %s803_s21 = sshll.u32 (!%p167_p2), %s977_s16, 5  ;;  %v921_v2 = vld [vmem:[%s1187_s1 + $0x10] ss:$0 sps:$4 sm:$0x33] (!%p167_p2)  }
   0x6   : > { %170 = sbr.rel (%p167_p2) target bundleno = 314 (0x13a), region = 32  ;;  %865 = vmatprep.subr.bf16.mxu0 (!%p167_p2), %v919_v0  ;;  %p197_p3 = scmp.lt.s32.totalorder (!%p167_p2), %s803_s21, 63  ;;  %903 = vmatprep.subr.bf16.mxu1 (!%p167_p2), %v919_v0  ;;  %vm401_vm0 = vcmask (!%p167_p2), 1041408   ;;  %vm352_vm1 = vcmask (!%p167_p2), 293888   ;;  %v1035_v20 = vld [vmem:[%s1188_s2] ss:$0 sm:$0xff] (!%p167_p2) }
   0x7   : > { %866 = vmatpush3.bf16.msra.mxu0 (!%p167_p2), %v919_v0  ;;  %906 = vmatpush3.bf16.msra.mxu1 (!%p167_p2), %v919_v0  ;;  %v403_v3 = vsel (!%p167_p2), %vm401_vm0, %v921_v2, 0  ;;  %p208_p4 = scmp.lt.s32.totalorder (!%p167_p2), %s977_s16, 1 }
   0x8   : > { %867 = vmatprep.subr.bf16.mxu0 (!%p167_p2), %v920_v1  ;;  %904 = vmatprep.subr.bf16.mxu1 (!%p167_p2), %v920_v1 }
   0xb   : > { %868 = vmatpush3.bf16.msra.mxu0 (!%p167_p2), %v920_v1  ;;  %907 = vmatpush3.bf16.msra.mxu1 (!%p167_p2), %v920_v1 }
   0xc   : > { %909 = vmatprep.subr.msk.bf16.mxu0 (!%p167_p2), %vm401_vm0, %v921_v2  ;;  %910 = vmatprep.subr.msk.bf16.mxu1 (!%p167_p2), %vm401_vm0, %v921_v2 }
   0xd   : > { %s1192_s21 = smov (!%p197_p3, %s803_s21), 63  ;;  %s1194_s16 = smov (!%p208_p4, %s977_s16), 1 }
   0xe   : > { %s804_s24 = sshll.u32 %s1192_s21, 2  ;;  %s806_s28 = sshll.u32 %s1192_s21, 3 }
   0xf   : > { %s997_s27 = scalar_lea.vmem %s1186_s0, %s804_s24  ;;  %870 = vmatpush3.bf16.msra.mxu0 %v403_v3  ;;  %908 = vmatpush3.bf16.msra.mxu1 %v403_v3  ;;  %s1040_s7 = scalar_lea.vmem %s1189_s3, %s806_s28 }
  0x10   : > { %v922_v4 = vld [vmem:[%s997_s27] sm:$0xff]   ;;  %v923_v5 = vld [vmem:[%s997_s27 + $0x8] sm:$0xff]   ;;  %v924_v6 = vld [vmem:[%s997_s27 + $0x10] sm:$0xff]   ;;  %s807_s8 = sshll.u32 %s1194_s16, 3 }
  0x11   : > { %871 = vmatprep.mubr.msk.bf16.mxu0 %vm352_vm1, %v922_v4  ;;  %v925_v7 = vld [vmem:[%s997_s27 + $0x18] sm:$0xff]   ;;  %v930_v8 = vld [vmem:[%s997_s27 + $0x40] sm:$0xff]   ;;  %v931_v9 = vld [vmem:[%s997_s27 + $0x48] sm:$0xff]   ;;  %s211_s11 = scalar_lea.vmem %s1190_s4, %s807_s8 }
  0x12   : > { %872 = vmatmul.mubr.msk.bf16.vlgmr.msra.gmra.mrb[0].mxu0 %vm352_vm1, %v923_v5  ;;  %887 = vmatprep.mubr.msk.bf16.mxu1 %vm352_vm1, %v930_v8  ;;  %v932_v10 = vld [vmem:[%s997_s27 + $0x50] sm:$0xff]   ;;  %v926_v11 = vld [vmem:[%s997_s27 + $0x20] sm:$0xff]   ;;  %v933_v12 = vld [vmem:[%s997_s27 + $0x58] sm:$0xff]  }
  0x13   : > { %875 = vmatprep.mubr.msk.bf16.mxu0 %vm352_vm1, %v924_v6  ;;  %888 = vmatmul.mubr.msk.bf16.vlgmr.msra.gmra.mrb[0].mxu1 %vm352_vm1, %v931_v9  ;;  %v934_v13 = vld [vmem:[%s997_s27 + $0x60] sm:$0xff]   ;;  %v927_v14 = vld [vmem:[%s997_s27 + $0x28] sm:$0xff]   ;;  %v928_v15 = vld [vmem:[%s997_s27 + $0x30] sm:$0xff]  }
  0x14   : > { %891 = vmatprep.mubr.msk.bf16.mxu1 %vm352_vm1, %v932_v10  ;;  %v935_v16 = vld [vmem:[%s997_s27 + $0x68] sm:$0xff]   ;;  %v936_v17 = vld [vmem:[%s997_s27 + $0x70] sm:$0xff]   ;;  %v929_v18 = vld [vmem:[%s997_s27 + $0x38] sm:$0xff]  }
  0x15   : > { %v937_v19 = vld [vmem:[%s997_s27 + $0x78] sm:$0xff]  }
  0x1a   : > { %876 = vmatmul.mubr.msk.bf16.gmra.mrb[4].mxu0 %vm352_vm1, %v925_v7 }
  0x1b   : > { %879 = vmatprep.mubr.msk.bf16.mxu0 %vm352_vm1, %v926_v11  ;;  %892 = vmatmul.mubr.msk.bf16.gmra.mrb[4].mxu1 %vm352_vm1, %v933_v12 }
  0x1c   : > { %895 = vmatprep.mubr.msk.bf16.mxu1 %vm352_vm1, %v934_v13 }
  0x22   : > { %880 = vmatmul.mubr.msk.bf16.gmra.mrb[8].mxu0 %vm352_vm1, %v927_v14 }
  0x23   : > { %883 = vmatprep.mubr.msk.bf16.mxu0 %vm352_vm1, %v928_v15  ;;  %896 = vmatmul.mubr.msk.bf16.gmra.mrb[8].mxu1 %vm352_vm1, %v935_v16 }
  0x24   : > { %899 = vmatprep.mubr.msk.bf16.mxu1 %vm352_vm1, %v936_v17 }
  0x2a   : > { %884 = vmatmul.mubr.msk.bf16.gmra.mrb[12].mxu0 %vm352_vm1, %v929_v18 }
  0x2b   : > { %900 = vmatmul.mubr.msk.bf16.gmra.mrb[12].mxu1 %vm352_vm1, %v937_v19 }
  0xe5   : > { %v873_v21 = vpop.f32.mrb[0].mxu0 }
  0xe6   : > { %v448_v22 = vadd.f32 %v873_v21, %v1035_v20  ;;  %v439_v23 = vpop.f32.mrb[1].mxu0  ;;  %v889_v29 = vpop.f32.mrb[0].mxu1 }
  0xe7   : > { %v440_v24 = vadd.f32 %v1035_v20, %v439_v23  ;;  %v874_v25 = vpop.f32.mrb[2].mxu0  ;;  %v1051_v33 = vadd.f32 %v889_v29, %v1035_v20  ;;  %v503_v34 = vpop.f32.mrb[1].mxu1 }
  0xe8   : > { %568 = vst [vmem:[%s1040_s7 + $0x10] sm:$0xff] %v448_v22  ;;  %v451_v26 = vadd.f32 %v874_v25, %v1035_v20  ;;  %v442_v27 = vpop.f32.mrb[3].mxu0  ;;  %v1054_v35 = vadd.f32 %v1035_v20, %v503_v34  ;;  %v890_v36 = vpop.f32.mrb[2].mxu1  ;;  %v637_v37 = vmul.f32 %v448_v22, %v448_v22 }
  0xe9   : > { %566 = vst [vmem:[%s1040_s7] sm:$0xff] %v440_v24  ;;  %v443_v28 = vadd.f32 %v1035_v20, %v442_v27  ;;  %v635_v30 = vmul.f32 %v440_v24, %v440_v24  ;;  %584 = vst [vmem:[%s1040_s7 + $0x90] sm:$0xff] %v1051_v33  ;;  %v1059_v41 = vadd.f32 %v890_v36, %v1035_v20  ;;  %v506_v42 = vpop.f32.mrb[3].mxu1 }
  0xea   : > { %569 = vst [vmem:[%s1040_s7 + $0x18] sm:$0xff] %v451_v26  ;;  %582 = vst [vmem:[%s1040_s7 + $0x80] sm:$0xff] %v1054_v35  ;;  %v1065_v45 = vadd.f32 %v1035_v20, %v506_v42  ;;  %v638_v46 = vmul.f32 %v451_v26, %v451_v26 }
  0xeb   : > { %567 = vst [vmem:[%s1040_s7 + $0x8] sm:$0xff] %v443_v28  ;;  %v598_v31 = vadd.f32 %v443_v28, %v440_v24  ;;  %v636_v32 = vmul.f32 %v443_v28, %v443_v28  ;;  %585 = vst [vmem:[%s1040_s7 + $0x98] sm:$0xff] %v1059_v41 }
  0xec   : > { %583 = vst [vmem:[%s1040_s7 + $0x88] sm:$0xff] %v1065_v45 }
  0xed   : > { %v599_v38 = vadd.f32 %v598_v31, %v448_v22  ;;  %v667_v39 = vadd.f32 %v636_v32, %v635_v30  ;;  %v877_v40 = vpop.f32.mrb[4].mxu0 }
  0xee   : > { %v464_v43 = vadd.f32 %v877_v40, %v1035_v20  ;;  %v455_v44 = vpop.f32.mrb[5].mxu0  ;;  %v893_v57 = vpop.f32.mrb[4].mxu1 }
  0xef   : > { %v668_v47 = vadd.f32 %v667_v39, %v637_v37  ;;  %v456_v48 = vadd.f32 %v1035_v20, %v455_v44  ;;  %v600_v49 = vadd.f32 %v599_v38, %v451_v26  ;;  %v878_v50 = vpop.f32.mrb[6].mxu0  ;;  %v1079_v61 = vadd.f32 %v893_v57, %v1035_v20  ;;  %v519_v62 = vpop.f32.mrb[5].mxu1 }
  0xf0   : > { %572 = vst [vmem:[%s1040_s7 + $0x30] sm:$0xff] %v464_v43  ;;  %v467_v51 = vadd.f32 %v878_v50, %v1035_v20  ;;  %v458_v52 = vpop.f32.mrb[7].mxu0  ;;  %v1082_v63 = vadd.f32 %v1035_v20, %v519_v62  ;;  %v894_v0 = vpop.f32.mrb[6].mxu1  ;;  %v641_v1 = vmul.f32 %v464_v43, %v464_v43 }
  0xf1   : > { %570 = vst [vmem:[%s1040_s7 + $0x20] sm:$0xff] %v456_v48  ;;  %v601_v53 = vadd.f32 %v600_v49, %v456_v48  ;;  %v639_v54 = vmul.f32 %v456_v48, %v456_v48  ;;  %v669_v55 = vadd.f32 %v668_v47, %v638_v46  ;;  %v459_v56 = vadd.f32 %v1035_v20, %v458_v52  ;;  %v522_v6 = vpop.f32.mrb[7].mxu1 }
  0xf2   : > { %573 = vst [vmem:[%s1040_s7 + $0x38] sm:$0xff] %v467_v51  ;;  %588 = vst [vmem:[%s1040_s7 + $0xb0] sm:$0xff] %v1079_v61  ;;  %v1087_v5 = vadd.f32 %v894_v0, %v1035_v20  ;;  %v1093_v9 = vadd.f32 %v1035_v20, %v522_v6  ;;  %v642_v10 = vmul.f32 %v467_v51, %v467_v51 }
  0xf3   : > { %v670_v58 = vadd.f32 %v669_v55, %v639_v54  ;;  %571 = vst [vmem:[%s1040_s7 + $0x28] sm:$0xff] %v459_v56  ;;  %v602_v59 = vadd.f32 %v601_v53, %v459_v56  ;;  %v640_v60 = vmul.f32 %v459_v56, %v459_v56  ;;  %586 = vst [vmem:[%s1040_s7 + $0xa0] sm:$0xff] %v1082_v63 }
  0xf4   : > { %589 = vst [vmem:[%s1040_s7 + $0xb8] sm:$0xff] %v1087_v5  ;;  %587 = vst [vmem:[%s1040_s7 + $0xa8] sm:$0xff] %v1093_v9 }
  0xf5   : > { %v603_v2 = vadd.f32 %v602_v59, %v464_v43  ;;  %v671_v3 = vadd.f32 %v670_v58, %v640_v60  ;;  %v881_v4 = vpop.f32.mrb[8].mxu0 }
  0xf6   : > { %v480_v7 = vadd.f32 %v881_v4, %v1035_v20  ;;  %v471_v8 = vpop.f32.mrb[9].mxu0  ;;  %v897_v22 = vpop.f32.mrb[8].mxu1 }
  0xf7   : > { %v672_v11 = vadd.f32 %v671_v3, %v641_v1  ;;  %v472_v12 = vadd.f32 %v1035_v20, %v471_v8  ;;  %v604_v13 = vadd.f32 %v603_v2, %v467_v51  ;;  %v882_v14 = vpop.f32.mrb[10].mxu0  ;;  %v1107_v26 = vadd.f32 %v897_v22, %v1035_v20  ;;  %v535_v27 = vpop.f32.mrb[9].mxu1 }
  0xf8   : > { %576 = vst [vmem:[%s1040_s7 + $0x50] sm:$0xff] %v480_v7  ;;  %v483_v15 = vadd.f32 %v882_v14, %v1035_v20  ;;  %v474_v16 = vpop.f32.mrb[11].mxu0  ;;  %v1110_v28 = vadd.f32 %v1035_v20, %v535_v27  ;;  %v898_v29 = vpop.f32.mrb[10].mxu1  ;;  %v645_v30 = vmul.f32 %v480_v7, %v480_v7  ;;  %v656_v27 = vmul.f32 %v1093_v9, %v1093_v9 }
  0xf9   : > { %574 = vst [vmem:[%s1040_s7 + $0x40] sm:$0xff] %v472_v12  ;;  %v605_v17 = vadd.f32 %v604_v13, %v472_v12  ;;  %v643_v18 = vmul.f32 %v472_v12, %v472_v12  ;;  %v673_v19 = vadd.f32 %v672_v11, %v642_v10  ;;  %v475_v21 = vadd.f32 %v1035_v20, %v474_v16  ;;  %v538_v37 = vpop.f32.mrb[11].mxu1 }
  0xfa   : > { %577 = vst [vmem:[%s1040_s7 + $0x58] sm:$0xff] %v483_v15  ;;  %592 = vst [vmem:[%s1040_s7 + $0xd0] sm:$0xff] %v1107_v26  ;;  %v1115_v36 = vadd.f32 %v898_v29, %v1035_v20  ;;  %v1121_v40 = vadd.f32 %v1035_v20, %v538_v37  ;;  %v646_v42 = vmul.f32 %v483_v15, %v483_v15 }
  0xfb   : > { %v674_v23 = vadd.f32 %v673_v19, %v643_v18  ;;  %575 = vst [vmem:[%s1040_s7 + $0x48] sm:$0xff] %v475_v21  ;;  %v606_v24 = vadd.f32 %v605_v17, %v475_v21  ;;  %v644_v25 = vmul.f32 %v475_v21, %v475_v21  ;;  %590 = vst [vmem:[%s1040_s7 + $0xc0] sm:$0xff] %v1110_v28 }
  0xfc   : > { %593 = vst [vmem:[%s1040_s7 + $0xd8] sm:$0xff] %v1115_v36  ;;  %591 = vst [vmem:[%s1040_s7 + $0xc8] sm:$0xff] %v1121_v40  ;;  %v651_v11 = vmul.f32 %v1054_v35, %v1054_v35  ;;  %v652_v16 = vmul.f32 %v1065_v45, %v1065_v45  ;;  %v654_v19 = vmul.f32 %v1059_v41, %v1059_v41 }
  0xfd   : > { %v607_v31 = vadd.f32 %v606_v24, %v480_v7  ;;  %v675_v32 = vadd.f32 %v674_v23, %v644_v25  ;;  %v885_v34 = vpop.f32.mrb[12].mxu0 }
  0xfe   : > { %v496_v38 = vadd.f32 %v885_v34, %v1035_v20  ;;  %v487_v39 = vpop.f32.mrb[13].mxu0  ;;  %v901_v54 = vpop.f32.mrb[12].mxu1 }
  0xff   : > { %v676_v43 = vadd.f32 %v675_v32, %v645_v30  ;;  %v488_v44 = vadd.f32 %v1035_v20, %v487_v39  ;;  %v608_v46 = vadd.f32 %v607_v31, %v483_v15  ;;  %v886_v47 = vpop.f32.mrb[14].mxu0  ;;  %v560_v58 = vadd.f32 %v901_v54, %v1035_v20  ;;  %v551_v59 = vpop.f32.mrb[13].mxu1 }
 0x100   : > { %580 = vst [vmem:[%s1040_s7 + $0x70] sm:$0xff] %v496_v38  ;;  %v499_v48 = vadd.f32 %v886_v47, %v1035_v20  ;;  %v490_v49 = vpop.f32.mrb[15].mxu0  ;;  %v552_v60 = vadd.f32 %v1035_v20, %v551_v59  ;;  %v902_v62 = vpop.f32.mrb[14].mxu1  ;;  %v649_v0 = vmul.f32 %v496_v38, %v496_v38  ;;  %v660_v39 = vmul.f32 %v1121_v40, %v1121_v40 }
 0x101   : > { %578 = vst [vmem:[%s1040_s7 + $0x60] sm:$0xff] %v488_v44  ;;  %v609_v50 = vadd.f32 %v608_v46, %v488_v44  ;;  %v647_v51 = vmul.f32 %v488_v44, %v488_v44  ;;  %v677_v52 = vadd.f32 %v676_v43, %v646_v42  ;;  %v491_v53 = vadd.f32 %v1035_v20, %v490_v49  ;;  %v554_v4 = vpop.f32.mrb[15].mxu1 }
 0x102   : > { %581 = vst [vmem:[%s1040_s7 + $0x78] sm:$0xff] %v499_v48  ;;  %596 = vst [vmem:[%s1040_s7 + $0xf0] sm:$0xff] %v560_v58  ;;  %v563_v3 = vadd.f32 %v902_v62, %v1035_v20  ;;  %v555_v6 = vadd.f32 %v1035_v20, %v554_v4  ;;  %v650_v7 = vmul.f32 %v499_v48, %v499_v48 }
 0x103   : > { %v678_v55 = vadd.f32 %v677_v52, %v647_v51  ;;  %579 = vst [vmem:[%s1040_s7 + $0x68] sm:$0xff] %v491_v53  ;;  %v610_v56 = vadd.f32 %v609_v50, %v491_v53  ;;  %v648_v57 = vmul.f32 %v491_v53, %v491_v53  ;;  %594 = vst [vmem:[%s1040_s7 + $0xe0] sm:$0xff] %v552_v60 }
 0x104   : > { %597 = vst [vmem:[%s1040_s7 + $0xf8] sm:$0xff] %v563_v3  ;;  %595 = vst [vmem:[%s1040_s7 + $0xe8] sm:$0xff] %v555_v6  ;;  %v653_v20 = vmul.f32 %v1051_v33, %v1051_v33  ;;  %v663_v46 = vmul.f32 %v552_v60, %v552_v60  ;;  %v665_v51 = vmul.f32 %v560_v58, %v560_v58 }
 0x105   : > { %v611_v1 = vadd.f32 %v610_v56, %v496_v38  ;;  %v679_v2 = vadd.f32 %v678_v55, %v648_v57  ;;  %v666_v54 = vmul.f32 %v563_v3, %v563_v3 }
 0x107   : > { %v680_v8 = vadd.f32 %v679_v2, %v649_v0  ;;  %v612_v10 = vadd.f32 %v611_v1, %v499_v48  ;;  %v704_v0 = vlaneseq }
 0x109   : > { %v613_v12 = vadd.f32 %v612_v10, %v1054_v35  ;;  %v681_v13 = vadd.f32 %v680_v8, %v650_v7  ;;  %v655_v35 = vmul.f32 %v1082_v63, %v1082_v63  ;;  %v705_v4 = vshrl.u32 %v704_v0, 7 }
 0x10b   : > { %v682_v14 = vadd.f32 %v681_v13, %v651_v11  ;;  %v614_v15 = vadd.f32 %v613_v12, %v1065_v45  ;;  %vm707_vm2 = vcmp.eq.s32.totalorder %v705_v4, 1  ;;  %vm706_vm3 = vcmp.eq.s32.totalorder %v705_v4, 0 }
 0x10d   : > { %v615_v17 = vadd.f32 %v614_v15, %v1051_v33  ;;  %v683_v18 = vadd.f32 %v682_v14, %v652_v16  ;;  %v657_v33 = vmul.f32 %v1079_v61, %v1079_v61 }
 0x10f   : > { %v684_v21 = vadd.f32 %v683_v18, %v653_v20  ;;  %v616_v22 = vadd.f32 %v615_v17, %v1059_v41  ;;  %v658_v41 = vmul.f32 %v1087_v5, %v1087_v5 }
 0x111   : > { %v617_v23 = vadd.f32 %v616_v22, %v1082_v63  ;;  %v685_v24 = vadd.f32 %v684_v21, %v654_v19  ;;  %v659_v63 = vmul.f32 %v1110_v28, %v1110_v28 }
 0x113   : > { %v686_v25 = vadd.f32 %v685_v24, %v655_v35  ;;  %v618_v45 = vadd.f32 %v617_v23, %v1093_v9 }
 0x115   : > { %v619_v29 = vadd.f32 %v618_v45, %v1079_v61  ;;  %v687_v30 = vadd.f32 %v686_v25, %v656_v27  ;;  %v661_v61 = vmul.f32 %v1107_v26, %v1107_v26 }
 0x117   : > { %v688_v31 = vadd.f32 %v687_v30, %v657_v33  ;;  %v620_v32 = vadd.f32 %v619_v29, %v1087_v5  ;;  %v662_v5 = vmul.f32 %v1115_v36, %v1115_v36 }
 0x119   : > { %v621_v34 = vadd.f32 %v620_v32, %v1110_v28  ;;  %v689_v37 = vadd.f32 %v688_v31, %v658_v41 }
 0x11b   : > { %v690_v38 = vadd.f32 %v689_v37, %v659_v63  ;;  %v622_v9 = vadd.f32 %v621_v34, %v1121_v40  ;;  %v664_v40 = vmul.f32 %v555_v6, %v555_v6 }
 0x11d   : > { %v623_v42 = vadd.f32 %v622_v9, %v1107_v26  ;;  %v691_v43 = vadd.f32 %v690_v38, %v660_v39 }
 0x11f   : > { %v692_v44 = vadd.f32 %v691_v43, %v661_v61  ;;  %v624_v28 = vadd.f32 %v623_v42, %v1115_v36 }
 0x121   : > { %v625_v47 = vadd.f32 %v624_v28, %v552_v60  ;;  %v693_v48 = vadd.f32 %v692_v44, %v662_v5 }
 0x123   : > { %v694_v49 = vadd.f32 %v693_v48, %v663_v46  ;;  %v626_v50 = vadd.f32 %v625_v47, %v555_v6 }
 0x125   : > { %v627_v52 = vadd.f32 %v626_v50, %v560_v58  ;;  %v695_v53 = vadd.f32 %v694_v49, %v664_v40 }
 0x127   : > { %v628_v26 = vadd.f32 %v627_v52, %v563_v3  ;;  %v696_v55 = vadd.f32 %v695_v53, %v665_v51 }
 0x129   : > { %v629_v56 = vrot.slane %v628_v26, 4  ;;  %v697_v57 = vadd.f32 %v696_v55, %v666_v54 }
 0x12b   : > { %v630_v59 = vadd.f32 %v629_v56, %v628_v26  ;;  %v698_v62 = vrot.slane %v697_v57, 4 }
 0x12d   : > { %v631_v36 = vrot.slane %v630_v59, 2  ;;  %v699_v1 = vadd.f32 %v698_v62, %v697_v57 }
 0x12f   : > { %v632_v60 = vadd.f32 %v631_v36, %v630_v59  ;;  %v700_v2 = vrot.slane %v699_v1, 2 }
 0x131   : > { %v701_v7 = vadd.f32 %v700_v2, %v699_v1  ;;  %v633_v6 = vrot.slane %v632_v60, 1 }
 0x133   : > { %v702_v58 = vrot.slane %v701_v7, 1  ;;  %v634_v3 = vadd.f32 %v633_v6, %v632_v60 }
 0x135   : > { %v703_v8 = vadd.f32 %v702_v58, %v701_v7 }
 0x137   : > { %v708_v10 = vsel %vm707_vm2, %v703_v8, 0.0 }
 0x138   : > { %v709_v11 = vsel %vm706_vm3, %v634_v3, %v708_v10 }
 0x139   : > { %710 = vst [vmem:[%s211_s11] sm:$0xff] %v709_v11 }
 0x13a PF: > { %s15_s15 = sadd.s32 1, %s944_s15  }
 0x13b   : > { %p12_p5 = scmp.ge.s32.totalorder %s15_s15, 4  }
 0x13d   :  { %14 = sbr.rel (!%p12_p5) target bundleno = 1 (0x1), region = 74 }

// kernel: resnet_forward.5
= control target key start
LH: loop header
LB: loop body
LE: loop exit
PB: predicated region body
PF: predicated region fallthrough
CT: control target
= control target key end

     0   :  { %s1188_s12 = smov 0   ;;  %s1581_s0 = inlined_call_operand.vmem [shape: f32[512,128], index: 0, kind: input, shape index: {}]   ;;  %s1582_s1 = inlined_call_operand.vmem [shape: f32[1,128], index: 1, kind: input, shape index: {}]   ;;  %s1583_s2 = inlined_call_operand.vmem [shape: f32[1,128], index: 2, kind: input, shape index: {}]   ;;  %s1584_s3 = inlined_call_operand.vmem [shape: bf16[512,128], index: 3, kind: output, shape index: {}]  }
   0x1 LB: > { %s852_s13 = sadd.s32 4294967295, %s1166_s12   ;;  %p856_p0 = scmp.ge.s32.totalorder %s1166_s12, 1  ;;  %s1166_s12 = sphi %s1188_s12, %s13_s12  }
   0x2   : > { %p138_p1 = scmp.lt.s32.totalorder %s1166_s12, 3 }
   0x4   : > { %p139_p2 = pnand %p856_p0, %p138_p1 }
   0x5   : > { %s857_s14 = sshll.u32 (!%p139_p2), %s852_s13, 5  ;;  %v1202_v0 = vld [vmem:[%s1582_s1] ss:$0 sm:$0xff] (!%p139_p2) }
   0x6   : > { %142 = sbr.rel (%p139_p2) target bundleno = 144 (0x90), region = 32  ;;  %p163_p3 = scmp.lt.s32.totalorder (!%p139_p2), %s857_s14, 63  ;;  %v1212_v1 = vld [vmem:[%s1583_s2] ss:$0 sm:$0xff] (!%p139_p2) }
   0xd   : > { %s1586_s14 = smov (!%p163_p3, %s857_s14), 63 }
   0xe   : > { %s858_s15 = sshll.u32 %s1586_s14, 3  ;;  %s860_s23 = sshll.u32 %s1586_s14, 2 }
   0xf   : > { %s1207_s20 = scalar_lea.vmem %s1581_s0, %s858_s15  ;;  %s1348_s26 = scalar_lea.vmem %s1584_s3, %s860_s23 }
  0x10   : > { %v174_v2 = vld [vmem:[%s1207_s20] sm:$0xff]  ;;  %v175_v3 = vld [vmem:[%s1207_s20 + $0x8] sm:$0xff]  ;;  %v176_v4 = vld [vmem:[%s1207_s20 + $0x10] sm:$0xff] }
  0x11   : > { %v213_v5 = vmul.f32 %v1202_v0, %v174_v2  ;;  %v214_v6 = vmul.f32 %v1202_v0, %v175_v3  ;;  %v177_v7 = vld [vmem:[%s1207_s20 + $0x18] sm:$0xff]  ;;  %v215_v8 = vmul.f32 %v1202_v0, %v176_v4  ;;  %v178_v9 = vld [vmem:[%s1207_s20 + $0x20] sm:$0xff]  ;;  %v179_v10 = vld [vmem:[%s1207_s20 + $0x28] sm:$0xff] }
  0x12   : > { %v216_v11 = vmul.f32 %v1202_v0, %v177_v7  ;;  %v217_v12 = vmul.f32 %v1202_v0, %v178_v9  ;;  %v218_v13 = vmul.f32 %v1202_v0, %v179_v10  ;;  %v180_v14 = vld [vmem:[%s1207_s20 + $0x30] sm:$0xff]  ;;  %v181_v18 = vld [vmem:[%s1207_s20 + $0x38] sm:$0xff]  ;;  %v182_v28 = vld [vmem:[%s1207_s20 + $0x40] sm:$0xff] }
  0x13   : > { %v1228_v15 = vadd.f32 %v1212_v1, %v213_v5  ;;  %v1231_v16 = vadd.f32 %v1212_v1, %v214_v6  ;;  %v1234_v17 = vadd.f32 %v1212_v1, %v215_v8  ;;  %v219_v24 = vmul.f32 %v1202_v0, %v180_v14  ;;  %v183_v29 = vld [vmem:[%s1207_s20 + $0x48] sm:$0xff]  ;;  %v184_v36 = vld [vmem:[%s1207_s20 + $0x50] sm:$0xff]  ;;  %v185_v43 = vld [vmem:[%s1207_s20 + $0x58] sm:$0xff] }
  0x14   : > { %v1238_v19 = vadd.f32 %v1212_v1, %v216_v11  ;;  %v1241_v20 = vadd.f32 %v1212_v1, %v217_v12  ;;  %v1244_v21 = vadd.f32 %v1212_v1, %v218_v13  ;;  %v220_v27 = vmul.f32 %v1202_v0, %v181_v18  ;;  %v186_v51 = vld [vmem:[%s1207_s20 + $0x60] sm:$0xff]  ;;  %v187_v54 = vld [vmem:[%s1207_s20 + $0x68] sm:$0xff]  ;;  %v188_v12 = vld [vmem:[%s1207_s20 + $0x70] sm:$0xff] }
  0x15   : > { %v284_v22 = vmin.f32 %v1228_v15, 20.0  ;;  %v285_v23 = vmin.f32 %v1231_v16, 20.0  ;;  %v286_v25 = vmin.f32 %v1234_v17, 20.0  ;;  %v1258_v39 = vadd.f32 %v1212_v1, %v219_v24 }
  0x16   : > { %v287_v26 = vmin.f32 %v1238_v19, 20.0  ;;  %v288_v32 = vmin.f32 %v1241_v20, 20.0  ;;  %v289_v33 = vmin.f32 %v1244_v21, 20.0  ;;  %v1261_v40 = vadd.f32 %v1212_v1, %v220_v27 }
  0x17   : > { %v316_v30 = vmul.f32 1.442695, %v284_v22  ;;  %v318_v31 = vmul.f32 1.442695, %v285_v23  ;;  %v320_v34 = vmul.f32 1.442695, %v286_v25  ;;  %v221_v41 = vmul.f32 %v1202_v0, %v182_v28 }
  0x18   : > { %v322_v35 = vmul.f32 1.442695, %v287_v26  ;;  %v324_v37 = vmul.f32 1.442695, %v288_v32  ;;  %v326_v38 = vmul.f32 1.442695, %v289_v33  ;;  %v222_v42 = vmul.f32 %v1202_v0, %v183_v29 }
  0x19   : > { %1032 = vpow2.f32 %v316_v30  ;;  %v290_v44 = vmin.f32 %v1258_v39, 20.0  ;;  %v223_v45 = vmul.f32 %v1202_v0, %v184_v36  ;;  %v291_v46 = vmin.f32 %v1261_v40, 20.0  ;;  %v189_v30 = vld [vmem:[%s1207_s20 + $0x78] sm:$0xff] }
  0x1a   : > { %1034 = vpow2.f32 %v318_v31  ;;  %v1270_v47 = vadd.f32 %v1212_v1, %v221_v41  ;;  %v1273_v49 = vadd.f32 %v1212_v1, %v222_v42  ;;  %v224_v50 = vmul.f32 %v1202_v0, %v185_v43 }
  0x1b   : > { %1036 = vpow2.f32 %v320_v34  ;;  %v328_v48 = vmul.f32 1.442695, %v290_v44  ;;  %v330_v52 = vmul.f32 1.442695, %v291_v46  ;;  %v1281_v56 = vadd.f32 %v1212_v1, %v223_v45 }
  0x1c   : > { %1038 = vpow2.f32 %v322_v35  ;;  %v292_v53 = vmin.f32 %v1270_v47, 20.0  ;;  %v293_v55 = vmin.f32 %v1273_v49, 20.0  ;;  %v1284_v58 = vadd.f32 %v1212_v1, %v224_v50 }
  0x1d   : > { %1040 = vpow2.f32 %v324_v37  ;;  %v225_v59 = vmul.f32 %v1202_v0, %v186_v51  ;;  %v294_v61 = vmin.f32 %v1281_v56, 20.0  ;;  %v226_v62 = vmul.f32 %v1202_v0, %v187_v54 }
  0x1e   : > { %1042 = vpow2.f32 %v326_v38  ;;  %v332_v57 = vmul.f32 1.442695, %v292_v53  ;;  %v334_v60 = vmul.f32 1.442695, %v293_v55  ;;  %v295_v63 = vmin.f32 %v1284_v58, 20.0 }
  0x1f   : > { %1044 = vpow2.f32 %v328_v48  ;;  %v1291_v2 = vadd.f32 %v1212_v1, %v225_v59  ;;  %v336_v4 = vmul.f32 1.442695, %v294_v61  ;;  %v1294_v5 = vadd.f32 %v1212_v1, %v226_v62 }
  0x20   : > { %1046 = vpow2.f32 %v330_v52  ;;  %v338_v8 = vmul.f32 1.442695, %v295_v63  ;;  %v227_v31 = vmul.f32 %v1202_v0, %v188_v12  ;;  %v228_v45 = vmul.f32 %v1202_v0, %v189_v30 }
  0x21   : > { %1048 = vpow2.f32 %v332_v57  ;;  %v296_v11 = vmin.f32 %v1291_v2, 20.0  ;;  %v297_v22 = vmin.f32 %v1294_v5, 20.0  ;;  %vm572_vm0 = vcmp.gt.f32.partialorder %v1228_v15, 20.0 }
  0x22   : > { %1050 = vpow2.f32 %v334_v60  ;;  %vm573_vm1 = vcmp.gt.f32.partialorder %v1231_v16, 20.0  ;;  %vm574_vm2 = vcmp.gt.f32.partialorder %v1234_v17, 20.0  ;;  %vm575_vm3 = vcmp.gt.f32.partialorder %v1238_v19, 20.0 }
  0x23   : > { %v1033_v3 = vpop.eup %1032  ;;  %1052 = vpow2.f32 %v336_v4  ;;  %v1301_v36 = vmul.f32 1.442695, %v296_v11  ;;  %v1303_v42 = vmul.f32 1.442695, %v297_v22  ;;  %vm576_vm4 = vcmp.gt.f32.partialorder %v1241_v20, 20.0 }
  0x24   : > { %v1035_v6 = vpop.eup %1034  ;;  %v380_v7 = vadd.f32 2.0, %v1033_v3  ;;  %1054 = vpow2.f32 %v338_v8  ;;  %vm577_vm5 = vcmp.gt.f32.partialorder %v1244_v21, 20.0  ;;  %vm578_vm6 = vcmp.gt.f32.partialorder %v1258_v39, 20.0 }
  0x25   : > { %v1037_v9 = vpop.eup %1036  ;;  %v381_v10 = vadd.f32 2.0, %v1035_v6  ;;  %vm579_vm7 = vcmp.gt.f32.partialorder %v1261_v40, 20.0  ;;  %vm580_vm8 = vcmp.gt.f32.partialorder %v1270_v47, 20.0  ;;  %vm581_vm9 = vcmp.gt.f32.partialorder %v1273_v49, 20.0 }
  0x26   : > { %v1039_v13 = vpop.eup %1038  ;;  %v412_v14 = vmul.f32 %v1033_v3, %v380_v7  ;;  %v382_v18 = vadd.f32 2.0, %v1037_v9  ;;  %v1314_v3 = vadd.f32 %v1212_v1, %v227_v31  ;;  %vm582_vm10 = vcmp.gt.f32.partialorder %v1281_v56, 20.0 }
  0x27   : > { %v1041_v23 = vpop.eup %1040  ;;  %v413_v24 = vmul.f32 %v1035_v6, %v381_v10  ;;  %v383_v25 = vadd.f32 2.0, %v1039_v13  ;;  %vm583_vm11 = vcmp.gt.f32.partialorder %v1284_v58, 20.0  ;;  %vm584_vm12 = vcmp.gt.f32.partialorder %v1291_v2, 20.0 }
  0x28   : > { %v1043_v26 = vpop.eup %1042  ;;  %v476_v27 = vadd.f32 2.0, %v412_v14  ;;  %v414_v28 = vmul.f32 %v1037_v9, %v382_v18  ;;  %v384_v29 = vadd.f32 2.0, %v1041_v23  ;;  %v444_v48 = vmul.f32 %v412_v14, %v1228_v15 }
  0x29   : > { %v1045_v32 = vpop.eup %1044  ;;  %v477_v33 = vadd.f32 2.0, %v413_v24  ;;  %v415_v34 = vmul.f32 %v1039_v13, %v383_v25  ;;  %v385_v35 = vadd.f32 2.0, %v1043_v26  ;;  %v445_v53 = vmul.f32 %v413_v24, %v1231_v16 }
  0x2a   : > { %v1047_v37 = vpop.eup %1046  ;;  %1056 = vrcp.f32 %v476_v27  ;;  %v478_v38 = vadd.f32 2.0, %v414_v28  ;;  %v416_v41 = vmul.f32 %v1041_v23, %v384_v29  ;;  %v386_v51 = vadd.f32 2.0, %v1045_v32 }
  0x2b   : > { %1058 = vrcp.f32 %v477_v33  ;;  %v479_v43 = vadd.f32 2.0, %v415_v34  ;;  %v417_v44 = vmul.f32 %v1043_v26, %v385_v35  ;;  %v1049_v46 = vpop.eup %1048  ;;  %v387_v55 = vadd.f32 2.0, %v1047_v37 }
  0x2c   : > { %1060 = vrcp.f32 %v478_v38  ;;  %v480_v50 = vadd.f32 2.0, %v416_v41  ;;  %v1051_v52 = vpop.eup %1050  ;;  %v418_v57 = vmul.f32 %v1045_v32, %v386_v51  ;;  %v388_v59 = vadd.f32 2.0, %v1049_v46 }
  0x2d   : > { %1062 = vrcp.f32 %v479_v43  ;;  %v481_v54 = vadd.f32 2.0, %v417_v44  ;;  %v389_v60 = vadd.f32 2.0, %v1051_v52  ;;  %v1053_v61 = vpop.eup %1052  ;;  %v446_v62 = vmul.f32 %v414_v28, %v1234_v17 }
  0x2e   : > { %1064 = vrcp.f32 %v480_v50  ;;  %v419_v63 = vmul.f32 %v1047_v37, %v387_v55  ;;  %v1055_v4 = vpop.eup %1054  ;;  %v482_v6 = vadd.f32 2.0, %v418_v57  ;;  %v420_v7 = vmul.f32 %v1049_v46, %v388_v59  ;;  %v190_v50 = vld [vmem:[%s1207_s20 + $0x80] sm:$0xff]  ;;  %v192_v55 = vld [vmem:[%s1207_s20 + $0x90] sm:$0xff] }
  0x2f   : > { %1066 = vrcp.f32 %v481_v54  ;;  %v421_v8 = vmul.f32 %v1051_v52, %v389_v60  ;;  %v1318_v9 = vadd.f32 %v1212_v1, %v228_v45  ;;  %v447_v10 = vmul.f32 %v415_v34, %v1238_v19  ;;  %v191_v54 = vld [vmem:[%s1207_s20 + $0x88] sm:$0xff] }
  0x30   : > { %v483_v11 = vadd.f32 2.0, %v419_v63  ;;  %v390_v12 = vadd.f32 2.0, %v1053_v61  ;;  %v391_v13 = vadd.f32 2.0, %v1055_v4  ;;  %v448_v14 = vmul.f32 %v416_v41, %v1241_v20 }
  0x31   : > { %v449_v18 = vmul.f32 %v417_v44, %v1244_v21  ;;  %1068 = vrcp.f32 %v482_v6  ;;  %v484_v22 = vadd.f32 2.0, %v420_v7  ;;  %v485_v23 = vadd.f32 2.0, %v421_v8 }
  0x32   : > { %1070 = vrcp.f32 %v483_v11  ;;  %v1324_v24 = vmul.f32 %v1053_v61, %v390_v12  ;;  %v1326_v25 = vmul.f32 %v1055_v4, %v391_v13  ;;  %v450_v27 = vmul.f32 %v418_v57, %v1258_v39  ;;  %v193_v57 = vld [vmem:[%s1207_s20 + $0x98] sm:$0xff] }
  0x33   : > { %1072 = vrcp.f32 %v484_v22  ;;  %v298_v28 = vmin.f32 %v1314_v3, 20.0  ;;  %v299_v29 = vmin.f32 %v1318_v9, 20.0  ;;  %v451_v32 = vmul.f32 %v419_v63, %v1261_v40 }
  0x34   : > { %v1057_v26 = vpop.eup %1056  ;;  %v452_v33 = vmul.f32 %v420_v7, %v1270_v47  ;;  %1074 = vrcp.f32 %v485_v23  ;;  %v486_v37 = vadd.f32 2.0, %v1324_v24  ;;  %v487_v38 = vadd.f32 2.0, %v1326_v25 }
  0x35   : > { %v1059_v30 = vpop.eup %1058  ;;  %v540_v31 = vmul.f32 %v1057_v26, %v444_v48  ;;  %1076 = vpow2.f32 %v1301_v36  ;;  %v344_v45 = vmul.f32 1.442695, %v298_v28  ;;  %v346_v48 = vmul.f32 1.442695, %v299_v29 }
  0x36   : > { %v1061_v34 = vpop.eup %1060  ;;  %v541_v35 = vmul.f32 %v1059_v30, %v445_v53  ;;  %1078 = vpow2.f32 %v1303_v42  ;;  %v453_v60 = vmul.f32 %v421_v8, %v1273_v49  ;;  %v230_v4 = vmul.f32 %v1202_v0, %v191_v54 }
  0x37   : > { %v1063_v41 = vpop.eup %1062  ;;  %v604_v43 = vsel %vm572_vm0, %v1228_v15, %v540_v31  ;;  %v542_v44 = vmul.f32 %v1061_v34, %v446_v62  ;;  %1080 = vrcp.f32 %v486_v37  ;;  %v229_v62 = vmul.f32 %v1202_v0, %v190_v50 }
  0x38   : > { %v1065_v46 = vpop.eup %1064  ;;  %v605_v36 = vsel %vm573_vm1, %v1231_v16, %v541_v35  ;;  %v543_v15 = vmul.f32 %v1063_v41, %v447_v10  ;;  %1082 = vrcp.f32 %v487_v38  ;;  %v231_v6 = vmul.f32 %v1202_v0, %v192_v55 }
  0x39   : > { %v1067_v51 = vpop.eup %1066  ;;  %v932_v52 = vpack.c.bf16 %v605_v36, %v604_v43  ;;  %v606_v42 = vsel %vm574_vm2, %v1234_v17, %v542_v44  ;;  %v544_v53 = vmul.f32 %v1065_v46, %v448_v14  ;;  %1084 = vpow2.f32 %v344_v45 }
  0x3a   : > { %v607_v16 = vsel %vm575_vm3, %v1238_v19, %v543_v15  ;;  %v545_v59 = vmul.f32 %v1067_v51, %v449_v18  ;;  %1086 = vpow2.f32 %v346_v48  ;;  %v232_v7 = vmul.f32 %v1202_v0, %v193_v57  ;;  %v194_v15 = vld [vmem:[%s1207_s20 + $0xa0] sm:$0xff] }
  0x3b   : > { %933 = vst [vmem:[%s1348_s26] sm:$0xff] %v932_v52   ;;  %v937_v61 = vpack.c.bf16 %v607_v16, %v606_v42  ;;  %v608_v17 = vsel %vm576_vm4, %v1241_v20, %v544_v53  ;;  %v1069_v63 = vpop.eup %1068  ;;  %v1379_v20 = vadd.f32 %v1212_v1, %v229_v62  ;;  %v1384_v14 = vadd.f32 %v1212_v1, %v230_v4 }
  0x3c   : > { %v609_v19 = vsel %vm577_vm5, %v1244_v21, %v545_v59  ;;  %v1071_v8 = vpop.eup %1070  ;;  %v546_v11 = vmul.f32 %v1069_v63, %v450_v27  ;;  %v454_v21 = vmul.f32 %v1324_v24, %v1281_v56  ;;  %v1387_v18 = vadd.f32 %v1212_v1, %v231_v6  ;;  %v196_v63 = vld [vmem:[%s1207_s20 + $0xb0] sm:$0xff] }
  0x3d   : > { %1009 = vst [vmem:[%s1348_s26 + $0x8] sm:$0xff] %v937_v61   ;;  %v942_v10 = vpack.c.bf16 %v609_v19, %v608_v17  ;;  %v1073_v12 = vpop.eup %1072  ;;  %v547_v13 = vmul.f32 %v1071_v8, %v451_v32  ;;  %v455_v27 = vmul.f32 %v1326_v25, %v1284_v58  ;;  %v300_v28 = vmin.f32 %v1379_v20, 20.0  ;;  %v195_v17 = vld [vmem:[%s1207_s20 + $0xa8] sm:$0xff]  ;;  %v197_v19 = vld [vmem:[%s1207_s20 + $0xb8] sm:$0xff] }
  0x3e   : > { %v1075_v22 = vpop.eup %1074  ;;  %v610_v23 = vsel %vm578_vm6, %v1258_v39, %v546_v11  ;;  %v548_v26 = vmul.f32 %v1073_v12, %v452_v33  ;;  %v301_v31 = vmin.f32 %v1384_v14, 20.0  ;;  %v1401_v32 = vadd.f32 %v1212_v1, %v232_v7  ;;  %v198_v7 = vld [vmem:[%s1207_s20 + $0xc0] sm:$0xff] }
  0x3f   : > { %1010 = vst [vmem:[%s1348_s26 + $0x10] sm:$0xff] %v942_v10   ;;  %v1077_v29 = vpop.eup %1076  ;;  %v611_v24 = vsel %vm579_vm7, %v1261_v40, %v547_v13  ;;  %v549_v30 = vmul.f32 %v1075_v22, %v453_v60  ;;  %v348_v35 = vmul.f32 1.442695, %v300_v28  ;;  %v302_v43 = vmin.f32 %v1387_v18, 20.0 }
  0x40   : > { %v1079_v34 = vpop.eup %1078  ;;  %v947_v39 = vpack.c.bf16 %v611_v24, %v610_v23  ;;  %v612_v25 = vsel %vm580_vm8, %v1270_v47, %v548_v26  ;;  %v392_v33 = vadd.f32 2.0, %v1077_v29  ;;  %v350_v41 = vmul.f32 1.442695, %v301_v31  ;;  %v199_v26 = vld [vmem:[%s1207_s20 + $0xc8] sm:$0xff] }
  0x41   : > { %v1081_v37 = vpop.eup %1080  ;;  %v613_v40 = vsel %vm581_vm9, %v1273_v49, %v549_v30  ;;  %v393_v38 = vadd.f32 2.0, %v1079_v34  ;;  %1088 = vpow2.f32 %v348_v35  ;;  %v303_v51 = vmin.f32 %v1401_v32, 20.0 }
  0x42   : > { %v1083_v44 = vpop.eup %1082  ;;  %1011 = vst [vmem:[%s1348_s26 + $0x18] sm:$0xff] %v947_v39   ;;  %v952_v45 = vpack.c.bf16 %v613_v40, %v612_v25  ;;  %v550_v46 = vmul.f32 %v1081_v37, %v454_v21  ;;  %v424_v36 = vmul.f32 %v1077_v29, %v392_v33  ;;  %1090 = vpow2.f32 %v350_v41 }
  0x43   : > { %v1085_v47 = vpop.eup %1084  ;;  %v551_v48 = vmul.f32 %v1083_v44, %v455_v27  ;;  %v425_v50 = vmul.f32 %v1079_v34, %v393_v38  ;;  %v233_v16 = vmul.f32 %v1202_v0, %v194_v15  ;;  %v352_v61 = vmul.f32 1.442695, %v302_v43 }
  0x44   : > { %v1087_v49 = vpop.eup %1086  ;;  %1012 = vst [vmem:[%s1348_s26 + $0x20] sm:$0xff] %v952_v45   ;;  %v614_v52 = vsel %vm582_vm10, %v1281_v56, %v550_v46  ;;  %v488_v42 = vadd.f32 2.0, %v424_v36  ;;  %v394_v53 = vadd.f32 2.0, %v1085_v47  ;;  %v354_v62 = vmul.f32 1.442695, %v303_v51 }
  0x45   : > { %v615_v54 = vsel %vm583_vm11, %v1284_v58, %v551_v48  ;;  %v489_v55 = vadd.f32 2.0, %v425_v50  ;;  %v395_v57 = vadd.f32 2.0, %v1087_v49  ;;  %v234_v58 = vmul.f32 %v1202_v0, %v195_v17 }
  0x46   : > { %v957_v59 = vpack.c.bf16 %v615_v54, %v614_v52  ;;  %1092 = vrcp.f32 %v488_v42  ;;  %v426_v60 = vmul.f32 %v1085_v47, %v394_v53  ;;  %v1428_v8 = vadd.f32 %v1212_v1, %v233_v16 }
  0x47   : > { %1094 = vrcp.f32 %v489_v55  ;;  %v427_v56 = vmul.f32 %v1087_v49, %v395_v57  ;;  %v235_v10 = vmul.f32 %v1202_v0, %v196_v63  ;;  %v236_v11 = vmul.f32 %v1202_v0, %v197_v19 }
  0x48   : > { %1013 = vst [vmem:[%s1348_s26 + $0x28] sm:$0xff] %v957_v59   ;;  %v490_v4 = vadd.f32 2.0, %v426_v60  ;;  %1096 = vpow2.f32 %v352_v61  ;;  %vm585_vm13 = vcmp.gt.f32.partialorder %v1294_v5, 20.0  ;;  %v1435_v12 = vadd.f32 %v1212_v1, %v234_v58  ;;  %v201_v58 = vld [vmem:[%s1207_s20 + $0xd8] sm:$0xff] }
  0x49   : > { %v491_v6 = vadd.f32 2.0, %v427_v56  ;;  %1098 = vpow2.f32 %v354_v62  ;;  %vm586_vm14 = vcmp.gt.f32.partialorder %v1314_v3, 20.0  ;;  %v304_v21 = vmin.f32 %v1428_v8, 20.0 }
  0x4a   : > { %1100 = vrcp.f32 %v490_v4  ;;  %v1440_v22 = vadd.f32 %v1212_v1, %v235_v10  ;;  %v1443_v23 = vadd.f32 %v1212_v1, %v236_v11  ;;  %v237_v27 = vmul.f32 %v1202_v0, %v198_v7 }
  0x4b   : > { %1102 = vrcp.f32 %v491_v6  ;;  %v1089_v13 = vpop.eup %1088  ;;  %v456_v29 = vmul.f32 %v424_v36, %v1291_v2  ;;  %v457_v24 = vmul.f32 %v425_v50, %v1294_v5  ;;  %vm587_vm15 = vcmp.gt.f32.partialorder %v1318_v9, 20.0  ;;  %v200_v6 = vld [vmem:[%s1207_s20 + $0xd0] sm:$0xff] }
  0x4c   : > { %v1091_v28 = vpop.eup %1090  ;;  %v396_v30 = vadd.f32 2.0, %v1089_v13  ;;  %v305_v31 = vmin.f32 %v1435_v12, 20.0  ;;  %v356_v39 = vmul.f32 1.442695, %v304_v21  ;;  %v306_v25 = vmin.f32 %v1440_v22, 20.0 }
  0x4d   : > { %v397_v34 = vadd.f32 2.0, %v1091_v28  ;;  %v307_v33 = vmin.f32 %v1443_v23, 20.0  ;;  %v458_v35 = vmul.f32 %v426_v60, %v1314_v3  ;;  %v238_v38 = vmul.f32 %v1202_v0, %v199_v26 }
  0x4e   : > { %v428_v37 = vmul.f32 %v1089_v13, %v396_v30  ;;  %v358_v40 = vmul.f32 1.442695, %v305_v31  ;;  %1104 = vpow2.f32 %v356_v39  ;;  %v360_v44 = vmul.f32 1.442695, %v306_v25  ;;  %v203_v30 = vld [vmem:[%s1207_s20 + $0xe8] sm:$0xff] }
  0x4f   : > { %v429_v43 = vmul.f32 %v1091_v28, %v397_v34  ;;  %v1456_v45 = vadd.f32 %v1212_v1, %v237_v27  ;;  %v362_v47 = vmul.f32 1.442695, %v307_v33  ;;  %v459_v51 = vmul.f32 %v427_v56, %v1318_v9  ;;  %v202_v28 = vld [vmem:[%s1207_s20 + $0xe0] sm:$0xff] }
  0x50   : > { %v1093_v41 = vpop.eup %1092  ;;  %v492_v15 = vadd.f32 2.0, %v428_v37  ;;  %1106 = vpow2.f32 %v358_v40  ;;  %v1463_v54 = vadd.f32 %v1212_v1, %v238_v38  ;;  %vm588_vm0 = vcmp.gt.f32.partialorder %v1379_v20, 20.0 }
  0x51   : > { %v1095_v46 = vpop.eup %1094  ;;  %v552_v36 = vmul.f32 %v1093_v41, %v456_v29  ;;  %v493_v49 = vadd.f32 2.0, %v429_v43  ;;  %1108 = vpow2.f32 %v360_v44  ;;  %v308_v59 = vmin.f32 %v1456_v45, 20.0 }
  0x52   : > { %v1097_v48 = vpop.eup %1096  ;;  %v553_v50 = vmul.f32 %v1095_v46, %v457_v24  ;;  %1110 = vrcp.f32 %v492_v15  ;;  %v309_v63 = vmin.f32 %v1463_v54, 20.0  ;;  %vm589_vm1 = vcmp.gt.f32.partialorder %v1384_v14, 20.0 }
  0x53   : > { %v1099_v52 = vpop.eup %1098  ;;  %v616_v42 = vsel %vm584_vm12, %v1291_v2, %v552_v36  ;;  %v398_v53 = vadd.f32 2.0, %v1097_v48  ;;  %1112 = vrcp.f32 %v493_v49  ;;  %v364_v19 = vmul.f32 1.442695, %v308_v59  ;;  %v204_v59 = vld [vmem:[%s1207_s20 + $0xf0] sm:$0xff] }
  0x54   : > { %v1101_v55 = vpop.eup %1100  ;;  %v617_v57 = vsel %vm585_vm13, %v1294_v5, %v553_v50  ;;  %v399_v16 = vadd.f32 2.0, %v1099_v52  ;;  %1114 = vpow2.f32 %v362_v47  ;;  %v366_v13 = vmul.f32 1.442695, %v309_v63 }
  0x55   : > { %v1103_v60 = vpop.eup %1102  ;;  %v962_v61 = vpack.c.bf16 %v617_v57, %v616_v42  ;;  %v554_v2 = vmul.f32 %v1101_v55, %v458_v35  ;;  %v430_v17 = vmul.f32 %v1097_v48, %v398_v53  ;;  %1116 = vpow2.f32 %v364_v19 }
  0x56   : > { %v555_v56 = vmul.f32 %v1103_v60, %v459_v51  ;;  %v431_v62 = vmul.f32 %v1099_v52, %v399_v16  ;;  %v460_v21 = vmul.f32 %v428_v37, %v1379_v20  ;;  %v239_v26 = vmul.f32 %v1202_v0, %v200_v6 }
  0x57   : > { %1014 = vst [vmem:[%s1348_s26 + $0x30] sm:$0xff] %v962_v61   ;;  %v618_v5 = vsel %vm586_vm14, %v1314_v3, %v554_v2  ;;  %v494_v4 = vadd.f32 2.0, %v430_v17  ;;  %v240_v27 = vmul.f32 %v1202_v0, %v201_v58  ;;  %v461_v29 = vmul.f32 %v429_v43, %v1384_v14 }
  0x58   : > { %v619_v7 = vsel %vm587_vm15, %v1318_v9, %v555_v56  ;;  %v495_v10 = vadd.f32 2.0, %v431_v62  ;;  %v1105_v3 = vpop.eup %1104  ;;  %vm590_vm2 = vcmp.gt.f32.partialorder %v1387_v18, 20.0  ;;  %vm591_vm3 = vcmp.gt.f32.partialorder %v1401_v32, 20.0 }
  0x59   : > { %v967_v11 = vpack.c.bf16 %v619_v7, %v618_v5  ;;  %1118 = vrcp.f32 %v494_v4  ;;  %v400_v24 = vadd.f32 2.0, %v1105_v3  ;;  %v1491_v39 = vadd.f32 %v1212_v1, %v239_v26 }
  0x5a   : > { %1120 = vrcp.f32 %v495_v10  ;;  %v1107_v9 = vpop.eup %1106  ;;  %v1494_v25 = vadd.f32 %v1212_v1, %v240_v27  ;;  %v462_v35 = vmul.f32 %v430_v17, %v1387_v18  ;;  %v241_v38 = vmul.f32 %v1202_v0, %v202_v28  ;;  %v205_v17 = vld [vmem:[%s1207_s20 + $0xf8] sm:$0xff] }
  0x5b   : > { %1015 = vst [vmem:[%s1348_s26 + $0x38] sm:$0xff] %v967_v11   ;;  %1122 = vpow2.f32 %v366_v13  ;;  %v1109_v31 = vpop.eup %1108  ;;  %v401_v34 = vadd.f32 2.0, %v1107_v9  ;;  %v432_v37 = vmul.f32 %v1105_v3, %v400_v24  ;;  %v310_v46 = vmin.f32 %v1491_v39, 20.0 }
  0x5c   : > { %v1111_v33 = vpop.eup %1110  ;;  %v402_v40 = vadd.f32 2.0, %v1109_v31  ;;  %v242_v36 = vmul.f32 %v1202_v0, %v203_v30  ;;  %v311_v51 = vmin.f32 %v1494_v25, 20.0  ;;  %v463_v52 = vmul.f32 %v431_v62, %v1401_v32 }
  0x5d   : > { %v1113_v41 = vpop.eup %1112  ;;  %v556_v43 = vmul.f32 %v1111_v33, %v460_v21  ;;  %v433_v44 = vmul.f32 %v1107_v9, %v401_v34  ;;  %v496_v48 = vadd.f32 2.0, %v432_v37  ;;  %v1509_v16 = vadd.f32 %v1212_v1, %v241_v38 }
  0x5e   : > { %v1115_v15 = vpop.eup %1114  ;;  %v557_v47 = vmul.f32 %v1113_v41, %v461_v29  ;;  %v434_v50 = vmul.f32 %v1109_v31, %v402_v40  ;;  %v370_v63 = vmul.f32 1.442695, %v311_v51  ;;  %v1514_v19 = vadd.f32 %v1212_v1, %v242_v36 }
  0x5f   : > { %v620_v49 = vsel %vm588_vm0, %v1379_v20, %v556_v43  ;;  %v497_v42 = vadd.f32 2.0, %v433_v44  ;;  %v403_v53 = vadd.f32 2.0, %v1115_v15  ;;  %1124 = vrcp.f32 %v496_v48  ;;  %v1117_v60 = vpop.eup %1116 }
  0x60   : > { %v621_v55 = vsel %vm589_vm1, %v1384_v14, %v557_v47  ;;  %v498_v57 = vadd.f32 2.0, %v434_v50  ;;  %v368_v20 = vmul.f32 1.442695, %v310_v46  ;;  %v404_v62 = vadd.f32 2.0, %v1117_v60 }
  0x61   : > { %v972_v61 = vpack.c.bf16 %v621_v55, %v620_v49  ;;  %1126 = vrcp.f32 %v497_v42  ;;  %v435_v2 = vmul.f32 %v1115_v15, %v403_v53  ;;  %v243_v6 = vmul.f32 %v1202_v0, %v204_v59 }
  0x62   : > { %1128 = vrcp.f32 %v498_v57  ;;  %v436_v10 = vmul.f32 %v1117_v60, %v404_v62  ;;  %v244_v11 = vmul.f32 %v1202_v0, %v205_v17  ;;  %v312_v21 = vmin.f32 %v1509_v16, 20.0 }
  0x63   : > { %v1119_v56 = vpop.eup %1118  ;;  %1016 = vst [vmem:[%s1348_s26 + $0x40] sm:$0xff] %v972_v61   ;;  %v499_v4 = vadd.f32 2.0, %v435_v2  ;;  %1130 = vpow2.f32 %v368_v20  ;;  %v313_v28 = vmin.f32 %v1514_v19, 20.0  ;;  %v464_v29 = vmul.f32 %v432_v37, %v1428_v8 }
  0x64   : > { %v1121_v14 = vpop.eup %1120  ;;  %v558_v5 = vmul.f32 %v1119_v56, %v462_v35  ;;  %1132 = vpow2.f32 %v370_v63  ;;  %v500_v27 = vadd.f32 2.0, %v436_v10  ;;  %v372_v24 = vmul.f32 1.442695, %v312_v21 }
  0x65   : > { %v1123_v58 = vpop.eup %1122  ;;  %v559_v7 = vmul.f32 %v1121_v14, %v463_v52  ;;  %1134 = vrcp.f32 %v499_v4  ;;  %v465_v30 = vmul.f32 %v433_v44, %v1435_v12  ;;  %v1530_v31 = vadd.f32 %v1212_v1, %v243_v6 }
  0x66   : > { %v622_v13 = vsel %vm590_vm2, %v1387_v18, %v558_v5  ;;  %v405_v3 = vadd.f32 2.0, %v1123_v58  ;;  %1136 = vrcp.f32 %v500_v27  ;;  %v374_v18 = vmul.f32 1.442695, %v313_v28 }
  0x67   : > { %v623_v26 = vsel %vm591_vm3, %v1401_v32, %v559_v7  ;;  %v466_v34 = vmul.f32 %v434_v50, %v1440_v22  ;;  %1138 = vpow2.f32 %v372_v24  ;;  %v1535_v32 = vadd.f32 %v1212_v1, %v244_v11 }
  0x68   : > { %v977_v9 = vpack.c.bf16 %v623_v26, %v622_v13  ;;  %v437_v0 = vmul.f32 %v1123_v58, %v405_v3  ;;  %vm592_vm4 = vcmp.gt.f32.partialorder %v1428_v8, 20.0  ;;  %1140 = vpow2.f32 %v374_v18 }
  0x69   : > { %v1125_v35 = vpop.eup %1124  ;;  %v314_v37 = vmin.f32 %v1530_v31, 20.0  ;;  %vm593_vm5 = vcmp.gt.f32.partialorder %v1435_v12, 20.0  ;;  %v315_v41 = vmin.f32 %v1535_v32, 20.0  ;;  %v467_v46 = vmul.f32 %v435_v2, %v1443_v23 }
  0x6a   : > { %1017 = vst [vmem:[%s1348_s26 + $0x48] sm:$0xff] %v977_v9   ;;  %v501_v33 = vadd.f32 2.0, %v437_v0  ;;  %v560_v38 = vmul.f32 %v1125_v35, %v464_v29  ;;  %vm594_vm6 = vcmp.gt.f32.partialorder %v1440_v22, 20.0  ;;  %vm595_vm7 = vcmp.gt.f32.partialorder %v1443_v23, 20.0 }
  0x6b   : > { %v1127_v40 = vpop.eup %1126  ;;  %v376_v36 = vmul.f32 1.442695, %v314_v37  ;;  %v378_v48 = vmul.f32 1.442695, %v315_v41  ;;  %v468_v53 = vmul.f32 %v436_v10, %v1456_v45  ;;  %v469_v2 = vmul.f32 %v437_v0, %v1463_v54 }
  0x6c   : > { %1142 = vrcp.f32 %v501_v33  ;;  %v1129_v43 = vpop.eup %1128  ;;  %v561_v44 = vmul.f32 %v1127_v40, %v465_v30  ;;  %v624_v15 = vsel %vm592_vm4, %v1428_v8, %v560_v38  ;;  %vm596_vm8 = vcmp.gt.f32.partialorder %v1456_v45, 20.0 }
  0x6d   : > { %v1131_v1 = vpop.eup %1130  ;;  %v562_v47 = vmul.f32 %v1129_v43, %v466_v34  ;;  %1144 = vpow2.f32 %v376_v36  ;;  %vm597_vm9 = vcmp.gt.f32.partialorder %v1463_v54, 20.0  ;;  %vm598_vm10 = vcmp.gt.f32.partialorder %v1491_v39, 20.0 }
  0x6e   : > { %v1133_v50 = vpop.eup %1132  ;;  %v625_v51 = vsel %vm593_vm5, %v1435_v12, %v561_v44  ;;  %v406_v49 = vadd.f32 2.0, %v1131_v1  ;;  %1146 = vpow2.f32 %v378_v48  ;;  %vm599_vm11 = vcmp.gt.f32.partialorder %v1494_v25, 20.0 }
  0x6f   : > { %v1135_v52 = vpop.eup %1134  ;;  %v982_v42 = vpack.c.bf16 %v625_v51, %v624_v15  ;;  %v407_v55 = vadd.f32 2.0, %v1133_v50  ;;  %v626_v8 = vsel %vm594_vm6, %v1440_v22, %v562_v47  ;;  %vm600_vm12 = vcmp.gt.f32.partialorder %v1509_v16, 20.0 }
  0x70   : > { %v563_v57 = vmul.f32 %v1135_v52, %v467_v46  ;;  %v438_v59 = vmul.f32 %v1131_v1, %v406_v49  ;;  %v1137_v61 = vpop.eup %1136  ;;  %vm601_vm13 = vcmp.gt.f32.partialorder %v1514_v19, 20.0  ;;  %vm602_vm14 = vcmp.gt.f32.partialorder %v1530_v31, 20.0 }
  0x71   : > { %1018 = vst [vmem:[%s1348_s26 + $0x50] sm:$0xff] %v982_v42   ;;  %v439_v60 = vmul.f32 %v1133_v50, %v407_v55  ;;  %v1139_v17 = vpop.eup %1138  ;;  %v564_v62 = vmul.f32 %v1137_v61, %v468_v53  ;;  %vm603_vm15 = vcmp.gt.f32.partialorder %v1535_v32, 20.0 }
  0x72   : > { %v627_v12 = vsel %vm595_vm7, %v1443_v23, %v563_v57  ;;  %v502_v20 = vadd.f32 2.0, %v438_v59  ;;  %v1141_v14 = vpop.eup %1140  ;;  %v408_v5 = vadd.f32 2.0, %v1139_v17  ;;  %v470_v9 = vmul.f32 %v438_v59, %v1491_v39 }
  0x73   : > { %v987_v56 = vpack.c.bf16 %v627_v12, %v626_v8  ;;  %v503_v63 = vadd.f32 2.0, %v439_v60  ;;  %v409_v4 = vadd.f32 2.0, %v1141_v14  ;;  %v628_v6 = vsel %vm596_vm8, %v1456_v45, %v564_v62 }
  0x74   : > { %1148 = vrcp.f32 %v502_v20  ;;  %v440_v58 = vmul.f32 %v1139_v17, %v408_v5  ;;  %v471_v0 = vmul.f32 %v439_v60, %v1494_v25 }
  0x75   : > { %1019 = vst [vmem:[%s1348_s26 + $0x58] sm:$0xff] %v987_v56   ;;  %1150 = vrcp.f32 %v503_v63  ;;  %v441_v7 = vmul.f32 %v1141_v14, %v409_v4 }
  0x76   : > { %v1143_v22 = vpop.eup %1142  ;;  %v504_v13 = vadd.f32 2.0, %v440_v58  ;;  %v472_v37 = vmul.f32 %v440_v58, %v1509_v16 }
  0x77   : > { %v565_v23 = vmul.f32 %v1143_v22, %v469_v2  ;;  %v1145_v10 = vpop.eup %1144  ;;  %v505_v26 = vadd.f32 2.0, %v441_v7  ;;  %v473_v38 = vmul.f32 %v441_v7, %v1514_v19 }
  0x78   : > { %v1147_v3 = vpop.eup %1146  ;;  %v410_v27 = vadd.f32 2.0, %v1145_v10  ;;  %1152 = vrcp.f32 %v504_v13 }
  0x79   : > { %v629_v11 = vsel %vm597_vm9, %v1463_v54, %v565_v23  ;;  %v411_v28 = vadd.f32 2.0, %v1147_v3  ;;  %1154 = vrcp.f32 %v505_v26 }
  0x7a   : > { %v992_v21 = vpack.c.bf16 %v629_v11, %v628_v6  ;;  %v442_v29 = vmul.f32 %v1145_v10, %v410_v27 }
  0x7b   : > { %v443_v45 = vmul.f32 %v1147_v3, %v411_v28 }
  0x7c   : > { %1020 = vst [vmem:[%s1348_s26 + $0x60] sm:$0xff] %v992_v21   ;;  %v506_v24 = vadd.f32 2.0, %v442_v29 }
  0x7d   : > { %v507_v54 = vadd.f32 2.0, %v443_v45 }
  0x7e   : > { %v1149_v30 = vpop.eup %1148  ;;  %1156 = vrcp.f32 %v506_v24 }
  0x7f   : > { %v1151_v18 = vpop.eup %1150  ;;  %v566_v34 = vmul.f32 %v1149_v30, %v470_v9  ;;  %1158 = vrcp.f32 %v507_v54 }
  0x80   : > { %v567_v33 = vmul.f32 %v1151_v18, %v471_v0 }
  0x81   : > { %v630_v35 = vsel %vm598_vm10, %v1491_v39, %v566_v34  ;;  %v474_v39 = vmul.f32 %v442_v29, %v1530_v31 }
  0x82   : > { %v631_v40 = vsel %vm599_vm11, %v1494_v25, %v567_v33  ;;  %v1153_v43 = vpop.eup %1152  ;;  %v475_v25 = vmul.f32 %v443_v45, %v1535_v32 }
  0x83   : > { %v997_v41 = vpack.c.bf16 %v631_v40, %v630_v35  ;;  %v1155_v44 = vpop.eup %1154  ;;  %v568_v46 = vmul.f32 %v1153_v43, %v472_v37 }
  0x84   : > { %v569_v36 = vmul.f32 %v1155_v44, %v473_v38 }
  0x85   : > { %1021 = vst [vmem:[%s1348_s26 + $0x68] sm:$0xff] %v997_v41   ;;  %v632_v1 = vsel %vm600_vm12, %v1509_v16, %v568_v46 }
  0x86   : > { %v633_v15 = vsel %vm601_vm13, %v1514_v19, %v569_v36 }
  0x87   : > { %v1002_v48 = vpack.c.bf16 %v633_v15, %v632_v1 }
  0x88   : > { %v1157_v47 = vpop.eup %1156 }
  0x89   : > { %v1159_v50 = vpop.eup %1158  ;;  %v570_v51 = vmul.f32 %v1157_v47, %v474_v39  ;;  %1022 = vst [vmem:[%s1348_s26 + $0x70] sm:$0xff] %v1002_v48  }
  0x8a   : > { %v571_v49 = vmul.f32 %v1159_v50, %v475_v25 }
  0x8b   : > { %v634_v52 = vsel %vm602_vm14, %v1530_v31, %v570_v51 }
  0x8c   : > { %v635_v42 = vsel %vm603_vm15, %v1535_v32, %v571_v49 }
  0x8d   : > { %v1007_v53 = vpack.c.bf16 %v635_v42, %v634_v52 }
  0x8f   : > { %1023 = vst [vmem:[%s1348_s26 + $0x78] sm:$0xff] %v1007_v53  }
  0x90 PF: > { %s13_s12 = sadd.s32 1, %s1166_s12  }
  0x91   : > { %p10_p4 = scmp.ge.s32.totalorder %s13_s12, 4  }
  0x93   :  { %12 = sbr.rel (!%p10_p4) target bundleno = 1 (0x1), region = 62 }

// kernel: resnet_forward.6
= control target key start
LH: loop header
LB: loop body
LE: loop exit
PB: predicated region body
PF: predicated region fallthrough
CT: control target
= control target key end

     0   :  { %s1001_s15 = smov 0   ;;  %s1240_s0 = inlined_call_operand.vmem [shape: bf16[512,72], index: 0, kind: input, shape index: {}]   ;;  %s1241_s1 = inlined_call_operand.vmem [shape: bf16[72,128], index: 1, kind: input, shape index: {}]   ;;  %s1242_s2 = inlined_call_operand.vmem [shape: f32[1,128], index: 2, kind: input, shape index: {}]   ;;  %s1243_s3 = inlined_call_operand.vmem [shape: f32[512,128], index: 3, kind: output, shape index: {0}]   ;;  %s1244_s4 = inlined_call_operand.vmem [shape: f32[2,8,128], index: 4, kind: output, shape index: {1}]  }
   0x1 LB: > { %s1007_s16 = sadd.s32 4294967295, %s974_s15   ;;  %p818_p0 = scmp.ge.s32.totalorder %s974_s15, 1  ;;  %s974_s15 = sphi %s1001_s15, %s15_s15  }
   0x2   : > { %p166_p1 = scmp.lt.s32.totalorder %s974_s15, 3 }
   0x4   : > { %p167_p2 = pnand %p818_p0, %p166_p1 }
   0x5   : > { %v947_v0 = vld [vmem:[%s1241_s1] sm:$0xff] (!%p167_p2)   ;;  %v948_v1 = vld [vmem:[%s1241_s1 + $0x8] sm:$0xff] (!%p167_p2)   ;;  %s819_s21 = sshll.u32 (!%p167_p2), %s1007_s16, 5  ;;  %v949_v2 = vld [vmem:[%s1241_s1 + $0x10] sm:$0xff] (!%p167_p2)   ;;  %vm368_vm0 = vcmask (!%p167_p2), 588800   ;;  %vm417_vm1 = vcmask (!%p167_p2), 1043456  }
   0x6   : > { %170 = sbr.rel (%p167_p2) target bundleno = 322 (0x142), region = 32  ;;  %885 = vmatprep.subr.bf16.mxu0 (!%p167_p2), %v947_v0  ;;  %p197_p3 = scmp.lt.s32.totalorder (!%p167_p2), %s819_s21, 63  ;;  %927 = vmatprep.subr.bf16.mxu1 (!%p167_p2), %v947_v0  ;;  %v950_v3 = vld [vmem:[%s1241_s1 + $0x18] sm:$0xff] (!%p167_p2)   ;;  %v951_v5 = vld [vmem:[%s1241_s1 + $0x20] ss:$0 sps:$4 sm:$0xff] (!%p167_p2)  }
   0x7   : > { %886 = vmatpush3.bf16.msra.mxu0 (!%p167_p2), %v947_v0  ;;  %932 = vmatpush3.bf16.msra.mxu1 (!%p167_p2), %v947_v0  ;;  %v419_v6 = vsel (!%p167_p2), %vm417_vm1, %v951_v5, 0  ;;  %v1071_v22 = vld [vmem:[%s1242_s2] ss:$0 sm:$0xff] (!%p167_p2)  ;;  %p208_p4 = scmp.lt.s32.totalorder (!%p167_p2), %s1007_s16, 1 }
   0x8   : > { %887 = vmatprep.subr.bf16.mxu0 (!%p167_p2), %v948_v1  ;;  %928 = vmatprep.subr.bf16.mxu1 (!%p167_p2), %v948_v1 }
   0xb   : > { %888 = vmatpush3.bf16.msra.mxu0 (!%p167_p2), %v948_v1  ;;  %933 = vmatpush3.bf16.msra.mxu1 (!%p167_p2), %v948_v1 }
   0xc   : > { %889 = vmatprep.subr.bf16.mxu0 (!%p167_p2), %v949_v2  ;;  %929 = vmatprep.subr.bf16.mxu1 (!%p167_p2), %v949_v2 }
   0xd   : > { %s1246_s21 = smov (!%p197_p3, %s819_s21), 63  ;;  %s1248_s16 = smov (!%p208_p4, %s1007_s16), 1 }
   0xe   : > { %s820_s24 = sshll.u32 %s1246_s21, 2  ;;  %s822_s6 = sshll.u32 %s1246_s21, 3 }
   0xf   : > { %s1030_s29 = scalar_lea.vmem %s1240_s0, %s820_s24  ;;  %890 = vmatpush3.bf16.msra.mxu0 %v949_v2  ;;  %934 = vmatpush3.bf16.msra.mxu1 %v949_v2  ;;  %s1076_s11 = scalar_lea.vmem %s1243_s3, %s822_s6 }
  0x10   : > { %v952_v4 = vld [vmem:[%s1030_s29] sm:$0xff]   ;;  %891 = vmatprep.subr.bf16.mxu0 %v950_v3  ;;  %930 = vmatprep.subr.bf16.mxu1 %v950_v3  ;;  %v953_v7 = vld [vmem:[%s1030_s29 + $0x8] sm:$0xff]   ;;  %v954_v9 = vld [vmem:[%s1030_s29 + $0x10] sm:$0xff]   ;;  %s823_s12 = sshll.u32 %s1248_s16, 3 }
  0x11   : > { %895 = vmatprep.mubr.msk.bf16.mxu0 %vm368_vm0, %v952_v4  ;;  %v960_v8 = vld [vmem:[%s1030_s29 + $0x40] sm:$0xff]   ;;  %v961_v10 = vld [vmem:[%s1030_s29 + $0x48] sm:$0xff]   ;;  %v962_v11 = vld [vmem:[%s1030_s29 + $0x50] sm:$0xff]   ;;  %s211_s17 = scalar_lea.vmem %s1244_s4, %s823_s12 }
  0x12   : > { %911 = vmatprep.mubr.msk.bf16.mxu1 %vm368_vm0, %v960_v8  ;;  %v955_v12 = vld [vmem:[%s1030_s29 + $0x18] sm:$0xff]   ;;  %v956_v14 = vld [vmem:[%s1030_s29 + $0x20] sm:$0xff]   ;;  %v957_v16 = vld [vmem:[%s1030_s29 + $0x28] sm:$0xff]  }
  0x13   : > { %892 = vmatpush3.bf16.msra.mxu0 %v950_v3  ;;  %935 = vmatpush3.bf16.msra.mxu1 %v950_v3  ;;  %v963_v13 = vld [vmem:[%s1030_s29 + $0x58] sm:$0xff]   ;;  %v964_v15 = vld [vmem:[%s1030_s29 + $0x60] sm:$0xff]   ;;  %v965_v17 = vld [vmem:[%s1030_s29 + $0x68] sm:$0xff]  }
  0x14   : > { %937 = vmatprep.subr.msk.bf16.mxu0 %vm417_vm1, %v951_v5  ;;  %938 = vmatprep.subr.msk.bf16.mxu1 %vm417_vm1, %v951_v5  ;;  %v958_v18 = vld [vmem:[%s1030_s29 + $0x30] sm:$0xff]   ;;  %v959_v20 = vld [vmem:[%s1030_s29 + $0x38] sm:$0xff]  }
  0x15   : > { %v966_v19 = vld [vmem:[%s1030_s29 + $0x70] sm:$0xff]   ;;  %v967_v21 = vld [vmem:[%s1030_s29 + $0x78] sm:$0xff]  }
  0x17   : > { %894 = vmatpush3.bf16.msra.mxu0 %v419_v6  ;;  %936 = vmatpush3.bf16.msra.mxu1 %v419_v6 }
  0x1a   : > { %896 = vmatmul.mubr.msk.bf16.vlgmr.msra.gmra.mrb[0].mxu0 %vm368_vm0, %v953_v7  ;;  %912 = vmatmul.mubr.msk.bf16.vlgmr.msra.gmra.mrb[0].mxu1 %vm368_vm0, %v961_v10 }
  0x1b   : > { %899 = vmatprep.mubr.msk.bf16.mxu0 %vm368_vm0, %v954_v9  ;;  %915 = vmatprep.mubr.msk.bf16.mxu1 %vm368_vm0, %v962_v11 }
  0x22   : > { %900 = vmatmul.mubr.msk.bf16.gmra.mrb[4].mxu0 %vm368_vm0, %v955_v12  ;;  %916 = vmatmul.mubr.msk.bf16.gmra.mrb[4].mxu1 %vm368_vm0, %v963_v13 }
  0x23   : > { %903 = vmatprep.mubr.msk.bf16.mxu0 %vm368_vm0, %v956_v14  ;;  %919 = vmatprep.mubr.msk.bf16.mxu1 %vm368_vm0, %v964_v15 }
  0x2a   : > { %904 = vmatmul.mubr.msk.bf16.gmra.mrb[8].mxu0 %vm368_vm0, %v957_v16  ;;  %920 = vmatmul.mubr.msk.bf16.gmra.mrb[8].mxu1 %vm368_vm0, %v965_v17 }
  0x2b   : > { %907 = vmatprep.mubr.msk.bf16.mxu0 %vm368_vm0, %v958_v18  ;;  %923 = vmatprep.mubr.msk.bf16.mxu1 %vm368_vm0, %v966_v19 }
  0x32   : > { %908 = vmatmul.mubr.msk.bf16.gmra.mrb[12].mxu0 %vm368_vm0, %v959_v20  ;;  %924 = vmatmul.mubr.msk.bf16.gmra.mrb[12].mxu1 %vm368_vm0, %v967_v21 }
  0xed   : > { %v897_v23 = vpop.f32.mrb[0].mxu0  ;;  %v913_v24 = vpop.f32.mrb[0].mxu1 }
  0xee   : > { %v464_v25 = vadd.f32 %v897_v23, %v1071_v22  ;;  %v455_v26 = vpop.f32.mrb[1].mxu0  ;;  %v1080_v27 = vadd.f32 %v913_v24, %v1071_v22  ;;  %v519_v28 = vpop.f32.mrb[1].mxu1 }
  0xef   : > { %v456_v29 = vadd.f32 %v1071_v22, %v455_v26  ;;  %v898_v30 = vpop.f32.mrb[2].mxu0  ;;  %v1084_v31 = vadd.f32 %v1071_v22, %v519_v28  ;;  %v914_v32 = vpop.f32.mrb[2].mxu1 }
  0xf0   : > { %584 = vst [vmem:[%s1076_s11 + $0x10] sm:$0xff] %v464_v25  ;;  %v467_v33 = vadd.f32 %v898_v30, %v1071_v22  ;;  %v458_v34 = vpop.f32.mrb[3].mxu0  ;;  %600 = vst [vmem:[%s1076_s11 + $0x90] sm:$0xff] %v1080_v27  ;;  %v1091_v35 = vadd.f32 %v914_v32, %v1071_v22  ;;  %v522_v36 = vpop.f32.mrb[3].mxu1  ;;  %v653_v42 = vmul.f32 %v464_v25, %v464_v25 }
  0xf1   : > { %582 = vst [vmem:[%s1076_s11] sm:$0xff] %v456_v29  ;;  %v459_v37 = vadd.f32 %v1071_v22, %v458_v34  ;;  %598 = vst [vmem:[%s1076_s11 + $0x80] sm:$0xff] %v1084_v31  ;;  %v1098_v38 = vadd.f32 %v1071_v22, %v522_v36  ;;  %v651_v39 = vmul.f32 %v456_v29, %v456_v29 }
  0xf2   : > { %585 = vst [vmem:[%s1076_s11 + $0x18] sm:$0xff] %v467_v33  ;;  %601 = vst [vmem:[%s1076_s11 + $0x98] sm:$0xff] %v1091_v35  ;;  %v654_v47 = vmul.f32 %v467_v33, %v467_v33 }
  0xf3   : > { %583 = vst [vmem:[%s1076_s11 + $0x8] sm:$0xff] %v459_v37  ;;  %v614_v40 = vadd.f32 %v459_v37, %v456_v29  ;;  %v652_v41 = vmul.f32 %v459_v37, %v459_v37  ;;  %599 = vst [vmem:[%s1076_s11 + $0x88] sm:$0xff] %v1098_v38 }
  0xf5   : > { %v615_v43 = vadd.f32 %v614_v40, %v464_v25  ;;  %v683_v44 = vadd.f32 %v652_v41, %v651_v39  ;;  %v901_v45 = vpop.f32.mrb[4].mxu0  ;;  %v917_v46 = vpop.f32.mrb[4].mxu1 }
  0xf6   : > { %v480_v48 = vadd.f32 %v901_v45, %v1071_v22  ;;  %v471_v49 = vpop.f32.mrb[5].mxu0  ;;  %v1108_v50 = vadd.f32 %v917_v46, %v1071_v22  ;;  %v535_v51 = vpop.f32.mrb[5].mxu1 }
  0xf7   : > { %v684_v52 = vadd.f32 %v683_v44, %v653_v42  ;;  %v472_v53 = vadd.f32 %v1071_v22, %v471_v49  ;;  %v616_v54 = vadd.f32 %v615_v43, %v467_v33  ;;  %v902_v55 = vpop.f32.mrb[6].mxu0  ;;  %v1112_v56 = vadd.f32 %v1071_v22, %v535_v51  ;;  %v918_v57 = vpop.f32.mrb[6].mxu1 }
  0xf8   : > { %588 = vst [vmem:[%s1076_s11 + $0x30] sm:$0xff] %v480_v48  ;;  %v483_v58 = vadd.f32 %v902_v55, %v1071_v22  ;;  %v474_v59 = vpop.f32.mrb[7].mxu0  ;;  %604 = vst [vmem:[%s1076_s11 + $0xb0] sm:$0xff] %v1108_v50  ;;  %v1119_v60 = vadd.f32 %v918_v57, %v1071_v22  ;;  %v538_v61 = vpop.f32.mrb[7].mxu1  ;;  %v657_v6 = vmul.f32 %v480_v48, %v480_v48 }
  0xf9   : > { %586 = vst [vmem:[%s1076_s11 + $0x20] sm:$0xff] %v472_v53  ;;  %v617_v62 = vadd.f32 %v616_v54, %v472_v53  ;;  %v655_v63 = vmul.f32 %v472_v53, %v472_v53  ;;  %v685_v0 = vadd.f32 %v684_v52, %v654_v47  ;;  %v475_v1 = vadd.f32 %v1071_v22, %v474_v59 }
  0xfa   : > { %602 = vst [vmem:[%s1076_s11 + $0xa0] sm:$0xff] %v1112_v56  ;;  %589 = vst [vmem:[%s1076_s11 + $0x38] sm:$0xff] %v483_v58  ;;  %v1129_v2 = vadd.f32 %v1071_v22, %v538_v61  ;;  %v658_v11 = vmul.f32 %v483_v58, %v483_v58 }
  0xfb   : > { %605 = vst [vmem:[%s1076_s11 + $0xb8] sm:$0xff] %v1119_v60  ;;  %v686_v3 = vadd.f32 %v685_v0, %v655_v63  ;;  %587 = vst [vmem:[%s1076_s11 + $0x28] sm:$0xff] %v475_v1  ;;  %v618_v4 = vadd.f32 %v617_v62, %v475_v1  ;;  %v656_v5 = vmul.f32 %v475_v1, %v475_v1 }
  0xfc   : > { %603 = vst [vmem:[%s1076_s11 + $0xa8] sm:$0xff] %v1129_v2 }
  0xfd   : > { %v619_v7 = vadd.f32 %v618_v4, %v480_v48  ;;  %v687_v8 = vadd.f32 %v686_v3, %v656_v5  ;;  %v905_v9 = vpop.f32.mrb[8].mxu0  ;;  %v921_v10 = vpop.f32.mrb[8].mxu1 }
  0xfe   : > { %v496_v12 = vadd.f32 %v905_v9, %v1071_v22  ;;  %v487_v13 = vpop.f32.mrb[9].mxu0  ;;  %v1136_v14 = vadd.f32 %v921_v10, %v1071_v22  ;;  %v551_v15 = vpop.f32.mrb[9].mxu1 }
  0xff   : > { %v688_v16 = vadd.f32 %v687_v8, %v657_v6  ;;  %v488_v17 = vadd.f32 %v1071_v22, %v487_v13  ;;  %v620_v18 = vadd.f32 %v619_v7, %v483_v58  ;;  %v906_v19 = vpop.f32.mrb[10].mxu0  ;;  %v1140_v20 = vadd.f32 %v1071_v22, %v551_v15  ;;  %v922_v21 = vpop.f32.mrb[10].mxu1 }
 0x100   : > { %592 = vst [vmem:[%s1076_s11 + $0x50] sm:$0xff] %v496_v12  ;;  %v499_v23 = vadd.f32 %v906_v19, %v1071_v22  ;;  %v490_v24 = vpop.f32.mrb[11].mxu0  ;;  %608 = vst [vmem:[%s1076_s11 + $0xd0] sm:$0xff] %v1136_v14  ;;  %v1147_v25 = vadd.f32 %v922_v21, %v1071_v22  ;;  %v554_v26 = vpop.f32.mrb[11].mxu1  ;;  %v661_v39 = vmul.f32 %v496_v12, %v496_v12 }
 0x101   : > { %590 = vst [vmem:[%s1076_s11 + $0x40] sm:$0xff] %v488_v17  ;;  %v621_v28 = vadd.f32 %v620_v18, %v488_v17  ;;  %v659_v29 = vmul.f32 %v488_v17, %v488_v17  ;;  %v689_v30 = vadd.f32 %v688_v16, %v658_v11  ;;  %v491_v32 = vadd.f32 %v1071_v22, %v490_v24 }
 0x102   : > { %606 = vst [vmem:[%s1076_s11 + $0xc0] sm:$0xff] %v1140_v20  ;;  %593 = vst [vmem:[%s1076_s11 + $0x58] sm:$0xff] %v499_v23  ;;  %v1157_v33 = vadd.f32 %v1071_v22, %v554_v26  ;;  %v662_v44 = vmul.f32 %v499_v23, %v499_v23  ;;  %v667_v13 = vmul.f32 %v1084_v31, %v1084_v31 }
 0x103   : > { %609 = vst [vmem:[%s1076_s11 + $0xd8] sm:$0xff] %v1147_v25  ;;  %v690_v34 = vadd.f32 %v689_v30, %v659_v29  ;;  %591 = vst [vmem:[%s1076_s11 + $0x48] sm:$0xff] %v491_v32  ;;  %v622_v36 = vadd.f32 %v621_v28, %v491_v32  ;;  %v660_v37 = vmul.f32 %v491_v32, %v491_v32 }
 0x104   : > { %607 = vst [vmem:[%s1076_s11 + $0xc8] sm:$0xff] %v1157_v33  ;;  %v668_v18 = vmul.f32 %v1098_v38, %v1098_v38  ;;  %v669_v19 = vmul.f32 %v1080_v27, %v1080_v27  ;;  %v670_v24 = vmul.f32 %v1091_v35, %v1091_v35 }
 0x105   : > { %v623_v40 = vadd.f32 %v622_v36, %v496_v12  ;;  %v691_v41 = vadd.f32 %v690_v34, %v660_v37  ;;  %v909_v42 = vpop.f32.mrb[12].mxu0  ;;  %v925_v43 = vpop.f32.mrb[12].mxu1  ;;  %v672_v34 = vmul.f32 %v1129_v2, %v1129_v2 }
 0x106   : > { %v512_v45 = vadd.f32 %v909_v42, %v1071_v22  ;;  %v503_v46 = vpop.f32.mrb[13].mxu0  ;;  %v1164_v47 = vadd.f32 %v925_v43, %v1071_v22  ;;  %v567_v48 = vpop.f32.mrb[13].mxu1 }
 0x107   : > { %v692_v49 = vadd.f32 %v691_v41, %v661_v39  ;;  %v504_v51 = vadd.f32 %v1071_v22, %v503_v46  ;;  %v624_v52 = vadd.f32 %v623_v40, %v499_v23  ;;  %v910_v53 = vpop.f32.mrb[14].mxu0  ;;  %v1168_v54 = vadd.f32 %v1071_v22, %v567_v48  ;;  %v926_v55 = vpop.f32.mrb[14].mxu1 }
 0x108   : > { %596 = vst [vmem:[%s1076_s11 + $0x70] sm:$0xff] %v512_v45  ;;  %v515_v57 = vadd.f32 %v910_v53, %v1071_v22  ;;  %v506_v58 = vpop.f32.mrb[15].mxu0  ;;  %612 = vst [vmem:[%s1076_s11 + $0xf0] sm:$0xff] %v1164_v47  ;;  %v1175_v59 = vadd.f32 %v926_v55, %v1071_v22  ;;  %v570_v61 = vpop.f32.mrb[15].mxu1  ;;  %v665_v7 = vmul.f32 %v512_v45, %v512_v45 }
 0x109   : > { %594 = vst [vmem:[%s1076_s11 + $0x60] sm:$0xff] %v504_v51  ;;  %v625_v62 = vadd.f32 %v624_v52, %v504_v51  ;;  %v663_v63 = vmul.f32 %v504_v51, %v504_v51  ;;  %v693_v0 = vadd.f32 %v692_v49, %v662_v44  ;;  %v507_v1 = vadd.f32 %v1071_v22, %v506_v58 }
 0x10a   : > { %610 = vst [vmem:[%s1076_s11 + $0xe0] sm:$0xff] %v1168_v54  ;;  %597 = vst [vmem:[%s1076_s11 + $0x78] sm:$0xff] %v515_v57  ;;  %v571_v3 = vadd.f32 %v1071_v22, %v570_v61  ;;  %v666_v10 = vmul.f32 %v515_v57, %v515_v57  ;;  %v676_v44 = vmul.f32 %v1157_v33, %v1157_v33 }
 0x10b   : > { %613 = vst [vmem:[%s1076_s11 + $0xf8] sm:$0xff] %v1175_v59  ;;  %v694_v4 = vadd.f32 %v693_v0, %v663_v63  ;;  %595 = vst [vmem:[%s1076_s11 + $0x68] sm:$0xff] %v507_v1  ;;  %v626_v5 = vadd.f32 %v625_v62, %v507_v1  ;;  %v664_v6 = vmul.f32 %v507_v1, %v507_v1 }
 0x10c   : > { %611 = vst [vmem:[%s1076_s11 + $0xe8] sm:$0xff] %v571_v3  ;;  %v679_v49 = vmul.f32 %v1168_v54, %v1168_v54  ;;  %v680_v55 = vmul.f32 %v571_v3, %v571_v3  ;;  %v682_v61 = vmul.f32 %v1175_v59, %v1175_v59 }
 0x10d   : > { %v627_v8 = vadd.f32 %v626_v5, %v512_v45  ;;  %v695_v9 = vadd.f32 %v694_v4, %v664_v6  ;;  %v720_v4 = vlaneseq }
 0x10f   : > { %v696_v11 = vadd.f32 %v695_v9, %v665_v7  ;;  %v628_v12 = vadd.f32 %v627_v8, %v515_v57  ;;  %v721_v8 = vshrl.u32 %v720_v4, 7 }
 0x111   : > { %v629_v15 = vadd.f32 %v628_v12, %v1084_v31  ;;  %v697_v16 = vadd.f32 %v696_v11, %v666_v10  ;;  %v671_v31 = vmul.f32 %v1112_v56, %v1112_v56  ;;  %vm723_vm2 = vcmp.eq.s32.totalorder %v721_v8, 1 }
 0x112   : > { %vm722_vm3 = vcmp.eq.s32.totalorder %v721_v8, 0 }
 0x113   : > { %v698_v17 = vadd.f32 %v697_v16, %v667_v13  ;;  %v630_v22 = vadd.f32 %v629_v15, %v1098_v38 }
 0x115   : > { %v631_v21 = vadd.f32 %v630_v22, %v1080_v27  ;;  %v699_v23 = vadd.f32 %v698_v17, %v668_v18  ;;  %v673_v27 = vmul.f32 %v1108_v50, %v1108_v50 }
 0x117   : > { %v700_v26 = vadd.f32 %v699_v23, %v669_v19  ;;  %v632_v28 = vadd.f32 %v631_v21, %v1091_v35  ;;  %v674_v35 = vmul.f32 %v1119_v60, %v1119_v60 }
 0x119   : > { %v633_v29 = vadd.f32 %v632_v28, %v1112_v56  ;;  %v701_v30 = vadd.f32 %v700_v26, %v670_v24  ;;  %v675_v56 = vmul.f32 %v1140_v20, %v1140_v20 }
 0x11b   : > { %v702_v32 = vadd.f32 %v701_v30, %v671_v31  ;;  %v634_v38 = vadd.f32 %v633_v29, %v1129_v2 }
 0x11d   : > { %v635_v36 = vadd.f32 %v634_v38, %v1108_v50  ;;  %v703_v37 = vadd.f32 %v702_v32, %v672_v34  ;;  %v677_v50 = vmul.f32 %v1136_v14, %v1136_v14 }
 0x11f   : > { %v704_v39 = vadd.f32 %v703_v37, %v673_v27  ;;  %v636_v40 = vadd.f32 %v635_v36, %v1119_v60  ;;  %v678_v60 = vmul.f32 %v1147_v25, %v1147_v25 }
 0x121   : > { %v637_v41 = vadd.f32 %v636_v40, %v1140_v20  ;;  %v705_v42 = vadd.f32 %v704_v39, %v674_v35 }
 0x123   : > { %v706_v43 = vadd.f32 %v705_v42, %v675_v56  ;;  %v638_v2 = vadd.f32 %v637_v41, %v1157_v33 }
 0x125   : > { %v639_v45 = vadd.f32 %v638_v2, %v1136_v14  ;;  %v707_v46 = vadd.f32 %v706_v43, %v676_v44  ;;  %v681_v14 = vmul.f32 %v1164_v47, %v1164_v47 }
 0x127   : > { %v708_v48 = vadd.f32 %v707_v46, %v677_v50  ;;  %v640_v20 = vadd.f32 %v639_v45, %v1147_v25 }
 0x129   : > { %v641_v51 = vadd.f32 %v640_v20, %v1168_v54  ;;  %v709_v52 = vadd.f32 %v708_v48, %v678_v60 }
 0x12b   : > { %v710_v33 = vadd.f32 %v709_v52, %v679_v49  ;;  %v642_v53 = vadd.f32 %v641_v51, %v571_v3 }
 0x12d   : > { %v643_v57 = vadd.f32 %v642_v53, %v1164_v47  ;;  %v711_v58 = vadd.f32 %v710_v33, %v680_v55 }
 0x12f   : > { %v644_v25 = vadd.f32 %v643_v57, %v1175_v59  ;;  %v712_v62 = vadd.f32 %v711_v58, %v681_v14 }
 0x131   : > { %v645_v63 = vrot.slane %v644_v25, 4  ;;  %v713_v0 = vadd.f32 %v712_v62, %v682_v61 }
 0x133   : > { %v646_v54 = vadd.f32 %v645_v63, %v644_v25  ;;  %v714_v1 = vrot.slane %v713_v0, 4 }
 0x135   : > { %v647_v5 = vrot.slane %v646_v54, 2  ;;  %v715_v3 = vadd.f32 %v714_v1, %v713_v0 }
 0x137   : > { %v648_v6 = vadd.f32 %v647_v5, %v646_v54  ;;  %v716_v7 = vrot.slane %v715_v3, 2 }
 0x139   : > { %v717_v47 = vadd.f32 %v716_v7, %v715_v3  ;;  %v649_v9 = vrot.slane %v648_v6, 1 }
 0x13b   : > { %v718_v10 = vrot.slane %v717_v47, 1  ;;  %v650_v59 = vadd.f32 %v649_v9, %v648_v6 }
 0x13d   : > { %v719_v11 = vadd.f32 %v718_v10, %v717_v47 }
 0x13f   : > { %v724_v12 = vsel %vm723_vm2, %v719_v11, 0.0 }
 0x140   : > { %v725_v13 = vsel %vm722_vm3, %v650_v59, %v724_v12 }
 0x141   : > { %726 = vst [vmem:[%s211_s17] sm:$0xff] %v725_v13 }
 0x142 PF: > { %s15_s15 = sadd.s32 1, %s974_s15  }
 0x143   : > { %p12_p5 = scmp.ge.s32.totalorder %s15_s15, 4  }
 0x145   :  { %14 = sbr.rel (!%p12_p5) target bundleno = 1 (0x1), region = 74 }

// kernel: resnet_forward.7
= control target key start
LH: loop header
LB: loop body
LE: loop exit
PB: predicated region body
PF: predicated region fallthrough
CT: control target
= control target key end

     0   :  { %s1551_s21 = smov 0   ;;  %s2235_s0 = inlined_call_operand.vmem [shape: f32[512,128], index: 0, kind: input, shape index: {}]   ;;  %s2236_s1 = inlined_call_operand.vmem [shape: f32[1,128], index: 1, kind: input, shape index: {}]   ;;  %s2237_s2 = inlined_call_operand.vmem [shape: f32[1,128], index: 2, kind: input, shape index: {}]   ;;  %s2238_s3 = inlined_call_operand.vmem [shape: f32[512,4], index: 3, kind: input, shape index: {}]   ;;  %s2239_s4 = inlined_call_operand.vmem [shape: f32[4,128], index: 4, kind: input, shape index: {}]   ;;  %s2240_s5 = inlined_call_operand.vmem [shape: f32[1,128], index: 5, kind: input, shape index: {}]   ;;  %s2241_s6 = inlined_call_operand.vmem [shape: f32[512,128], index: 6, kind: output, shape index: {}]  }
   0x1 LB: > { %s1237_s22 = sadd.s32 4294967295, %s1514_s21   ;;  %p1241_p0 = scmp.ge.s32.totalorder %s1514_s21, 1  ;;  %s1514_s21 = sphi %s1551_s21, %s16_s21  }
   0x2   : > { %p224_p1 = scmp.lt.s32.totalorder %s1514_s21, 3 }
   0x4   : > { %p225_p2 = pnand %p1241_p0, %p224_p1 }
   0x6   : > { %228 = sbr.rel (%p225_p2) target bundleno = 368 (0x170), region = 44 }
   0xd   : > { %v419_v0 = vld [vmem:[%s2239_s4] sm:$0xf]  ;;  %vm524_vm0 = vcmask 1043456   ;;  %s1242_s25 = sshll.u32 %s1237_s22, 5  ;;  %vm427_vm1 = vcmask 31744  }
   0xe   : > { %1319 = vmatprep.subr.msk.mxu0 %vm524_vm0, %v419_v0  ;;  %1369 = vmatprep.subr.msk.mxu1 %vm524_vm0, %v419_v0  ;;  %p260_p3 = scmp.lt.s32.totalorder %s1242_s25, 63  ;;  %v1644_v34 = vld [vmem:[%s2236_s1] ss:$0 sm:$0xff] }
   0xf   : > { %1320 = vmatpush3.msk.msra.mxu0 %vm524_vm0, %v419_v0  ;;  %1370 = vmatpush3.msk.msra.mxu1 %vm524_vm0, %v419_v0  ;;  %v1656_v42 = vld [vmem:[%s2237_s2] ss:$0 sm:$0xff] }
  0x10   : > { %s2271_s25 = smov (!%p260_p3, %s1242_s25), 63 }
  0x11   : > { %s1562_s26 = sshll.u32 %s2271_s25, 3 }
  0x12   : > { %s1568_s29 = scalar_lea.vmem %s2238_s3, %s1562_s26  ;;  %s1638_s8 = scalar_lea.vmem %s2235_s0, %s1562_s26 }
  0x13   : > { %v387_v1 = vld [vmem:[%s1568_s29] sm:$0xff]  ;;  %v388_v3 = vld [vmem:[%s1568_s29 + $0x8] sm:$0xff]  ;;  %v389_v5 = vld [vmem:[%s1568_s29 + $0x10] sm:$0xff]  ;;  %s1913_s17 = scalar_lea.vmem %s2241_s6, %s1562_s26 }
  0x14   : > { %v403_v2 = vld [vmem:[%s1568_s29 + $0x80] sm:$0xff]  ;;  %1321 = vmatprep.mubr.msk.f32.mxu0 %vm427_vm1, %v387_v1  ;;  %v404_v4 = vld [vmem:[%s1568_s29 + $0x88] sm:$0xff]  ;;  %v405_v6 = vld [vmem:[%s1568_s29 + $0x90] sm:$0xff] }
  0x15   : > { %1345 = vmatprep.mubr.msk.f32.mxu1 %vm427_vm1, %v403_v2  ;;  %1322 = vmatmul.mubr.msk.f32.vlgmr.msra.gmra.mrb[0].mxu0 %vm427_vm1, %v388_v3  ;;  %v390_v7 = vld [vmem:[%s1568_s29 + $0x18] sm:$0xff]  ;;  %v391_v9 = vld [vmem:[%s1568_s29 + $0x20] sm:$0xff]  ;;  %v392_v11 = vld [vmem:[%s1568_s29 + $0x28] sm:$0xff] }
  0x16   : > { %1346 = vmatmul.mubr.msk.f32.vlgmr.msra.gmra.mrb[0].mxu1 %vm427_vm1, %v404_v4  ;;  %1324 = vmatprep.mubr.msk.f32.mxu0 %vm427_vm1, %v389_v5  ;;  %v406_v8 = vld [vmem:[%s1568_s29 + $0x98] sm:$0xff]  ;;  %v407_v10 = vld [vmem:[%s1568_s29 + $0xa0] sm:$0xff]  ;;  %v408_v12 = vld [vmem:[%s1568_s29 + $0xa8] sm:$0xff] }
  0x17   : > { %1348 = vmatprep.mubr.msk.f32.mxu1 %vm427_vm1, %v405_v6  ;;  %v393_v13 = vld [vmem:[%s1568_s29 + $0x30] sm:$0xff]  ;;  %v394_v15 = vld [vmem:[%s1568_s29 + $0x38] sm:$0xff]  ;;  %v395_v17 = vld [vmem:[%s1568_s29 + $0x40] sm:$0xff] }
  0x18   : > { %v409_v14 = vld [vmem:[%s1568_s29 + $0xb0] sm:$0xff]  ;;  %v410_v16 = vld [vmem:[%s1568_s29 + $0xb8] sm:$0xff]  ;;  %v411_v18 = vld [vmem:[%s1568_s29 + $0xc0] sm:$0xff] }
  0x19   : > { %1325 = vmatmul.mubr.msk.f32.gmra.mrb[2].mxu0 %vm427_vm1, %v390_v7  ;;  %v396_v19 = vld [vmem:[%s1568_s29 + $0x48] sm:$0xff]  ;;  %v397_v21 = vld [vmem:[%s1568_s29 + $0x50] sm:$0xff]  ;;  %v398_v23 = vld [vmem:[%s1568_s29 + $0x58] sm:$0xff] }
  0x1a   : > { %1349 = vmatmul.mubr.msk.f32.gmra.mrb[2].mxu1 %vm427_vm1, %v406_v8  ;;  %1327 = vmatprep.mubr.msk.f32.mxu0 %vm427_vm1, %v391_v9  ;;  %v412_v20 = vld [vmem:[%s1568_s29 + $0xc8] sm:$0xff]  ;;  %v413_v22 = vld [vmem:[%s1568_s29 + $0xd0] sm:$0xff]  ;;  %v414_v24 = vld [vmem:[%s1568_s29 + $0xd8] sm:$0xff] }
  0x1b   : > { %1351 = vmatprep.mubr.msk.f32.mxu1 %vm427_vm1, %v407_v10  ;;  %v399_v25 = vld [vmem:[%s1568_s29 + $0x60] sm:$0xff]  ;;  %v400_v27 = vld [vmem:[%s1568_s29 + $0x68] sm:$0xff]  ;;  %v401_v29 = vld [vmem:[%s1568_s29 + $0x70] sm:$0xff] }
  0x1c   : > { %v415_v26 = vld [vmem:[%s1568_s29 + $0xe0] sm:$0xff]  ;;  %v416_v28 = vld [vmem:[%s1568_s29 + $0xe8] sm:$0xff]  ;;  %v417_v30 = vld [vmem:[%s1568_s29 + $0xf0] sm:$0xff] }
  0x1d   : > { %1328 = vmatmul.mubr.msk.f32.gmra.mrb[4].mxu0 %vm427_vm1, %v392_v11  ;;  %v402_v31 = vld [vmem:[%s1568_s29 + $0x78] sm:$0xff]  ;;  %v278_v33 = vld [vmem:[%s1638_s8 + $0x8] sm:$0xff]  ;;  %v277_v36 = vld [vmem:[%s1638_s8] sm:$0xff] }
  0x1e   : > { %1352 = vmatmul.mubr.msk.f32.gmra.mrb[4].mxu1 %vm427_vm1, %v408_v12  ;;  %1330 = vmatprep.mubr.msk.f32.mxu0 %vm427_vm1, %v393_v13  ;;  %v418_v32 = vld [vmem:[%s1568_s29 + $0xf8] sm:$0xff]  ;;  %v294_v35 = vld [vmem:[%s1638_s8 + $0x88] sm:$0xff]  ;;  %v293_v37 = vld [vmem:[%s1638_s8 + $0x80] sm:$0xff]  ;;  %v317_v41 = vmul.f32 %v1644_v34, %v278_v33  ;;  %v316_v46 = vmul.f32 %v1644_v34, %v277_v36 }
  0x1f   : > { %1354 = vmatprep.mubr.msk.f32.mxu1 %vm427_vm1, %v409_v14  ;;  %v280_v38 = vld [vmem:[%s1638_s8 + $0x18] sm:$0xff]  ;;  %v279_v40 = vld [vmem:[%s1638_s8 + $0x10] sm:$0xff]  ;;  %v282_v44 = vld [vmem:[%s1638_s8 + $0x28] sm:$0xff]  ;;  %v333_v45 = vmul.f32 %v1644_v34, %v294_v35  ;;  %v332_v47 = vmul.f32 %v1644_v34, %v293_v37 }
  0x20   : > { %v296_v39 = vld [vmem:[%s1638_s8 + $0x98] sm:$0xff]  ;;  %v295_v43 = vld [vmem:[%s1638_s8 + $0x90] sm:$0xff]  ;;  %v319_v48 = vmul.f32 %v1644_v34, %v280_v38  ;;  %v298_v49 = vld [vmem:[%s1638_s8 + $0xa8] sm:$0xff]  ;;  %v318_v53 = vmul.f32 %v1644_v34, %v279_v40  ;;  %v321_v55 = vmul.f32 %v1644_v34, %v282_v44  ;;  %v356_v58 = vadd.f32 %v1656_v42, %v317_v41 }
  0x21   : > { %1331 = vmatmul.mubr.msk.f32.gmra.mrb[6].mxu0 %vm427_vm1, %v394_v15  ;;  %v281_v50 = vld [vmem:[%s1638_s8 + $0x20] sm:$0xff]  ;;  %v335_v52 = vmul.f32 %v1644_v34, %v296_v39  ;;  %v334_v54 = vmul.f32 %v1644_v34, %v295_v43  ;;  %v284_v56 = vld [vmem:[%s1638_s8 + $0x38] sm:$0xff]  ;;  %v337_v59 = vmul.f32 %v1644_v34, %v298_v49  ;;  %v283_v62 = vld [vmem:[%s1638_s8 + $0x30] sm:$0xff]  ;;  %v372_v0 = vadd.f32 %v1656_v42, %v333_v45 }
  0x22   : > { %1355 = vmatmul.mubr.msk.f32.gmra.mrb[6].mxu1 %vm427_vm1, %v410_v16  ;;  %1333 = vmatprep.mubr.msk.f32.mxu0 %vm427_vm1, %v395_v17  ;;  %v297_v51 = vld [vmem:[%s1638_s8 + $0xa0] sm:$0xff]  ;;  %v300_v57 = vld [vmem:[%s1638_s8 + $0xb8] sm:$0xff]  ;;  %v320_v60 = vmul.f32 %v1644_v34, %v281_v50  ;;  %v299_v63 = vld [vmem:[%s1638_s8 + $0xb0] sm:$0xff]  ;;  %v355_v1 = vadd.f32 %v1656_v42, %v316_v46  ;;  %v371_v2 = vadd.f32 %v1656_v42, %v332_v47 }
  0x23   : > { %1357 = vmatprep.mubr.msk.f32.mxu1 %vm427_vm1, %v411_v18  ;;  %v336_v61 = vmul.f32 %v1644_v34, %v297_v51  ;;  %v1683_v3 = vadd.f32 %v1656_v42, %v319_v48  ;;  %v286_v4 = vld [vmem:[%s1638_s8 + $0x48] sm:$0xff]  ;;  %v1689_v5 = vld [vmem:[%s2240_s5] ss:$0 sm:$0xff]  ;;  %v374_v6 = vadd.f32 %v1656_v42, %v335_v52  ;;  %v1693_v7 = vadd.f32 %v1656_v42, %v318_v53  ;;  %v288_v38 = vld [vmem:[%s1638_s8 + $0x58] sm:$0xff] }
  0x24   : > { %v323_v8 = vmul.f32 %v1644_v34, %v284_v56  ;;  %v339_v9 = vmul.f32 %v1644_v34, %v300_v57  ;;  %v302_v10 = vld [vmem:[%s1638_s8 + $0xc8] sm:$0xff]  ;;  %v285_v11 = vld [vmem:[%s1638_s8 + $0x40] sm:$0xff]  ;;  %v373_v12 = vadd.f32 %v1656_v42, %v334_v54  ;;  %v1701_v13 = vadd.f32 %v1656_v42, %v321_v55  ;;  %v304_v39 = vld [vmem:[%s1638_s8 + $0xd8] sm:$0xff] }
  0x25   : > { %1334 = vmatmul.mubr.msk.f32.gmra.mrb[8].mxu0 %vm427_vm1, %v396_v19  ;;  %v322_v14 = vmul.f32 %v1644_v34, %v283_v62  ;;  %v338_v15 = vmul.f32 %v1644_v34, %v299_v63  ;;  %v1706_v18 = vadd.f32 %v1656_v42, %v337_v59  ;;  %v1709_v19 = vadd.f32 %v1656_v42, %v320_v60 }
  0x26   : > { %1358 = vmatmul.mubr.msk.f32.gmra.mrb[8].mxu1 %vm427_vm1, %v412_v20  ;;  %1336 = vmatprep.mubr.msk.f32.mxu0 %vm427_vm1, %v397_v21  ;;  %v1712_v20 = vadd.f32 %v1656_v42, %v336_v61  ;;  %v325_v21 = vmul.f32 %v1644_v34, %v286_v4  ;;  %v327_v55 = vmul.f32 %v1644_v34, %v288_v38 }
  0x27   : > { %1360 = vmatprep.mubr.msk.f32.mxu1 %vm427_vm1, %v413_v22  ;;  %v1733_v36 = vadd.f32 %v1656_v42, %v322_v14  ;;  %v1736_v37 = vadd.f32 %v1656_v42, %v338_v15  ;;  %v343_v56 = vmul.f32 %v1644_v34, %v304_v39  ;;  %v287_v14 = vld [vmem:[%s1638_s8 + $0x50] sm:$0xff] }
  0x28   : > { %v1745_v45 = vadd.f32 %v1656_v42, %v325_v21 }
  0x29   : > { %1337 = vmatmul.mubr.msk.f32.gmra.mrb[10].mxu0 %vm427_vm1, %v398_v23 }
  0x2a   : > { %1361 = vmatmul.mubr.msk.f32.gmra.mrb[10].mxu1 %vm427_vm1, %v414_v24  ;;  %1339 = vmatprep.mubr.msk.f32.mxu0 %vm427_vm1, %v399_v25 }
  0x2b   : > { %1363 = vmatprep.mubr.msk.f32.mxu1 %vm427_vm1, %v415_v26  ;;  %v341_v26 = vmul.f32 %v1644_v34, %v302_v10 }
  0x2d   : > { %1340 = vmatmul.mubr.msk.f32.gmra.mrb[12].mxu0 %vm427_vm1, %v400_v27  ;;  %v324_v27 = vmul.f32 %v1644_v34, %v285_v11  ;;  %v1751_v51 = vadd.f32 %v1656_v42, %v341_v26 }
  0x2e   : > { %1364 = vmatmul.mubr.msk.f32.gmra.mrb[12].mxu1 %vm427_vm1, %v416_v28  ;;  %1342 = vmatprep.mubr.msk.f32.mxu0 %vm427_vm1, %v401_v29  ;;  %v301_v28 = vld [vmem:[%s1638_s8 + $0xc0] sm:$0xff] }
  0x2f   : > { %1366 = vmatprep.mubr.msk.f32.mxu1 %vm427_vm1, %v417_v30  ;;  %v340_v46 = vmul.f32 %v1644_v34, %v301_v28  ;;  %v1754_v52 = vadd.f32 %v1656_v42, %v324_v27  ;;  %v1791_v28 = vadd.f32 %v1656_v42, %v343_v56  ;;  %v306_v56 = vld [vmem:[%s1638_s8 + $0xe8] sm:$0xff] }
  0x31   : > { %1343 = vmatmul.mubr.msk.f32.gmra.mrb[14].mxu0 %vm427_vm1, %v402_v31  ;;  %v1723_v31 = vadd.f32 %v1656_v42, %v323_v8  ;;  %v1780_v21 = vadd.f32 %v1656_v42, %v340_v46 }
  0x32   : > { %1367 = vmatmul.mubr.msk.f32.gmra.mrb[14].mxu1 %vm427_vm1, %v418_v32  ;;  %v1726_v32 = vadd.f32 %v1656_v42, %v339_v9 }
  0xe8   : > { %v1323_v16 = vpop.f32.mrb[0].mxu0 }
  0xe9   : > { %v1347_v17 = vpop.f32.mrb[0].mxu1  ;;  %v600_v22 = vadd.f32 %v1323_v16, %v1689_v5  ;;  %v594_v24 = vpop.f32.mrb[1].mxu0 }
  0xea   : > { %v680_v23 = vadd.f32 %v1347_v17, %v1689_v5  ;;  %v674_v25 = vpop.f32.mrb[1].mxu1  ;;  %v595_v29 = vadd.f32 %v1689_v5, %v594_v24 }
  0xeb   : > { %v675_v30 = vadd.f32 %v1689_v5, %v674_v25  ;;  %v1728_v33 = vadd.f32 %v600_v22, %v356_v58 }
  0xec   : > { %v1730_v35 = vadd.f32 %v680_v23, %v372_v0  ;;  %v1740_v40 = vadd.f32 %v595_v29, %v355_v1  ;;  %v1326_v43 = vpop.f32.mrb[2].mxu0  ;;  %v303_v29 = vld [vmem:[%s1638_s8 + $0xd0] sm:$0xff] }
  0xed   : > { %v1742_v41 = vadd.f32 %v675_v30, %v371_v2  ;;  %v1350_v44 = vpop.f32.mrb[2].mxu1  ;;  %v786_v47 = vmin.f32 %v1728_v33, 20.0  ;;  %v604_v49 = vpop.f32.mrb[3].mxu0  ;;  %v610_v59 = vadd.f32 %v1326_v43, %v1689_v5  ;;  %vm1074_vm2 = vcmp.gt.f32.partialorder %v1728_v33, 20.0 }
  0xee   : > { %v802_v48 = vmin.f32 %v1730_v35, 20.0  ;;  %v684_v50 = vpop.f32.mrb[3].mxu1  ;;  %v785_v53 = vmin.f32 %v1740_v40, 20.0  ;;  %v690_v60 = vadd.f32 %v1350_v44, %v1689_v5  ;;  %v605_v63 = vadd.f32 %v1689_v5, %v604_v49 }
  0xef   : > { %v801_v54 = vmin.f32 %v1742_v41, 20.0  ;;  %v819_v57 = vmul.f32 1.442695, %v786_v47  ;;  %v685_v0 = vadd.f32 %v1689_v5, %v684_v50  ;;  %v1765_v4 = vadd.f32 %v610_v59, %v1683_v3 }
  0xf0   : > { %v851_v58 = vmul.f32 1.442695, %v802_v48  ;;  %v817_v61 = vmul.f32 1.442695, %v785_v53  ;;  %v1329_v1 = vpop.f32.mrb[4].mxu0  ;;  %v1767_v8 = vadd.f32 %v690_v60, %v374_v6  ;;  %v1772_v15 = vadd.f32 %v605_v63, %v1693_v7 }
  0xf1   : > { %v849_v62 = vmul.f32 1.442695, %v801_v54  ;;  %v1353_v2 = vpop.f32.mrb[4].mxu1  ;;  %1379 = vpow2.f32 %v819_v57  ;;  %v620_v9 = vadd.f32 %v1329_v1, %v1689_v5  ;;  %v614_v10 = vpop.f32.mrb[5].mxu0  ;;  %v1774_v16 = vadd.f32 %v685_v0, %v373_v12 }
  0xf2   : > { %v694_v11 = vpop.f32.mrb[5].mxu1  ;;  %1381 = vpow2.f32 %v851_v58  ;;  %v700_v17 = vadd.f32 %v1353_v2, %v1689_v5  ;;  %v788_v3 = vmin.f32 %v1765_v4, 20.0  ;;  %v804_v6 = vmin.f32 %v1767_v8, 20.0 }
  0xf3   : > { %1383 = vpow2.f32 %v817_v61  ;;  %v787_v22 = vmin.f32 %v1772_v15, 20.0  ;;  %v1786_v7 = vadd.f32 %v1656_v42, %v327_v55  ;;  %v326_v12 = vmul.f32 %v1644_v34, %v287_v14  ;;  %v290_v55 = vld [vmem:[%s1638_s8 + $0x68] sm:$0xff] }
  0xf4   : > { %1385 = vpow2.f32 %v849_v62  ;;  %v1332_v23 = vpop.f32.mrb[6].mxu0  ;;  %v823_v25 = vmul.f32 1.442695, %v788_v3  ;;  %v855_v26 = vmul.f32 1.442695, %v804_v6  ;;  %v803_v27 = vmin.f32 %v1774_v16, 20.0 }
  0xf5   : > { %v1783_v24 = vpop.f32.mrb[6].mxu1  ;;  %v821_v30 = vmul.f32 1.442695, %v787_v22  ;;  %v1795_v38 = vadd.f32 %v620_v9, %v1701_v13  ;;  %v1798_v39 = vadd.f32 %v700_v17, %v1706_v18  ;;  %v615_v43 = vadd.f32 %v1689_v5, %v614_v10  ;;  %v1801_v44 = vpop.f32.mrb[7].mxu0  ;;  %v289_v62 = vld [vmem:[%s1638_s8 + $0x60] sm:$0xff] }
  0xf6   : > { %v1803_v46 = vpop.f32.mrb[7].mxu1  ;;  %1387 = vpow2.f32 %v823_v25  ;;  %v853_v47 = vmul.f32 1.442695, %v803_v27  ;;  %v695_v48 = vadd.f32 %v1689_v5, %v694_v11  ;;  %v630_v49 = vadd.f32 %v1332_v23, %v1689_v5 }
  0xf7   : > { %1389 = vpow2.f32 %v855_v26  ;;  %v790_v13 = vmin.f32 %v1795_v38, 20.0  ;;  %v806_v50 = vmin.f32 %v1798_v39, 20.0  ;;  %v342_v54 = vmul.f32 %v1644_v34, %v303_v29 }
  0xf8   : > { %v1809_v18 = vpop.f32.mrb[8].mxu0  ;;  %1391 = vpow2.f32 %v821_v30  ;;  %v1817_v57 = vadd.f32 %v615_v43, %v1709_v19  ;;  %v1820_v58 = vadd.f32 %v695_v48, %v1712_v20  ;;  %v1827_v61 = vadd.f32 %v1656_v42, %v326_v12 }
  0xf9   : > { %v1811_v53 = vpop.f32.mrb[8].mxu1  ;;  %v1822_v59 = vpop.f32.mrb[9].mxu0  ;;  %1393 = vpow2.f32 %v853_v47  ;;  %v827_v63 = vmul.f32 1.442695, %v790_v13  ;;  %v859_v0 = vmul.f32 1.442695, %v806_v50  ;;  %v1831_v1 = vadd.f32 %v630_v49, %v1723_v31 }
  0xfa   : > { %v1824_v60 = vpop.f32.mrb[9].mxu1  ;;  %v789_v19 = vmin.f32 %v1817_v57, 20.0  ;;  %v805_v20 = vmin.f32 %v1820_v58, 20.0  ;;  %v329_v9 = vmul.f32 %v1644_v34, %v290_v55  ;;  %v345_v10 = vmul.f32 %v1644_v34, %v306_v56 }
  0xfb   : > { %v1380_v2 = vpop.eup %1379  ;;  %1395 = vpow2.f32 %v827_v63  ;;  %v792_v17 = vmin.f32 %v1831_v1, 20.0  ;;  %v328_v31 = vmul.f32 %v1644_v34, %v289_v62  ;;  %v1846_v47 = vadd.f32 %v1656_v42, %v342_v54  ;;  %v305_v54 = vld [vmem:[%s1638_s8 + $0xe0] sm:$0xff] }
  0xfc   : > { %v1382_v11 = vpop.eup %1381  ;;  %v882_v14 = vadd.f32 2.0, %v1380_v2  ;;  %v1838_v3 = vpop.f32.mrb[10].mxu0  ;;  %1397 = vpow2.f32 %v859_v0  ;;  %v825_v12 = vmul.f32 1.442695, %v789_v19  ;;  %v857_v25 = vmul.f32 1.442695, %v805_v20 }
  0xfd   : > { %v1840_v6 = vpop.f32.mrb[10].mxu1  ;;  %v1384_v22 = vpop.eup %1383  ;;  %v898_v23 = vadd.f32 2.0, %v1382_v11  ;;  %v831_v43 = vmul.f32 1.442695, %v792_v17  ;;  %2244 = vst [vmem:[#allocation2_spill] sm:$0xff] %v1846_v47  ;;  %v1851_v50 = vadd.f32 %v1656_v42, %v329_v9  ;;  %v1856_v63 = vadd.f32 %v1656_v42, %v345_v10  ;;  %v292_v17 = vld [vmem:[%s1638_s8 + $0x78] sm:$0xff] }
  0xfe   : > { %v1843_v26 = vpop.f32.mrb[11].mxu0  ;;  %v1386_v27 = vpop.eup %1385  ;;  %v914_v29 = vmul.f32 %v1380_v2, %v882_v14  ;;  %v881_v30 = vadd.f32 2.0, %v1384_v22  ;;  %1399 = vpow2.f32 %v825_v12  ;;  %v710_v12 = vadd.f32 %v1783_v24, %v1689_v5 }
  0xff   : > { %v1848_v48 = vpop.f32.mrb[11].mxu1  ;;  %v930_v49 = vmul.f32 %v1382_v11, %v898_v23  ;;  %v897_v13 = vadd.f32 2.0, %v1386_v27  ;;  %2245 = vst [vmem:[#allocation3_spill] sm:$0xff] %v1851_v50  ;;  %1401 = vpow2.f32 %v857_v25  ;;  %2247 = vst [vmem:[#allocation5_spill] sm:$0xff] %v1856_v63  ;;  %v1862_v11 = vadd.f32 %v1656_v42, %v328_v31 }
 0x100   : > { %v978_v55 = vadd.f32 2.0, %v914_v29  ;;  %v913_v56 = vmul.f32 %v1384_v22, %v881_v30  ;;  %v1853_v62 = vpop.f32.mrb[12].mxu0  ;;  %v1388_v2 = vpop.eup %1387  ;;  %1403 = vpow2.f32 %v831_v43  ;;  %v1872_v43 = vmul.f32 %v1644_v34, %v305_v54 }
 0x101   : > { %2246 = vst [vmem:[#allocation4_spill] sm:$0xff] %v1853_v62  ;;  %v1858_v0 = vpop.f32.mrb[12].mxu1  ;;  %v994_v19 = vadd.f32 2.0, %v930_v49  ;;  %v929_v20 = vmul.f32 %v1386_v27, %v897_v13  ;;  %2249 = vst [vmem:[#allocation7_spill] sm:$0xff] %v1862_v11  ;;  %v1864_v9 = vpop.f32.mrb[13].mxu0  ;;  %v884_v10 = vadd.f32 2.0, %v1388_v2 }
 0x102   : > { %2248 = vst [vmem:[#allocation6_spill] sm:$0xff] %v1858_v0  ;;  %2250 = vst [vmem:[#allocation8_spill] sm:$0xff] %v1864_v9  ;;  %v1866_v14 = vpop.f32.mrb[13].mxu1  ;;  %v1390_v22 = vpop.eup %1389  ;;  %1405 = vrcp.f32 %v978_v55  ;;  %v977_v23 = vadd.f32 2.0, %v913_v56  ;;  %vm1090_vm3 = vcmp.gt.f32.partialorder %v1730_v35, 20.0  ;;  %vm1073_vm4 = vcmp.gt.f32.partialorder %v1740_v40, 20.0 }
 0x103   : > { %2251 = vst [vmem:[#allocation9_spill] sm:$0xff] %v1866_v14  ;;  %v1392_v25 = vpop.eup %1391  ;;  %1407 = vrcp.f32 %v994_v19  ;;  %v993_v30 = vadd.f32 2.0, %v929_v20  ;;  %v900_v27 = vadd.f32 2.0, %v1390_v22  ;;  %v916_v13 = vmul.f32 %v1388_v2, %v884_v10 }
 0x104   : > { %v1394_v31 = vpop.eup %1393  ;;  %1409 = vrcp.f32 %v977_v23  ;;  %v883_v11 = vadd.f32 2.0, %v1392_v25  ;;  %v1875_v14 = vmul.f32 %v1644_v34, %v292_v17  ;;  %v1877_v55 = vpop.f32.mrb[14].mxu0  ;;  %v625_v19 = vadd.f32 %v1689_v5, %v1801_v44 }
 0x105   : > { %2252 = vst [vmem:[#allocation10_spill] sm:$0xff] %v1877_v55  ;;  %v1879_v9 = vpop.f32.mrb[14].mxu1  ;;  %1411 = vrcp.f32 %v993_v30  ;;  %v932_v24 = vmul.f32 %v1390_v22, %v900_v27  ;;  %v899_v63 = vadd.f32 2.0, %v1394_v31  ;;  %v1883_v50 = vpop.f32.mrb[15].mxu0  ;;  %v946_v2 = vmul.f32 %v914_v29, %v1728_v33 }
 0x106   : > { %2253 = vst [vmem:[#allocation11_spill] sm:$0xff] %v1879_v9  ;;  %2254 = vst [vmem:[#allocation12_spill] sm:$0xff] %v1883_v50  ;;  %v1885_v54 = vpop.f32.mrb[15].mxu1  ;;  %v1396_v23 = vpop.eup %1395  ;;  %v980_v17 = vadd.f32 2.0, %v916_v13  ;;  %v915_v10 = vmul.f32 %v1392_v25, %v883_v11  ;;  %v1890_v55 = vadd.f32 %v710_v12, %v1726_v32  ;;  %v962_v22 = vmul.f32 %v930_v49, %v1730_v35 }
 0x107   : > { %2255 = vst [vmem:[#allocation13_spill] sm:$0xff] %v1885_v54  ;;  %v1398_v30 = vpop.eup %1397  ;;  %v996_v44 = vadd.f32 2.0, %v932_v24  ;;  %v931_v27 = vmul.f32 %v1394_v31, %v899_v63  ;;  %v886_v50 = vadd.f32 2.0, %v1396_v23  ;;  %v945_v54 = vmul.f32 %v913_v56, %v1740_v40 }
 0x108   : > { %2256 = vst [vmem:[#allocation14_spill] sm:$0xff] %v1890_v55  ;;  %1413 = vrcp.f32 %v980_v17  ;;  %v979_v29 = vadd.f32 2.0, %v915_v10  ;;  %v902_v9 = vadd.f32 2.0, %v1398_v30  ;;  %v1400_v47 = vpop.eup %1399  ;;  %v961_v11 = vmul.f32 %v929_v20, %v1742_v41 }
 0x109   : > { %vm1089_vm5 = vcmp.gt.f32.partialorder %v1742_v41, 20.0  ;;  %1415 = vrcp.f32 %v996_v44  ;;  %v995_v32 = vadd.f32 2.0, %v931_v27  ;;  %v918_v49 = vmul.f32 %v1396_v23, %v886_v50  ;;  %v1402_v12 = vpop.eup %1401 }
 0x10a   : > { %1417 = vrcp.f32 %v979_v29  ;;  %v1898_v63 = vmul.f32 %v1398_v30, %v902_v9  ;;  %v885_v25 = vadd.f32 2.0, %v1400_v47  ;;  %v808_v56 = vmin.f32 %v1890_v55, 20.0  ;;  %v1404_v31 = vpop.eup %1403 }
 0x10b   : > { %1419 = vrcp.f32 %v995_v32  ;;  %v982_v17 = vadd.f32 2.0, %v918_v49  ;;  %v901_v0 = vadd.f32 2.0, %v1402_v12  ;;  %v1902_v62 = vadd.f32 %v625_v19, %v1733_v36 }
 0x10c   : > { %v1406_v20 = vpop.eup %1405  ;;  %v948_v44 = vmul.f32 %v916_v13, %v1765_v4  ;;  %vm1076_vm6 = vcmp.gt.f32.partialorder %v1765_v4, 20.0  ;;  %v998_v50 = vadd.f32 2.0, %v1898_v63  ;;  %v1907_v23 = vmul.f32 %v1400_v47, %v885_v25 }
 0x10d   : > { %v888_v9 = vadd.f32 2.0, %v1404_v31  ;;  %v1408_v30 = vpop.eup %1407  ;;  %v1042_v29 = vmul.f32 %v1406_v20, %v946_v2  ;;  %v964_v36 = vmul.f32 %v932_v24, %v1767_v8  ;;  %vm1092_vm7 = vcmp.gt.f32.partialorder %v1767_v8, 20.0 }
 0x10e   : > { %1421 = vrcp.f32 %v982_v17  ;;  %v1917_v13 = vmul.f32 %v1402_v12, %v901_v0  ;;  %v1410_v19 = vpop.eup %1409  ;;  %v1058_v32 = vmul.f32 %v1408_v30, %v962_v22  ;;  %vm1075_vm8 = vcmp.gt.f32.partialorder %v1772_v15, 20.0 }
 0x10f   : > { %1423 = vrcp.f32 %v998_v50  ;;  %v981_v47 = vadd.f32 2.0, %v1907_v23  ;;  %v863_v25 = vmul.f32 1.442695, %v808_v56  ;;  %v1412_v55 = vpop.eup %1411  ;;  %v1106_v24 = vsel %vm1074_vm2, %v1728_v33, %v1042_v29 }
 0x110   : > { %v1041_v2 = vmul.f32 %v1410_v19, %v945_v54  ;;  %v947_v17 = vmul.f32 %v915_v10, %v1772_v15  ;;  %vm1091_vm9 = vcmp.gt.f32.partialorder %v1774_v16, 20.0  ;;  %v997_v0 = vadd.f32 2.0, %v1917_v13  ;;  %1138 = vst [vmem:[%s1913_s17 + $0x8] sm:$0xff] %v1106_v24 }
 0x111   : > { %v1122_v22 = vsel %vm1090_vm3, %v1730_v35, %v1058_v32  ;;  %v1057_v12 = vmul.f32 %v1412_v55, %v961_v11  ;;  %1425 = vrcp.f32 %v981_v47  ;;  %v920_v56 = vmul.f32 %v1404_v31, %v888_v9 }
 0x112   : > { %1154 = vst [vmem:[%s1913_s17 + $0x88] sm:$0xff] %v1122_v22  ;;  %v1105_v33 = vsel %vm1073_vm4, %v1740_v40, %v1041_v2  ;;  %v963_v54 = vmul.f32 %v931_v27, %v1774_v16  ;;  %vm1078_vm10 = vcmp.gt.f32.partialorder %v1795_v38, 20.0  ;;  %1427 = vrcp.f32 %v997_v0  ;;  %v1414_v20 = vpop.eup %1413 }
 0x113   : > { %v791_v10 = vmin.f32 %v1902_v62, 20.0  ;;  %1137 = vst [vmem:[%s1913_s17] sm:$0xff] %v1105_v33  ;;  %v1121_v35 = vsel %vm1089_vm5, %v1742_v41, %v1057_v12  ;;  %v950_v55 = vmul.f32 %v918_v49, %v1795_v38  ;;  %vm1094_vm11 = vcmp.gt.f32.partialorder %v1798_v39, 20.0  ;;  %v1416_v40 = vpop.eup %1415 }
 0x114   : > { %v984_v11 = vadd.f32 2.0, %v920_v56  ;;  %1429 = vpow2.f32 %v863_v25  ;;  %1153 = vst [vmem:[%s1913_s17 + $0x80] sm:$0xff] %v1121_v35  ;;  %v1044_v27 = vmul.f32 %v1414_v20, %v948_v44  ;;  %v705_v50 = vadd.f32 %v1689_v5, %v1803_v46  ;;  %v1418_v30 = vpop.eup %1417 }
 0x115   : > { %v829_v31 = vmul.f32 1.442695, %v791_v10  ;;  %v640_v9 = vadd.f32 %v1809_v18, %v1689_v5  ;;  %v1060_v29 = vmul.f32 %v1416_v40, %v964_v36  ;;  %vm1077_vm12 = vcmp.gt.f32.partialorder %v1817_v57, 20.0  ;;  %v1420_v44 = vpop.eup %1419 }
 0x116   : > { %1431 = vrcp.f32 %v984_v11  ;;  %v720_v41 = vadd.f32 %v1811_v53, %v1689_v5  ;;  %v635_v49 = vadd.f32 %v1689_v5, %v1822_v59  ;;  %v1108_v46 = vsel %vm1076_vm6, %v1765_v4, %v1044_v27 }
 0x117   : > { %v1043_v19 = vmul.f32 %v1418_v30, %v947_v17  ;;  %vm1093_vm13 = vcmp.gt.f32.partialorder %v1820_v58, 20.0  ;;  %1433 = vpow2.f32 %v829_v31  ;;  %v1959_v18 = vadd.f32 %v705_v50, %v1736_v37  ;;  %1140 = vst [vmem:[%s1913_s17 + $0x18] sm:$0xff] %v1108_v46 }
 0x118   : > { %v1124_v53 = vsel %vm1092_vm7, %v1767_v8, %v1060_v29  ;;  %v1059_v59 = vmul.f32 %v1420_v44, %v963_v54  ;;  %v1966_v36 = vadd.f32 %v640_v9, %v1745_v45  ;;  %v1969_v4 = vadd.f32 %v720_v41, %v1751_v51  ;;  %v1422_v32 = vpop.eup %1421  ;;  %v308_v41 = vld [vmem:[%s1638_s8 + $0xf8] sm:$0xff] }
 0x119   : > { %1156 = vst [vmem:[%s1913_s17 + $0x98] sm:$0xff] %v1124_v53  ;;  %v1107_v37 = vsel %vm1075_vm8, %v1772_v15, %v1043_v19  ;;  %v966_v47 = vmul.f32 %v1898_v63, %v1798_v39  ;;  %v807_v25 = vmin.f32 %v1959_v18, 20.0  ;;  %v1979_v8 = vadd.f32 %v635_v49, %v1754_v52  ;;  %v1424_v24 = vpop.eup %1423 }
 0x11a   : > { %1139 = vst [vmem:[%s1913_s17 + $0x10] sm:$0xff] %v1107_v37  ;;  %v1123_v45 = vsel %vm1091_vm9, %v1774_v16, %v1059_v59  ;;  %v1046_v51 = vmul.f32 %v1422_v32, %v950_v55  ;;  %v949_v2 = vmul.f32 %v1907_v23, %v1817_v57  ;;  %v794_v15 = vmin.f32 %v1966_v36, 20.0  ;;  %v307_v32 = vld [vmem:[%s1638_s8 + $0xf0] sm:$0xff] }
 0x11b   : > { %1155 = vst [vmem:[%s1913_s17 + $0x90] sm:$0xff] %v1123_v45  ;;  %v1062_v63 = vmul.f32 %v1424_v24, %v966_v47  ;;  %v965_v52 = vmul.f32 %v1917_v13, %v1820_v58  ;;  %v861_v17 = vmul.f32 1.442695, %v807_v25  ;;  %v810_v0 = vmin.f32 %v1969_v4, 20.0  ;;  %v1426_v22 = vpop.eup %1425 }
 0x11c   : > { %v1110_v16 = vsel %vm1078_vm10, %v1795_v38, %v1046_v51  ;;  %v952_v12 = vmul.f32 %v920_v56, %v1831_v1  ;;  %v835_v33 = vmul.f32 1.442695, %v794_v15  ;;  %v793_v23 = vmin.f32 %v1979_v8, 20.0  ;;  %v1428_v54 = vpop.eup %1427 }
 0x11d   : > { %1142 = vst [vmem:[%s1913_s17 + $0x28] sm:$0xff] %v1110_v16  ;;  %v1126_v13 = vsel %vm1094_vm11, %v1798_v39, %v1062_v63  ;;  %v1045_v10 = vmul.f32 %v1426_v22, %v949_v2  ;;  %1435 = vpow2.f32 %v861_v17  ;;  %v867_v20 = vmul.f32 1.442695, %v810_v0  ;;  %v2257_v63 = vld [vmem:[#allocation4_spill] sm:$0xff]  ;;  %v2258_v17 = vld [vmem:[#allocation6_spill] sm:$0xff] }
 0x11e   : > { %v1430_v35 = vpop.eup %1429  ;;  %1158 = vst [vmem:[%s1913_s17 + $0xa8] sm:$0xff] %v1126_v13  ;;  %v1061_v55 = vmul.f32 %v1428_v54, %v965_v52  ;;  %1437 = vpow2.f32 %v835_v33  ;;  %v833_v38 = vmul.f32 1.442695, %v793_v23  ;;  %v715_v56 = vadd.f32 %v1689_v5, %v1824_v60  ;;  %v2259_v33 = vld [vmem:[#allocation2_spill] sm:$0xff] }
 0x11f   : > { %v1109_v11 = vsel %vm1077_vm12, %v1817_v57, %v1045_v10  ;;  %v904_v40 = vadd.f32 2.0, %v1430_v35  ;;  %1439 = vpow2.f32 %v867_v20  ;;  %v650_v39 = vadd.f32 %v1838_v3, %v1689_v5 }
 0x120   : > { %v1432_v27 = vpop.eup %1431  ;;  %1141 = vst [vmem:[%s1913_s17 + $0x20] sm:$0xff] %v1109_v11  ;;  %v1125_v31 = vsel %vm1093_vm13, %v1820_v58, %v1061_v55  ;;  %1441 = vpow2.f32 %v833_v38  ;;  %v2014_v50 = vadd.f32 %v715_v56, %v1780_v21  ;;  %v730_v60 = vadd.f32 %v1840_v6, %v1689_v5 }
 0x121   : > { %v1434_v57 = vpop.eup %1433  ;;  %1157 = vst [vmem:[%s1913_s17 + $0xa0] sm:$0xff] %v1125_v31  ;;  %v1048_v9 = vmul.f32 %v1432_v27, %v952_v12  ;;  %v936_v3 = vmul.f32 %v1430_v35, %v904_v40  ;;  %v2020_v30 = vadd.f32 %v650_v39, %v1786_v7  ;;  %v645_v29 = vadd.f32 %v1689_v5, %v1843_v26  ;;  %v291_v26 = vld [vmem:[%s1638_s8 + $0x70] sm:$0xff]  ;;  %v2261_v40 = vld [vmem:[#allocation5_spill] sm:$0xff]  ;;  %v2262_v31 = vld [vmem:[#allocation14_spill] sm:$0xff] }
 0x122   : > { %vm1080_vm14 = vcmp.gt.f32.partialorder %v1831_v1, 20.0  ;;  %v887_v21 = vadd.f32 2.0, %v1434_v57  ;;  %v809_v58 = vmin.f32 %v2014_v50, 20.0  ;;  %v2027_v6 = vadd.f32 %v730_v60, %v1791_v28 }
 0x123   : > { %v1112_v49 = vsel %vm1080_vm14, %v1831_v1, %v1048_v9  ;;  %v1000_v44 = vadd.f32 2.0, %v936_v3  ;;  %v796_v46 = vmin.f32 %v2020_v30, 20.0  ;;  %v2034_v7 = vadd.f32 %v1656_v42, %v1872_v43 }
 0x124   : > { %1144 = vst [vmem:[%s1913_s17 + $0x38] sm:$0xff] %v1112_v49  ;;  %v919_v19 = vmul.f32 %v1434_v57, %v887_v21  ;;  %v865_v53 = vmul.f32 1.442695, %v809_v58  ;;  %v812_v59 = vmin.f32 %v2027_v6, 20.0  ;;  %v2041_v28 = vadd.f32 %v1656_v42, %v1875_v14 }
 0x125   : > { %1443 = vrcp.f32 %v1000_v44  ;;  %v839_v1 = vmul.f32 1.442695, %v796_v46  ;;  %v2045_v37 = vadd.f32 %v645_v29, %v1827_v61  ;;  %v347_v47 = vmul.f32 %v1644_v34, %v308_v41 }
 0x126   : > { %v983_v43 = vadd.f32 2.0, %v919_v19  ;;  %1445 = vpow2.f32 %v865_v53  ;;  %v871_v25 = vmul.f32 1.442695, %v812_v59  ;;  %v330_v24 = vmul.f32 %v1644_v34, %v291_v26 }
 0x127   : > { %v1436_v45 = vpop.eup %1435  ;;  %1447 = vpow2.f32 %v839_v1  ;;  %v795_v51 = vmin.f32 %v2045_v37, 20.0  ;;  %v725_v14 = vadd.f32 %v1689_v5, %v1848_v48  ;;  %v346_v2 = vmul.f32 %v1644_v34, %v307_v32  ;;  %v2260_v34 = vld [vmem:[#allocation3_spill] sm:$0xff]  ;;  %v2263_v1 = vld [vmem:[#allocation8_spill] sm:$0xff] }
 0x128   : > { %v1438_v15 = vpop.eup %1437  ;;  %1449 = vrcp.f32 %v983_v43  ;;  %v903_v61 = vadd.f32 2.0, %v1436_v45  ;;  %v660_v52 = vadd.f32 %v2257_v63, %v1689_v5  ;;  %v740_v0 = vadd.f32 %v2258_v17, %v1689_v5 }
 0x129   : > { %v1440_v22 = vpop.eup %1439  ;;  %v890_v16 = vadd.f32 2.0, %v1438_v15  ;;  %1451 = vpow2.f32 %v871_v25  ;;  %v837_v12 = vmul.f32 1.442695, %v795_v51  ;;  %v2058_v23 = vadd.f32 %v725_v14, %v2259_v33 }
 0x12a   : > { %v1442_v54 = vpop.eup %1441  ;;  %v935_v48 = vmul.f32 %v1436_v45, %v903_v61  ;;  %v906_v13 = vadd.f32 2.0, %v1440_v22  ;;  %v2061_v10 = vadd.f32 %v660_v52, %v2260_v34  ;;  %v2064_v20 = vadd.f32 %v1656_v42, %v347_v47  ;;  %v2265_v52 = vld [vmem:[#allocation9_spill] sm:$0xff] }
 0x12b   : > { %v2066_v35 = vmul.f32 %v1438_v15, %v890_v16  ;;  %v889_v55 = vadd.f32 2.0, %v1442_v54  ;;  %1453 = vpow2.f32 %v837_v12  ;;  %v811_v38 = vmin.f32 %v2058_v23, 20.0 }
 0x12c   : > { %v999_v56 = vadd.f32 2.0, %v935_v48  ;;  %v2069_v11 = vmul.f32 %v1440_v22, %v906_v13  ;;  %v2072_v39 = vadd.f32 %v740_v0, %v2261_v40  ;;  %v2075_v27 = vadd.f32 %v1656_v42, %v330_v24 }
 0x12d   : > { %v968_v60 = vmul.f32 %v936_v3, %v2262_v31  ;;  %v986_v57 = vadd.f32 2.0, %v2066_v35  ;;  %v2079_v9 = vmul.f32 %v1442_v54, %v889_v55  ;;  %v2082_v29 = vadd.f32 %v1656_v42, %v346_v2  ;;  %v2264_v2 = vld [vmem:[#allocation7_spill] sm:$0xff] }
 0x12e   : > { %1455 = vrcp.f32 %v999_v56  ;;  %v1002_v21 = vadd.f32 2.0, %v2069_v11  ;;  %v869_v58 = vmul.f32 1.442695, %v811_v38  ;;  %v798_v41 = vmin.f32 %v2061_v10, 20.0 }
 0x12f   : > { %v1444_v49 = vpop.eup %1443  ;;  %vm1096_vm15 = vcmp.gt.f32.partialorder %v2262_v31, 20.0  ;;  %vm1079_vm0 = vcmp.gt.f32.partialorder %v1902_v62, 20.0  ;;  %1457 = vrcp.f32 %v986_v57  ;;  %v985_v3 = vadd.f32 2.0, %v2079_v9 }
 0x130   : > { %v1446_v44 = vpop.eup %1445  ;;  %v1064_v46 = vmul.f32 %v1444_v49, %v968_v60  ;;  %1459 = vrcp.f32 %v1002_v21  ;;  %v843_v42 = vmul.f32 1.442695, %v798_v41  ;;  %v814_v26 = vmin.f32 %v2072_v39, 20.0 }
 0x131   : > { %v1448_v53 = vpop.eup %1447  ;;  %v951_v59 = vmul.f32 %v919_v19, %v1902_v62  ;;  %1461 = vrcp.f32 %v985_v3  ;;  %v905_v32 = vadd.f32 2.0, %v1446_v44  ;;  %v655_v47 = vadd.f32 %v1689_v5, %v2263_v1 }
 0x132   : > { %v1450_v43 = vpop.eup %1449  ;;  %v1128_v25 = vsel %vm1096_vm15, %v2262_v31, %v1064_v46  ;;  %vm1095_vm1 = vcmp.gt.f32.partialorder %v1959_v18, 20.0  ;;  %v892_v24 = vadd.f32 2.0, %v1448_v53  ;;  %1463 = vpow2.f32 %v869_v58  ;;  %v2266_v46 = vld [vmem:[#allocation10_spill] sm:$0xff] }
 0x133   : > { %v875_v45 = vmul.f32 1.442695, %v814_v26  ;;  %v1452_v51 = vpop.eup %1451  ;;  %1160 = vst [vmem:[%s1913_s17 + $0xb8] sm:$0xff] %v1128_v25  ;;  %v1047_v14 = vmul.f32 %v1450_v43, %v951_v59  ;;  %vm1082_vm2 = vcmp.gt.f32.partialorder %v1966_v36, 20.0  ;;  %v2097_v19 = vmul.f32 %v1446_v44, %v905_v32  ;;  %v2267_v59 = vld [vmem:[#allocation11_spill] sm:$0xff] }
 0x134   : > { %1465 = vpow2.f32 %v843_v42  ;;  %v2100_v15 = vadd.f32 %v655_v47, %v2264_v2  ;;  %v2102_v61 = vmul.f32 %v1448_v53, %v892_v24  ;;  %v908_v63 = vadd.f32 2.0, %v1452_v51 }
 0x135   : > { %1467 = vpow2.f32 %v875_v45  ;;  %v735_v17 = vadd.f32 %v1689_v5, %v2265_v52  ;;  %v1454_v0 = vpop.eup %1453  ;;  %v1111_v22 = vsel %vm1079_vm0, %v1902_v62, %v1047_v14  ;;  %vm1098_vm3 = vcmp.gt.f32.partialorder %v1969_v4, 20.0 }
 0x136   : > { %v1001_v16 = vadd.f32 2.0, %v2097_v19  ;;  %v797_v12 = vmin.f32 %v2100_v15, 20.0  ;;  %1143 = vst [vmem:[%s1913_s17 + $0x30] sm:$0xff] %v1111_v22  ;;  %vm1081_vm4 = vcmp.gt.f32.partialorder %v1979_v8, 20.0  ;;  %v988_v33 = vadd.f32 2.0, %v2102_v61 }
 0x137   : > { %v940_v54 = vmul.f32 %v1452_v51, %v908_v63  ;;  %v891_v13 = vadd.f32 2.0, %v1454_v0  ;;  %v967_v34 = vmul.f32 %v935_v48, %v1959_v18  ;;  %v2117_v38 = vadd.f32 %v735_v17, %v2034_v7  ;;  %v2268_v51 = vld [vmem:[#allocation12_spill] sm:$0xff] }
 0x138   : > { %1469 = vrcp.f32 %v1001_v16  ;;  %v841_v55 = vmul.f32 1.442695, %v797_v12  ;;  %v1456_v62 = vpop.eup %1455  ;;  %v954_v56 = vmul.f32 %v2066_v35, %v1966_v36  ;;  %v970_v21 = vmul.f32 %v2069_v11, %v1969_v4 }
 0x139   : > { %1471 = vrcp.f32 %v988_v33  ;;  %v1004_v40 = vadd.f32 2.0, %v940_v54  ;;  %v2121_v31 = vmul.f32 %v1454_v0, %v891_v13  ;;  %v1458_v60 = vpop.eup %1457  ;;  %v1063_v57 = vmul.f32 %v1456_v62, %v967_v34 }
 0x13a   : > { %1473 = vpow2.f32 %v841_v55  ;;  %v813_v48 = vmin.f32 %v2117_v38, 20.0  ;;  %v1460_v58 = vpop.eup %1459  ;;  %v1050_v7 = vmul.f32 %v1458_v60, %v954_v56  ;;  %v953_v41 = vmul.f32 %v2079_v9, %v1979_v8 }
 0x13b   : > { %1475 = vrcp.f32 %v1004_v40  ;;  %v987_v35 = vadd.f32 2.0, %v2121_v31  ;;  %v1462_v49 = vpop.eup %1461  ;;  %v1127_v3 = vsel %vm1095_vm1, %v1959_v18, %v1063_v57  ;;  %v1066_v44 = vmul.f32 %v1460_v58, %v970_v21 }
 0x13c   : > { %vm1097_vm5 = vcmp.gt.f32.partialorder %v2014_v50, 20.0  ;;  %v873_v11 = vmul.f32 1.442695, %v813_v48  ;;  %v670_v42 = vadd.f32 %v2266_v46, %v1689_v5  ;;  %v1464_v26 = vpop.eup %1463  ;;  %1159 = vst [vmem:[%s1913_s17 + $0xb0] sm:$0xff] %v1127_v3  ;;  %v1114_v9 = vsel %vm1082_vm2, %v1966_v36, %v1050_v7  ;;  %v1507_v7 = vld [vmem:[%s2240_s5] ss:$0 sm:$0xff] }
 0x13d   : > { %v1049_v53 = vmul.f32 %v1462_v49, %v953_v41  ;;  %1477 = vrcp.f32 %v987_v35  ;;  %v750_v18 = vadd.f32 %v2267_v59, %v1689_v5  ;;  %1146 = vst [vmem:[%s1913_s17 + $0x48] sm:$0xff] %v1114_v9  ;;  %v1130_v1 = vsel %vm1098_vm3, %v1969_v4, %v1066_v44  ;;  %v2269_v41 = vld [vmem:[#allocation13_spill] sm:$0xff] }
 0x13e   : > { %v1466_v32 = vpop.eup %1465  ;;  %v907_v47 = vadd.f32 2.0, %v1464_v26  ;;  %1479 = vpow2.f32 %v873_v11  ;;  %v2146_v43 = vadd.f32 %v670_v42, %v2041_v28  ;;  %1162 = vst [vmem:[%s1913_s17 + $0xc8] sm:$0xff] %v1130_v1  ;;  %v665_v14 = vadd.f32 %v1689_v5, %v2268_v51 }
 0x13f   : > { %v1468_v25 = vpop.eup %1467  ;;  %v1113_v36 = vsel %vm1081_vm4, %v1979_v8, %v1049_v53  ;;  %v894_v24 = vadd.f32 2.0, %v1466_v32  ;;  %v2153_v45 = vadd.f32 %v750_v18, %v2064_v20  ;;  %vm1084_vm6 = vcmp.gt.f32.partialorder %v2020_v30, 20.0 }
 0x140   : > { %1145 = vst [vmem:[%s1913_s17 + $0x40] sm:$0xff] %v1113_v36  ;;  %v939_v4 = vmul.f32 %v1464_v26, %v907_v47  ;;  %v910_v2 = vadd.f32 2.0, %v1468_v25  ;;  %v800_v28 = vmin.f32 %v2146_v43, 20.0  ;;  %v969_v63 = vmul.f32 %v2097_v19, %v2014_v50 }
 0x141   : > { %v926_v52 = vmul.f32 %v1466_v32, %v894_v24  ;;  %v816_v8 = vmin.f32 %v2153_v45, 20.0  ;;  %v2164_v17 = vadd.f32 %v665_v14, %v2075_v27  ;;  %v956_v5 = vmul.f32 %v2102_v61, %v2020_v30 }
 0x142   : > { %v1470_v20 = vpop.eup %1469  ;;  %vm1100_vm7 = vcmp.gt.f32.partialorder %v2027_v6, 20.0  ;;  %v1003_v0 = vadd.f32 2.0, %v939_v4  ;;  %v942_v22 = vmul.f32 %v1468_v25, %v910_v2  ;;  %v972_v33 = vmul.f32 %v940_v54, %v2027_v6 }
 0x143   : > { %v1472_v16 = vpop.eup %1471  ;;  %v1065_v12 = vmul.f32 %v1470_v20, %v969_v63  ;;  %v990_v19 = vadd.f32 2.0, %v926_v52  ;;  %v847_v13 = vmul.f32 1.442695, %v800_v28  ;;  %v879_v62 = vmul.f32 1.442695, %v816_v8 }
 0x144   : > { %v1474_v34 = vpop.eup %1473  ;;  %v1052_v55 = vmul.f32 %v1472_v16, %v956_v5  ;;  %1481 = vrcp.f32 %v1003_v0  ;;  %v1006_v27 = vadd.f32 2.0, %v942_v22  ;;  %v799_v60 = vmin.f32 %v2164_v17, 20.0 }
 0x145   : > { %v1476_v56 = vpop.eup %1475  ;;  %v1129_v61 = vsel %vm1097_vm5, %v2014_v50, %v1065_v12  ;;  %1483 = vrcp.f32 %v990_v19  ;;  %v893_v40 = vadd.f32 2.0, %v1474_v34  ;;  %v955_v21 = vmul.f32 %v2121_v31, %v2045_v37 }
 0x146   : > { %1161 = vst [vmem:[%s1913_s17 + $0xc0] sm:$0xff] %v1129_v61  ;;  %v1116_v54 = vsel %vm1084_vm6, %v2020_v30, %v1052_v55  ;;  %v1068_v57 = vmul.f32 %v1476_v56, %v972_v33  ;;  %1485 = vrcp.f32 %v1006_v27  ;;  %v845_v50 = vmul.f32 1.442695, %v799_v60 }
 0x147   : > { %v1478_v48 = vpop.eup %1477  ;;  %1148 = vst [vmem:[%s1913_s17 + $0x58] sm:$0xff] %v1116_v54  ;;  %v925_v58 = vmul.f32 %v1474_v34, %v893_v40  ;;  %1487 = vpow2.f32 %v847_v13  ;;  %v745_v35 = vadd.f32 %v1507_v7, %v2269_v41  ;;  %vm1083_vm8 = vcmp.gt.f32.partialorder %v2045_v37, 20.0 }
 0x148   : > { %v1480_v49 = vpop.eup %1479  ;;  %v1132_v30 = vsel %vm1100_vm7, %v2027_v6, %v1068_v57  ;;  %v1051_v3 = vmul.f32 %v1478_v48, %v955_v21  ;;  %1489 = vpow2.f32 %v879_v62  ;;  %v971_v6 = vmul.f32 %v939_v4, %v2058_v23 }
 0x149   : > { %1164 = vst [vmem:[%s1913_s17 + $0xd8] sm:$0xff] %v1132_v30  ;;  %v989_v31 = vadd.f32 2.0, %v925_v58  ;;  %v909_v44 = vadd.f32 2.0, %v1480_v49  ;;  %1491 = vpow2.f32 %v845_v50  ;;  %v2192_v46 = vadd.f32 %v745_v35, %v2082_v29 }
 0x14a   : > { %v1115_v11 = vsel %vm1083_vm8, %v2045_v37, %v1051_v3  ;;  %v958_v59 = vmul.f32 %v926_v52, %v2061_v10  ;;  %v974_v37 = vmul.f32 %v942_v22, %v2072_v39  ;;  %vm1099_vm9 = vcmp.gt.f32.partialorder %v2058_v23, 20.0 }
 0x14b   : > { %1147 = vst [vmem:[%s1913_s17 + $0x50] sm:$0xff] %v1115_v11  ;;  %1493 = vrcp.f32 %v989_v31  ;;  %v941_v42 = vmul.f32 %v1480_v49, %v909_v44  ;;  %v815_v26 = vmin.f32 %v2192_v46, 20.0  ;;  %vm1086_vm10 = vcmp.gt.f32.partialorder %v2061_v10, 20.0 }
 0x14c   : > { %vm1102_vm11 = vcmp.gt.f32.partialorder %v2072_v39, 20.0  ;;  %v957_v52 = vmul.f32 %v925_v58, %v2100_v15  ;;  %vm1085_vm12 = vcmp.gt.f32.partialorder %v2100_v15, 20.0  ;;  %vm1101_vm13 = vcmp.gt.f32.partialorder %v2117_v38, 20.0 }
 0x14d   : > { %v1005_v9 = vadd.f32 2.0, %v941_v42  ;;  %v877_v18 = vmul.f32 1.442695, %v815_v26  ;;  %vm1088_vm14 = vcmp.gt.f32.partialorder %v2146_v43, 20.0  ;;  %vm1104_vm15 = vcmp.gt.f32.partialorder %v2153_v45, 20.0 }
 0x14e   : > { %v1482_v53 = vpop.eup %1481  ;;  %vm1087_vm0 = vcmp.gt.f32.partialorder %v2164_v17, 20.0  ;;  %vm1103_vm1 = vcmp.gt.f32.partialorder %v2192_v46, 20.0 }
 0x14f   : > { %v1484_v32 = vpop.eup %1483  ;;  %v1067_v1 = vmul.f32 %v1482_v53, %v971_v6  ;;  %1495 = vrcp.f32 %v1005_v9 }
 0x150   : > { %v1486_v29 = vpop.eup %1485  ;;  %v1054_v47 = vmul.f32 %v1484_v32, %v958_v59  ;;  %1497 = vpow2.f32 %v877_v18 }
 0x151   : > { %v1488_v25 = vpop.eup %1487  ;;  %v1131_v36 = vsel %vm1099_vm9, %v2058_v23, %v1067_v1  ;;  %v1070_v24 = vmul.f32 %v1486_v29, %v974_v37 }
 0x152   : > { %v1490_v51 = vpop.eup %1489  ;;  %1163 = vst [vmem:[%s1913_s17 + $0xd0] sm:$0xff] %v1131_v36  ;;  %v1118_v14 = vsel %vm1086_vm10, %v2061_v10, %v1054_v47  ;;  %v896_v4 = vadd.f32 2.0, %v1488_v25 }
 0x153   : > { %v1492_v2 = vpop.eup %1491  ;;  %1150 = vst [vmem:[%s1913_s17 + $0x68] sm:$0xff] %v1118_v14  ;;  %v1134_v28 = vsel %vm1102_vm11, %v2072_v39, %v1070_v24  ;;  %v912_v63 = vadd.f32 2.0, %v1490_v51  ;;  %v973_v39 = vmul.f32 %v941_v42, %v2117_v38 }
 0x154   : > { %1166 = vst [vmem:[%s1913_s17 + $0xe8] sm:$0xff] %v1134_v28  ;;  %v928_v23 = vmul.f32 %v1488_v25, %v896_v4  ;;  %v895_v8 = vadd.f32 2.0, %v1492_v2 }
 0x155   : > { %v1494_v20 = vpop.eup %1493  ;;  %v944_v5 = vmul.f32 %v1490_v51, %v912_v63 }
 0x156   : > { %v1053_v0 = vmul.f32 %v1494_v20, %v957_v52  ;;  %v992_v22 = vadd.f32 2.0, %v928_v23  ;;  %v927_v16 = vmul.f32 %v1492_v2, %v895_v8 }
 0x157   : > { %v1008_v10 = vadd.f32 2.0, %v944_v5  ;;  %v976_v40 = vmul.f32 %v944_v5, %v2153_v45 }
 0x158   : > { %v1117_v12 = vsel %vm1085_vm12, %v2100_v15, %v1053_v0  ;;  %1499 = vrcp.f32 %v992_v22  ;;  %v991_v33 = vadd.f32 2.0, %v927_v16  ;;  %v960_v15 = vmul.f32 %v928_v23, %v2146_v43 }
 0x159   : > { %v1496_v19 = vpop.eup %1495  ;;  %1149 = vst [vmem:[%s1913_s17 + $0x60] sm:$0xff] %v1117_v12  ;;  %1501 = vrcp.f32 %v1008_v10  ;;  %v959_v57 = vmul.f32 %v927_v16, %v2164_v17 }
 0x15a   : > { %v1498_v13 = vpop.eup %1497  ;;  %v1069_v34 = vmul.f32 %v1496_v19, %v973_v39  ;;  %1503 = vrcp.f32 %v991_v33 }
 0x15b   : > { %v911_v55 = vadd.f32 2.0, %v1498_v13 }
 0x15c   : > { %v1133_v27 = vsel %vm1101_vm13, %v2117_v38, %v1069_v34 }
 0x15d   : > { %1165 = vst [vmem:[%s1913_s17 + $0xe0] sm:$0xff] %v1133_v27  ;;  %v943_v62 = vmul.f32 %v1498_v13, %v911_v55 }
 0x15f   : > { %v1007_v56 = vadd.f32 2.0, %v943_v62  ;;  %v975_v41 = vmul.f32 %v943_v62, %v2192_v46 }
 0x161   : > { %1505 = vrcp.f32 %v1007_v56 }
 0x162   : > { %v1500_v61 = vpop.eup %1499 }
 0x163   : > { %v1502_v60 = vpop.eup %1501  ;;  %v1056_v54 = vmul.f32 %v1500_v61, %v960_v15 }
 0x164   : > { %v1504_v21 = vpop.eup %1503  ;;  %v1072_v38 = vmul.f32 %v1502_v60, %v976_v40 }
 0x165   : > { %v1120_v48 = vsel %vm1088_vm14, %v2146_v43, %v1056_v54  ;;  %v1055_v58 = vmul.f32 %v1504_v21, %v959_v57 }
 0x166   : > { %1152 = vst [vmem:[%s1913_s17 + $0x78] sm:$0xff] %v1120_v48  ;;  %v1136_v50 = vsel %vm1104_vm15, %v2153_v45, %v1072_v38 }
 0x167   : > { %1168 = vst [vmem:[%s1913_s17 + $0xf8] sm:$0xff] %v1136_v50  ;;  %v1119_v7 = vsel %vm1087_vm0, %v2164_v17, %v1055_v58 }
 0x168   : > { %1151 = vst [vmem:[%s1913_s17 + $0x70] sm:$0xff] %v1119_v7 }
 0x16b   : > { %v1506_v35 = vpop.eup %1505 }
 0x16c   : > { %v1071_v49 = vmul.f32 %v1506_v35, %v975_v41 }
 0x16e   : > { %v1135_v43 = vsel %vm1103_vm1, %v2192_v46, %v1071_v49 }
 0x16f   : > { %1167 = vst [vmem:[%s1913_s17 + $0xf0] sm:$0xff] %v1135_v43 }
 0x170 PF: > { %s16_s21 = sadd.s32 1, %s1514_s21  }
 0x171   : > { %p13_p4 = scmp.ge.s32.totalorder %s16_s21, 4  }
 0x173   :  { %15 = sbr.rel (!%p13_p4) target bundleno = 1 (0x1), region = 77 }

</bundles_post_ra>
